<compile_context>
chip_gen: v5e
topology: v5e:2x2
jax: 0.10.0
libtpu: 0.0.40
codegen_flags: <defaults>
</compile_context>

<pallas_src>
import functools

import jax
import jax.numpy as jnp
from jax import lax
from jax.experimental import pallas as pl
from jax.experimental.pallas import tpu as pltpu


NEG_SLOPE = 0.2
BN_EPS = 1e-5
_VMEM_LIMIT_BYTES = 32 * 1024 * 1024  # explicit scoped-VMEM budget (all gens)


def _round_up(x, m):
    return (x + m - 1) // m * m


def _pick_m_tiling(m):
    """Padded M and M-tile size (tile multiple of 8, <=256)."""
    if m <= 256:
        mp = _round_up(m, 8)
        return mp, mp
    mp = _round_up(m, 256)
    return mp, 256


def _pick_k_tile(kp):
    return 512 if (kp % 512 == 0 and kp > 512) else kp


# ----------------------------------------------------------------------------
# Kernel 1: tiled matmul + bias (+ optional LeakyReLU)  -- conv1 / conv5
# ----------------------------------------------------------------------------
def _matmul_bias_act_kernel(x_ref, w_ref, b_ref, o_ref, acc_ref, *, lrelu):
    ki = pl.program_id(1)

    @pl.when(ki == 0)
    def _():
        acc_ref[...] = jnp.zeros_like(acc_ref)

    acc_ref[...] += jnp.dot(x_ref[...], w_ref[...],
                            preferred_element_type=jnp.float32)

    @pl.when(ki == pl.num_programs(1) - 1)
    def _():
        y = acc_ref[...] + b_ref[...]
        if lrelu:
            y = jnp.where(y >= 0.0, y, NEG_SLOPE * y)
        o_ref[...] = y


def _matmul_bias_act(patches, w2d, bias_row, *, lrelu):
    """patches: [Mp, Kp] bf16, w2d: [Kp, C] bf16, bias_row: [1, C] f32."""
    mp, kp = patches.shape
    _, c = w2d.shape
    _, tm = _pick_m_tiling(mp)
    tk = _pick_k_tile(kp)
    grid = (mp // tm, kp // tk)
    return pl.pallas_call(
        functools.partial(_matmul_bias_act_kernel, lrelu=lrelu),
        out_shape=jax.ShapeDtypeStruct((mp, c), jnp.float32),
        grid_spec=pltpu.PrefetchScalarGridSpec(
            num_scalar_prefetch=0,
            grid=grid,
            in_specs=[
                pl.BlockSpec((tm, tk), lambda mi, ki: (mi, ki)),
                pl.BlockSpec((tk, c), lambda mi, ki: (ki, 0)),
                pl.BlockSpec((1, c), lambda mi, ki: (0, 0)),
            ],
            out_specs=pl.BlockSpec((tm, c), lambda mi, ki: (mi, 0)),
            scratch_shapes=[pltpu.VMEM((tm, c), jnp.float32)],
        ),
        compiler_params=pltpu.CompilerParams(
            dimension_semantics=("parallel", "arbitrary"),
            vmem_limit_bytes=_VMEM_LIMIT_BYTES,
        ),
    )(patches, w2d, bias_row)


# ----------------------------------------------------------------------------
# Kernel 2: fused conv-matmul + train-mode BatchNorm + LeakyReLU  -- conv2..4
# Output block [Mp, C] stays resident in VMEM for the whole grid; stats are
# accumulated in scratch and the normalization is applied in an epilogue on
# the last grid step (no HBM round-trip of the conv output).
# ----------------------------------------------------------------------------
def _conv_bn_lrelu_kernel(x_ref, w_ref, g_ref, b_ref, o_ref,
                          acc_ref, sum_ref, ssq_ref, *,
                          m_true, tm, n_m_tiles):
    mi = pl.program_id(0)
    ki = pl.program_id(1)
    nk = pl.num_programs(1)

    @pl.when(ki == 0)
    def _():
        acc_ref[...] = jnp.zeros_like(acc_ref)

    @pl.when((mi == 0) & (ki == 0))
    def _():
        sum_ref[...] = jnp.zeros_like(sum_ref)
        ssq_ref[...] = jnp.zeros_like(ssq_ref)

    acc_ref[...] += jnp.dot(x_ref[...], w_ref[...],
                            preferred_element_type=jnp.float32)

    @pl.when(ki == nk - 1)
    def _():
        y = acc_ref[...]                     # raw conv tile (no bias: BN cancels it)
        row = pl.multiple_of(mi * tm, 8)
        o_ref[pl.ds(row, tm), :] = y
        sum_ref[...] += jnp.sum(y, axis=0, keepdims=True)
        ssq_ref[...] += jnp.sum(y * y, axis=0, keepdims=True)

    @pl.when((mi == pl.num_programs(0) - 1) & (ki == nk - 1))
    def _():
        # Padded M rows are all-zero conv outputs -> contribute 0 to sum/ssq,
        # so dividing by the true M gives exact batch statistics.
        inv_m = 1.0 / float(m_true)
        mean = sum_ref[...] * inv_m
        var = jnp.maximum(ssq_ref[...] * inv_m - mean * mean, 0.0)
        scale = g_ref[...] * lax.rsqrt(var + BN_EPS)
        shift = b_ref[...] - mean * scale

        def body(i, carry):
            r = pl.multiple_of(i * tm, 8)
            z = o_ref[pl.ds(r, tm), :] * scale + shift
            o_ref[pl.ds(r, tm), :] = jnp.where(z >= 0.0, z, NEG_SLOPE * z)
            return carry

        lax.fori_loop(0, n_m_tiles, body, 0)


def _conv_bn_lrelu_call(patches, w2d, gamma_row, beta_row, *, m_true):
    mp, kp = patches.shape
    _, c = w2d.shape
    _, tm = _pick_m_tiling(mp)
    tk = _pick_k_tile(kp)
    n_m = mp // tm
    grid = (n_m, kp // tk)
    return pl.pallas_call(
        functools.partial(_conv_bn_lrelu_kernel,
                          m_true=m_true, tm=tm, n_m_tiles=n_m),
        out_shape=jax.ShapeDtypeStruct((mp, c), jnp.float32),
        grid_spec=pltpu.PrefetchScalarGridSpec(
            num_scalar_prefetch=0,
            grid=grid,
            in_specs=[
                pl.BlockSpec((tm, tk), lambda mi, ki: (mi, ki)),
                pl.BlockSpec((tk, c), lambda mi, ki: (ki, 0)),
                pl.BlockSpec((1, c), lambda mi, ki: (0, 0)),
                pl.BlockSpec((1, c), lambda mi, ki: (0, 0)),
            ],
            # Constant index map -> output resident in VMEM across the grid,
            # written back to HBM once (after the BN epilogue).
            out_specs=pl.BlockSpec((mp, c), lambda mi, ki: (0, 0)),
            scratch_shapes=[
                pltpu.VMEM((tm, c), jnp.float32),   # matmul accumulator
                pltpu.VMEM((1, c), jnp.float32),    # per-channel sum
                pltpu.VMEM((1, c), jnp.float32),    # per-channel sum of squares
            ],
        ),
        compiler_params=pltpu.CompilerParams(
            # M axis must be 'arbitrary': batch statistics accumulate in
            # per-core scratch, so it cannot be split across TensorCores.
            dimension_semantics=("arbitrary", "arbitrary"),
            vmem_limit_bytes=_VMEM_LIMIT_BYTES,
        ),
    )(patches, w2d, gamma_row, beta_row)


# ----------------------------------------------------------------------------
# Plain-JAX glue: channel-last im2col, padding to TPU-friendly shapes
# ----------------------------------------------------------------------------
def _im2col_nhwc(x, ksize, stride, pad_hw):
    """x: [N, H, W, C] -> ([N*OH*OW, KH*KW*C], OH, OW); column order (kh, kw, c)."""
    (pt, pb), (plft, prgt) = pad_hw
    x = jnp.pad(x, ((0, 0), (pt, pb), (plft, prgt), (0, 0)))
    n, hp, wp, _ = x.shape
    oh = (hp - ksize) // stride + 1
    ow = (wp - ksize) // stride + 1
    cols = []
    for i in range(ksize):
        for j in range(ksize):
            cols.append(x[:, i:i + (oh - 1) * stride + 1:stride,
                          j:j + (ow - 1) * stride + 1:stride, :])
    patches = jnp.concatenate(cols, axis=-1)            # [N, OH, OW, k*k*C]
    return patches.reshape(n * oh * ow, -1), oh, ow


def _weight_to_kc(w):
    """PyTorch [Cout, Cin, KH, KW] -> [KH*KW*Cin, Cout] matching (kh, kw, c) patches."""
    cout = w.shape[0]
    return jnp.transpose(w, (2, 3, 1, 0)).reshape(-1, cout)


def conv_lrelu(x, w, b, *, stride, pad_hw, lrelu, cout_pad=None):
    """Conv(k=4) + bias (+ LeakyReLU). x is NHWC; returns NHWC."""
    n = x.shape[0]
    patches, oh, ow = _im2col_nhwc(x, 4, stride, pad_hw)
    m, k = patches.shape
    mp, _ = _pick_m_tiling(m)
    kp = _round_up(k, 128)
    patches = jnp.pad(patches, ((0, mp - m), (0, kp - k))).astype(jnp.bfloat16)

    w2d = _weight_to_kc(w)
    cout = w2d.shape[1]
    cp = cout if cout_pad is None else max(cout_pad, cout)
    w2d = jnp.pad(w2d, ((0, kp - k), (0, cp - cout))).astype(jnp.bfloat16)
    brow = jnp.pad(b.reshape(1, -1), ((0, 0), (0, cp - cout))).astype(jnp.float32)

    y = _matmul_bias_act(patches, w2d, brow, lrelu=lrelu)
    return y[:m, :cout].reshape(n, oh, ow, cout)


def conv_bn_lrelu(x, w, gamma, beta, *, stride, pad_hw):
    """Conv(k=4, no bias) + BatchNorm(train) + LeakyReLU, fused in one kernel."""
    n = x.shape[0]
    patches, oh, ow = _im2col_nhwc(x, 4, stride, pad_hw)
    m, k = patches.shape
    mp, _ = _pick_m_tiling(m)
    kp = _round_up(k, 128)
    patches = jnp.pad(patches, ((0, mp - m), (0, kp - k))).astype(jnp.bfloat16)

    w2d = jnp.pad(_weight_to_kc(w), ((0, kp - k), (0, 0))).astype(jnp.bfloat16)
    cout = w.shape[0]
    y = _conv_bn_lrelu_call(
        patches, w2d,
        gamma.reshape(1, -1).astype(jnp.float32),
        beta.reshape(1, -1).astype(jnp.float32),
        m_true=m)
    return y[:m].reshape(n, oh, ow, cout)


# ----------------------------------------------------------------------------
# Parameter init (deterministic, PyTorch-default-style uniform for convs)
# ----------------------------------------------------------------------------
def init_params(key):
    def conv_init(k, c_out, c_in, ksize):
        k1, k2 = jax.random.split(k)
        fan_in = c_in * ksize * ksize
        bound = 1.0 / (fan_in ** 0.5)
        w = jax.random.uniform(k1, (c_out, c_in, ksize, ksize), jnp.float32, -bound, bound)
        b = jax.random.uniform(k2, (c_out,), jnp.float32, -bound, bound)
        return w, b

    keys = jax.random.split(key, 5)
    return {
        "conv1": conv_init(keys[0], 64, 2, 4),
        "conv2": conv_init(keys[1], 128, 64, 4),   # bias unused (cancelled by BN)
        "conv3": conv_init(keys[2], 256, 128, 4),  # bias unused (cancelled by BN)
        "conv4": conv_init(keys[3], 512, 256, 4),  # bias unused (cancelled by BN)
        "conv5": conv_init(keys[4], 1, 512, 4),
        "bn2": (jnp.ones((128,), jnp.float32), jnp.zeros((128,), jnp.float32)),
        "bn3": (jnp.ones((256,), jnp.float32), jnp.zeros((256,), jnp.float32)),
        "bn4": (jnp.ones((512,), jnp.float32), jnp.zeros((512,), jnp.float32)),
    }


# ----------------------------------------------------------------------------
# Forward pass (mirrors Discriminator.forward, train-mode BatchNorm)
# ----------------------------------------------------------------------------
@jax.jit
def discriminator_forward(params, img_a, img_b):
    x = jnp.concatenate([img_a, img_b], axis=1)      # [N, 2, H, W] (NCHW input)
    x = jnp.transpose(x, (0, 2, 3, 1))               # -> NHWC once; stay NHWC

    # block 1: Conv(2->64, k4 s2 p1) + LeakyReLU(0.2) (fused, no norm)
    w, b = params["conv1"]
    x = conv_lrelu(x, w, b, stride=2, pad_hw=((1, 1), (1, 1)), lrelu=True)

    # blocks 2-4: Conv (no bias) + BatchNorm(train) + LeakyReLU, one kernel each
    for idx in (2, 3, 4):
        w, _unused_bias = params[f"conv{idx}"]
        gamma, beta = params[f"bn{idx}"]
        x = conv_bn_lrelu(x, w, gamma, beta, stride=2, pad_hw=((1, 1), (1, 1)))

    # ZeroPad2d((left=1,right=0,top=1,bottom=0)) folded into conv5's padding=1,
    # conv5 Cout padded 1 -> 128 for lane-dense stores (sliced back afterwards).
    w, b = params["conv5"]
    y = conv_lrelu(x, w, b, stride=1, pad_hw=((2, 1), (2, 1)), lrelu=False,
                   cout_pad=128)
    return jnp.transpose(y, (0, 3, 1, 2))            # back to NCHW like PyTorch


if __name__ == "__main__":
    key = jax.random.PRNGKey(0)
    k_params, k_a, k_b = jax.random.split(key, 3)

    params = init_params(k_params)
    # in_channels=2 total -> each image contributes 1 channel
    img_a = jax.random.normal(k_a, (2, 1, 16, 16), jnp.float32)
    img_b = jax.random.normal(k_b, (2, 1, 16, 16), jnp.float32)

    out = discriminator_forward(params, img_a, img_b)
    out = jax.block_until_ready(out)
    assert out.shape == (2, 1, 1, 1), out.shape
    assert out.dtype == jnp.float32
    print("KERNEL_OK")
</pallas_src>

<mosaic_0001>
module attributes {stable_mosaic.version = 11 : i64} {
  func.func @_matmul_bias_act_kernel(%arg0: i32, %arg1: i32, %arg2: memref<128x128xbf16, #tpu.memory_space<vmem>>, %arg3: memref<128x64xbf16, #tpu.memory_space<vmem>>, %arg4: memref<1x64xf32, #tpu.memory_space<vmem>>, %arg5: memref<128x64xf32, #tpu.memory_space<vmem>>, %arg6: memref<128x64xf32, #tpu.memory_space<vmem>>) attributes {dimension_semantics = [#tpu.dimension_semantics<parallel>, #tpu.dimension_semantics<arbitrary>], iteration_bounds = array<i64: 1, 1>, scalar_prefetch = 0 : i64, scratch_operands = 1 : i64, tpu.core_type = #tpu.core_type<tc>, window_params = [{transform_indices = @transform_0, window_bounds = array<i64: 128, 128>}, {transform_indices = @transform_1, window_bounds = array<i64: 128, 64>}, {pipeline_mode = #tpu.pipeline_mode<synchronous>, transform_indices = @transform_2, window_bounds = array<i64: 1, 64>}, {transform_indices = @transform_3, window_bounds = array<i64: 128, 64>}]} {
    %c0_i32 = arith.constant 0 : i32
    %0 = arith.cmpi eq, %arg1, %c0_i32 : i32
    %1 = arith.extui %0 : i1 to i32
    %c0_i32_0 = arith.constant 0 : i32
    %2 = arith.cmpi ne, %1, %c0_i32_0 : i32
    scf.if %2 {
      %cst_10 = arith.constant 0.000000e+00 : f32
      %12 = vector.broadcast %cst_10 : f32 to vector<128x64xf32>
      %c0_11 = arith.constant 0 : index
      %c0_12 = arith.constant 0 : index
      %13 = vector.load %arg6[%c0_11, %c0_12] : memref<128x64xf32, #tpu.memory_space<vmem>>, vector<128x64xf32>
      tpu.vector_store %arg6[%c0_11, %c0_12], %12 {strides = array<i32>} : memref<128x64xf32, #tpu.memory_space<vmem>>, vector<128x64xf32>,
    } else {
    }
    %c0 = arith.constant 0 : index
    %c0_1 = arith.constant 0 : index
    %3 = vector.load %arg6[%c0, %c0_1] : memref<128x64xf32, #tpu.memory_space<vmem>>, vector<128x64xf32>
    %c0_2 = arith.constant 0 : index
    %c0_3 = arith.constant 0 : index
    %4 = vector.load %arg2[%c0_2, %c0_3] : memref<128x128xbf16, #tpu.memory_space<vmem>>, vector<128x128xbf16>
    %c0_4 = arith.constant 0 : index
    %c0_5 = arith.constant 0 : index
    %5 = vector.load %arg3[%c0_4, %c0_5] : memref<128x64xbf16, #tpu.memory_space<vmem>>, vector<128x64xbf16>
    %cst = arith.constant dense<0.000000e+00> : vector<128x64xf32>
    %6 = tpu.matmul %4, %5, %cst {dimension_numbers = #tpu.dot_dimension_numbers<[1], [0], [0], [1], [0, 0, 1, 1], [], []>} : vector<128x128xbf16>, vector<128x64xbf16>, vector<128x64xf32> -> vector<128x64xf32>
    %7 = arith.addf %3, %6 : vector<128x64xf32>
    %c0_6 = arith.constant 0 : index
    %c0_7 = arith.constant 0 : index
    %8 = vector.load %arg6[%c0_6, %c0_7] : memref<128x64xf32, #tpu.memory_space<vmem>>, vector<128x64xf32>
    tpu.vector_store %arg6[%c0_6, %c0_7], %7 {strides = array<i32>} : memref<128x64xf32, #tpu.memory_space<vmem>>, vector<128x64xf32>,
    %c0_i32_8 = arith.constant 0 : i32
    %9 = arith.cmpi eq, %arg1, %c0_i32_8 : i32
    %10 = arith.extui %9 : i1 to i32
    %c0_i32_9 = arith.constant 0 : i32
    %11 = arith.cmpi ne, %10, %c0_i32_9 : i32
    scf.if %11 {
      %c0_10 = arith.constant 0 : index
      %c0_11 = arith.constant 0 : index
      %12 = vector.load %arg6[%c0_10, %c0_11] : memref<128x64xf32, #tpu.memory_space<vmem>>, vector<128x64xf32>
      %c0_12 = arith.constant 0 : index
      %c0_13 = arith.constant 0 : index
      %13 = vector.load %arg4[%c0_12, %c0_13] : memref<1x64xf32, #tpu.memory_space<vmem>>, vector<1x64xf32>
      %14 = vector.broadcast %13 : vector<1x64xf32> to vector<128x64xf32>
      %15 = arith.addf %12, %14 : vector<128x64xf32>
      %cst_14 = arith.constant 0.000000e+00 : f32
      %16 = vector.broadcast %cst_14 : f32 to vector<128x64xf32>
      %17 = arith.cmpf oge, %15, %16 : vector<128x64xf32>
      %cst_15 = arith.constant 2.000000e-01 : f32
      %18 = vector.broadcast %cst_15 : f32 to vector<128x64xf32>
      %19 = arith.mulf %18, %15 : vector<128x64xf32>
      %20 = arith.select %17, %15, %19 : vector<128x64xi1>, vector<128x64xf32>
      %c0_16 = arith.constant 0 : index
      %c0_17 = arith.constant 0 : index
      %21 = vector.load %arg5[%c0_16, %c0_17] : memref<128x64xf32, #tpu.memory_space<vmem>>, vector<128x64xf32>
      tpu.vector_store %arg5[%c0_16, %c0_17], %20 {strides = array<i32>} : memref<128x64xf32, #tpu.memory_space<vmem>>, vector<128x64xf32>,
    } else {
    }
    return
  }
  func.func @transform_0(%arg0: i32, %arg1: i32) -> (i32, i32) {
    %c0_i32 = arith.constant 0 : i32
    return %arg0, %arg1 : i32, i32
  }
  func.func @transform_1(%arg0: i32, %arg1: i32) -> (i32, i32) {
    %c0_i32 = arith.constant 0 : i32
    %c0_i32_0 = arith.constant 0 : i32
    return %arg1, %c0_i32 : i32, i32
  }
  func.func @transform_2(%arg0: i32, %arg1: i32) -> (i32, i32) {
    %c0_i32 = arith.constant 0 : i32
    %c0_i32_0 = arith.constant 0 : i32
    %c0_i32_1 = arith.constant 0 : i32
    return %c0_i32, %c0_i32_0 : i32, i32
  }
  func.func @transform_3(%arg0: i32, %arg1: i32) -> (i32, i32) {
    %c0_i32 = arith.constant 0 : i32
    %c0_i32_0 = arith.constant 0 : i32
    return %arg0, %c0_i32 : i32, i32
  }
}

module attributes {stable_mosaic.version = 11 : i64} {
  func.func @_conv_bn_lrelu_kernel(%arg0: i32, %arg1: i32, %arg2: memref<32x512xbf16, #tpu.memory_space<vmem>>, %arg3: memref<512x128xbf16, #tpu.memory_space<vmem>>, %arg4: memref<1x128xf32, #tpu.memory_space<vmem>>, %arg5: memref<1x128xf32, #tpu.memory_space<vmem>>, %arg6: memref<32x128xf32, #tpu.memory_space<vmem>>, %arg7: memref<32x128xf32, #tpu.memory_space<vmem>>, %arg8: memref<1x128xf32, #tpu.memory_space<vmem>>, %arg9: memref<1x128xf32, #tpu.memory_space<vmem>>) attributes {dimension_semantics = [#tpu.dimension_semantics<arbitrary>, #tpu.dimension_semantics<arbitrary>], iteration_bounds = array<i64: 1, 2>, scalar_prefetch = 0 : i64, scratch_operands = 3 : i64, tpu.core_type = #tpu.core_type<tc>, window_params = [{transform_indices = @transform_0, window_bounds = array<i64: 32, 512>}, {transform_indices = @transform_1, window_bounds = array<i64: 512, 128>}, {pipeline_mode = #tpu.pipeline_mode<synchronous>, transform_indices = @transform_2, window_bounds = array<i64: 1, 128>}, {pipeline_mode = #tpu.pipeline_mode<synchronous>, transform_indices = @transform_3, window_bounds = array<i64: 1, 128>}, {pipeline_mode = #tpu.pipeline_mode<synchronous>, transform_indices = @transform_4, window_bounds = array<i64: 32, 128>}]} {
    %c0_i32 = arith.constant 0 : i32
    %0 = arith.cmpi eq, %arg1, %c0_i32 : i32
    %1 = arith.extui %0 : i1 to i32
    %c0_i32_0 = arith.constant 0 : i32
    %2 = arith.cmpi ne, %1, %c0_i32_0 : i32
    scf.if %2 {
      %cst_15 = arith.constant 0.000000e+00 : f32
      %22 = vector.broadcast %cst_15 : f32 to vector<32x128xf32>
      %c0_16 = arith.constant 0 : index
      %c0_17 = arith.constant 0 : index
      %23 = vector.load %arg7[%c0_16, %c0_17] : memref<32x128xf32, #tpu.memory_space<vmem>>, vector<32x128xf32>
      tpu.vector_store %arg7[%c0_16, %c0_17], %22 {strides = array<i32>} : memref<32x128xf32, #tpu.memory_space<vmem>>, vector<32x128xf32>,
    } else {
    }
    %c0_i32_1 = arith.constant 0 : i32
    %3 = arith.cmpi eq, %arg0, %c0_i32_1 : i32
    %c0_i32_2 = arith.constant 0 : i32
    %4 = arith.cmpi eq, %arg1, %c0_i32_2 : i32
    %5 = arith.andi %3, %4 : i1
    %6 = arith.extui %5 : i1 to i32
    %c0_i32_3 = arith.constant 0 : i32
    %7 = arith.cmpi ne, %6, %c0_i32_3 : i32
    scf.if %7 {
      %cst_15 = arith.constant 0.000000e+00 : f32
      %22 = vector.broadcast %cst_15 : f32 to vector<1x128xf32>
      %c0_16 = arith.constant 0 : index
      %c0_17 = arith.constant 0 : index
      %23 = vector.load %arg8[%c0_16, %c0_17] : memref<1x128xf32, #tpu.memory_space<vmem>>, vector<1x128xf32>
      tpu.vector_store %arg8[%c0_16, %c0_17], %22 {strides = array<i32>} : memref<1x128xf32, #tpu.memory_space<vmem>>, vector<1x128xf32>,
      %cst_18 = arith.constant 0.000000e+00 : f32
      %24 = vector.broadcast %cst_18 : f32 to vector<1x128xf32>
      %c0_19 = arith.constant 0 : index
      %c0_20 = arith.constant 0 : index
      %25 = vector.load %arg9[%c0_19, %c0_20] : memref<1x128xf32, #tpu.memory_space<vmem>>, vector<1x128xf32>
      tpu.vector_store %arg9[%c0_19, %c0_20], %24 {strides = array<i32>} : memref<1x128xf32, #tpu.memory_space<vmem>>, vector<1x128xf32>,
    } else {
    }
    %c0 = arith.constant 0 : index
    %c0_4 = arith.constant 0 : index
    %8 = vector.load %arg7[%c0, %c0_4] : memref<32x128xf32, #tpu.memory_space<vmem>>, vector<32x128xf32>
    %c0_5 = arith.constant 0 : index
    %c0_6 = arith.constant 0 : index
    %9 = vector.load %arg2[%c0_5, %c0_6] : memref<32x512xbf16, #tpu.memory_space<vmem>>, vector<32x512xbf16>
    %c0_7 = arith.constant 0 : index
    %c0_8 = arith.constant 0 : index
    %10 = vector.load %arg3[%c0_7, %c0_8] : memref<512x128xbf16, #tpu.memory_space<vmem>>, vector<512x128xbf16>
    %cst = arith.constant dense<0.000000e+00> : vector<32x128xf32>
    %11 = tpu.matmul %9, %10, %cst {dimension_numbers = #tpu.dot_dimension_numbers<[1], [0], [0], [1], [0, 0, 1, 1], [], []>} : vector<32x512xbf16>, vector<512x128xbf16>, vector<32x128xf32> -> vector<32x128xf32>
    %12 = arith.addf %8, %11 : vector<32x128xf32>
    %c0_9 = arith.constant 0 : index
    %c0_10 = arith.constant 0 : index
    %13 = vector.load %arg7[%c0_9, %c0_10] : memref<32x128xf32, #tpu.memory_space<vmem>>, vector<32x128xf32>
    tpu.vector_store %arg7[%c0_9, %c0_10], %12 {strides = array<i32>} : memref<32x128xf32, #tpu.memory_space<vmem>>, vector<32x128xf32>,
    %c1_i32 = arith.constant 1 : i32
    %14 = arith.cmpi eq, %arg1, %c1_i32 : i32
    %15 = arith.extui %14 : i1 to i32
    %c0_i32_11 = arith.constant 0 : i32
    %16 = arith.cmpi ne, %15, %c0_i32_11 : i32
    scf.if %16 {
      %c0_15 = arith.constant 0 : index
      %c0_16 = arith.constant 0 : index
      %22 = vector.load %arg7[%c0_15, %c0_16] : memref<32x128xf32, #tpu.memory_space<vmem>>, vector<32x128xf32>
      %c32_i32 = arith.constant 32 : i32
      %23 = arith.muli %arg0, %c32_i32 : i32
      %24 = tpu.assume_multiple %23, 8 : i32
      %25 = arith.index_cast %24 : i32 to index
      %c0_17 = arith.constant 0 : index
      %26 = vector.load %arg6[%25, %c0_17] : memref<32x128xf32, #tpu.memory_space<vmem>>, vector<32x128xf32>
      tpu.vector_store %arg6[%25, %c0_17], %22 {strides = array<i32>} : memref<32x128xf32, #tpu.memory_space<vmem>>, vector<32x128xf32>,
      %c0_18 = arith.constant 0 : index
      %c0_19 = arith.constant 0 : index
      %27 = vector.load %arg8[%c0_18, %c0_19] : memref<1x128xf32, #tpu.memory_space<vmem>>, vector<1x128xf32>
      %cst_20 = arith.constant dense<0.000000e+00> : vector<128xf32>
      %28 = vector.multi_reduction <add>, %22, %cst_20 [0] : vector<32x128xf32> to vector<128xf32>
      %29 = vector.shape_cast %28 : vector<128xf32> to vector<1x128xf32>
      %30 = arith.addf %27, %29 : vector<1x128xf32>
      %c0_21 = arith.constant 0 : index
      %c0_22 = arith.constant 0 : index
      %31 = vector.load %arg8[%c0_21, %c0_22] : memref<1x128xf32, #tpu.memory_space<vmem>>, vector<1x128xf32>
      tpu.vector_store %arg8[%c0_21, %c0_22], %30 {strides = array<i32>} : memref<1x128xf32, #tpu.memory_space<vmem>>, vector<1x128xf32>,
      %c0_23 = arith.constant 0 : index
      %c0_24 = arith.constant 0 : index
      %32 = vector.load %arg9[%c0_23, %c0_24] : memref<1x128xf32, #tpu.memory_space<vmem>>, vector<1x128xf32>
      %33 = arith.mulf %22, %22 : vector<32x128xf32>
      %cst_25 = arith.constant dense<0.000000e+00> : vector<128xf32>
      %34 = vector.multi_reduction <add>, %33, %cst_25 [0] : vector<32x128xf32> to vector<128xf32>
      %35 = vector.shape_cast %34 : vector<128xf32> to vector<1x128xf32>
      %36 = arith.addf %32, %35 : vector<1x128xf32>
      %c0_26 = arith.constant 0 : index
      %c0_27 = arith.constant 0 : index
      %37 = vector.load %arg9[%c0_26, %c0_27] : memref<1x128xf32, #tpu.memory_space<vmem>>, vector<1x128xf32>
      tpu.vector_store %arg9[%c0_26, %c0_27], %36 {strides = array<i32>} : memref<1x128xf32, #tpu.memory_space<vmem>>, vector<1x128xf32>,
    } else {
    }
    %c0_i32_12 = arith.constant 0 : i32
    %17 = arith.cmpi eq, %arg0, %c0_i32_12 : i32
    %c1_i32_13 = arith.constant 1 : i32
    %18 = arith.cmpi eq, %arg1, %c1_i32_13 : i32
    %19 = arith.andi %17, %18 : i1
    %20 = arith.extui %19 : i1 to i32
    %c0_i32_14 = arith.constant 0 : i32
    %21 = arith.cmpi ne, %20, %c0_i32_14 : i32
    scf.if %21 {
      %c0_15 = arith.constant 0 : index
      %c0_16 = arith.constant 0 : index
      %22 = vector.load %arg8[%c0_15, %c0_16] : memref<1x128xf32, #tpu.memory_space<vmem>>, vector<1x128xf32>
      %cst_17 = arith.constant 3.125000e-02 : f32
      %23 = vector.broadcast %cst_17 : f32 to vector<1x128xf32>
      %24 = arith.mulf %22, %23 : vector<1x128xf32>
      %c0_18 = arith.constant 0 : index
      %c0_19 = arith.constant 0 : index
      %25 = vector.load %arg9[%c0_18, %c0_19] : memref<1x128xf32, #tpu.memory_space<vmem>>, vector<1x128xf32>
      %cst_20 = arith.constant 3.125000e-02 : f32
      %26 = vector.broadcast %cst_20 : f32 to vector<1x128xf32>
      %27 = arith.mulf %25, %26 : vector<1x128xf32>
      %28 = arith.mulf %24, %24 : vector<1x128xf32>
      %29 = arith.subf %27, %28 : vector<1x128xf32>
      %cst_21 = arith.constant 0.000000e+00 : f32
      %30 = vector.broadcast %cst_21 : f32 to vector<1x128xf32>
      %31 = arith.maximumf %29, %30 : vector<1x128xf32>
      %c0_22 = arith.constant 0 : index
      %c0_23 = arith.constant 0 : index
      %32 = vector.load %arg4[%c0_22, %c0_23] : memref<1x128xf32, #tpu.memory_space<vmem>>, vector<1x128xf32>
      %cst_24 = arith.constant 9.99999974E-6 : f32
      %33 = vector.broadcast %cst_24 : f32 to vector<1x128xf32>
      %34 = arith.addf %31, %33 : vector<1x128xf32>
      %35 = math.rsqrt %34 : vector<1x128xf32>
      %36 = arith.mulf %32, %35 : vector<1x128xf32>
      %c0_25 = arith.constant 0 : index
      %c0_26 = arith.constant 0 : index
      %37 = vector.load %arg5[%c0_25, %c0_26] : memref<1x128xf32, #tpu.memory_space<vmem>>, vector<1x128xf32>
      %38 = arith.mulf %24, %36 : vector<1x128xf32>
      %39 = arith.subf %37, %38 : vector<1x128xf32>
      %c0_i32_27 = arith.constant 0 : i32
      %c32_i32 = arith.constant 32 : i32
      %40 = arith.muli %c0_i32_27, %c32_i32 : i32
      %41 = tpu.assume_multiple %40, 8 : i32
      %42 = arith.index_cast %41 : i32 to index
      %c0_28 = arith.constant 0 : index
      %43 = vector.load %arg6[%42, %c0_28] : memref<32x128xf32, #tpu.memory_space<vmem>>, vector<32x128xf32>
      %44 = vector.broadcast %36 : vector<1x128xf32> to vector<32x128xf32>
      %45 = arith.mulf %43, %44 : vector<32x128xf32>
      %46 = vector.broadcast %39 : vector<1x128xf32> to vector<32x128xf32>
      %47 = arith.addf %45, %46 : vector<32x128xf32>
      %cst_29 = arith.constant 0.000000e+00 : f32
      %48 = vector.broadcast %cst_29 : f32 to vector<32x128xf32>
      %49 = arith.cmpf oge, %47, %48 : vector<32x128xf32>
      %cst_30 = arith.constant 2.000000e-01 : f32
      %50 = vector.broadcast %cst_30 : f32 to vector<32x128xf32>
      %51 = arith.mulf %50, %47 : vector<32x128xf32>
      %52 = arith.select %49, %47, %51 : vector<32x128xi1>, vector<32x128xf32>
      %53 = arith.index_cast %41 : i32 to index
      %c0_31 = arith.constant 0 : index
      %54 = vector.load %arg6[%53, %c0_31] : memref<32x128xf32, #tpu.memory_space<vmem>>, vector<32x128xf32>
      tpu.vector_store %arg6[%53, %c0_31], %52 {strides = array<i32>} : memref<32x128xf32, #tpu.memory_space<vmem>>, vector<32x128xf32>,
      %c1_i32_32 = arith.constant 1 : i32
    } else {
    }
    return
  }
  func.func @transform_0(%arg0: i32, %arg1: i32) -> (i32, i32) {
    %c0_i32 = arith.constant 0 : i32
    return %arg0, %arg1 : i32, i32
  }
  func.func @transform_1(%arg0: i32, %arg1: i32) -> (i32, i32) {
    %c0_i32 = arith.constant 0 : i32
    %c0_i32_0 = arith.constant 0 : i32
    return %arg1, %c0_i32 : i32, i32
  }
  func.func @transform_2(%arg0: i32, %arg1: i32) -> (i32, i32) {
    %c0_i32 = arith.constant 0 : i32
    %c0_i32_0 = arith.constant 0 : i32
    %c0_i32_1 = arith.constant 0 : i32
    return %c0_i32, %c0_i32_0 : i32, i32
  }
  func.func @transform_3(%arg0: i32, %arg1: i32) -> (i32, i32) {
    %c0_i32 = arith.constant 0 : i32
    %c0_i32_0 = arith.constant 0 : i32
    %c0_i32_1 = arith.constant 0 : i32
    return %c0_i32, %c0_i32_0 : i32, i32
  }
  func.func @transform_4(%arg0: i32, %arg1: i32) -> (i32, i32) {
    %c0_i32 = arith.constant 0 : i32
    %c0_i32_0 = arith.constant 0 : i32
    %c0_i32_1 = arith.constant 0 : i32
    return %c0_i32, %c0_i32_0 : i32, i32
  }
}

module attributes {stable_mosaic.version = 11 : i64} {
  func.func @_conv_bn_lrelu_kernel(%arg0: i32, %arg1: i32, %arg2: memref<8x512xbf16, #tpu.memory_space<vmem>>, %arg3: memref<512x256xbf16, #tpu.memory_space<vmem>>, %arg4: memref<1x256xf32, #tpu.memory_space<vmem>>, %arg5: memref<1x256xf32, #tpu.memory_space<vmem>>, %arg6: memref<8x256xf32, #tpu.memory_space<vmem>>, %arg7: memref<8x256xf32, #tpu.memory_space<vmem>>, %arg8: memref<1x256xf32, #tpu.memory_space<vmem>>, %arg9: memref<1x256xf32, #tpu.memory_space<vmem>>) attributes {dimension_semantics = [#tpu.dimension_semantics<arbitrary>, #tpu.dimension_semantics<arbitrary>], iteration_bounds = array<i64: 1, 4>, scalar_prefetch = 0 : i64, scratch_operands = 3 : i64, tpu.core_type = #tpu.core_type<tc>, window_params = [{transform_indices = @transform_0, window_bounds = array<i64: 8, 512>}, {transform_indices = @transform_1, window_bounds = array<i64: 512, 256>}, {pipeline_mode = #tpu.pipeline_mode<synchronous>, transform_indices = @transform_2, window_bounds = array<i64: 1, 256>}, {pipeline_mode = #tpu.pipeline_mode<synchronous>, transform_indices = @transform_3, window_bounds = array<i64: 1, 256>}, {pipeline_mode = #tpu.pipeline_mode<synchronous>, transform_indices = @transform_4, window_bounds = array<i64: 8, 256>}]} {
    %c0_i32 = arith.constant 0 : i32
    %0 = arith.cmpi eq, %arg1, %c0_i32 : i32
    %1 = arith.extui %0 : i1 to i32
    %c0_i32_0 = arith.constant 0 : i32
    %2 = arith.cmpi ne, %1, %c0_i32_0 : i32
    scf.if %2 {
      %cst_15 = arith.constant 0.000000e+00 : f32
      %22 = vector.broadcast %cst_15 : f32 to vector<8x256xf32>
      %c0_16 = arith.constant 0 : index
      %c0_17 = arith.constant 0 : index
      %23 = vector.load %arg7[%c0_16, %c0_17] : memref<8x256xf32, #tpu.memory_space<vmem>>, vector<8x256xf32>
      tpu.vector_store %arg7[%c0_16, %c0_17], %22 {strides = array<i32>} : memref<8x256xf32, #tpu.memory_space<vmem>>, vector<8x256xf32>,
    } else {
    }
    %c0_i32_1 = arith.constant 0 : i32
    %3 = arith.cmpi eq, %arg0, %c0_i32_1 : i32
    %c0_i32_2 = arith.constant 0 : i32
    %4 = arith.cmpi eq, %arg1, %c0_i32_2 : i32
    %5 = arith.andi %3, %4 : i1
    %6 = arith.extui %5 : i1 to i32
    %c0_i32_3 = arith.constant 0 : i32
    %7 = arith.cmpi ne, %6, %c0_i32_3 : i32
    scf.if %7 {
      %cst_15 = arith.constant 0.000000e+00 : f32
      %22 = vector.broadcast %cst_15 : f32 to vector<1x256xf32>
      %c0_16 = arith.constant 0 : index
      %c0_17 = arith.constant 0 : index
      %23 = vector.load %arg8[%c0_16, %c0_17] : memref<1x256xf32, #tpu.memory_space<vmem>>, vector<1x256xf32>
      tpu.vector_store %arg8[%c0_16, %c0_17], %22 {strides = array<i32>} : memref<1x256xf32, #tpu.memory_space<vmem>>, vector<1x256xf32>,
      %cst_18 = arith.constant 0.000000e+00 : f32
      %24 = vector.broadcast %cst_18 : f32 to vector<1x256xf32>
      %c0_19 = arith.constant 0 : index
      %c0_20 = arith.constant 0 : index
      %25 = vector.load %arg9[%c0_19, %c0_20] : memref<1x256xf32, #tpu.memory_space<vmem>>, vector<1x256xf32>
      tpu.vector_store %arg9[%c0_19, %c0_20], %24 {strides = array<i32>} : memref<1x256xf32, #tpu.memory_space<vmem>>, vector<1x256xf32>,
    } else {
    }
    %c0 = arith.constant 0 : index
    %c0_4 = arith.constant 0 : index
    %8 = vector.load %arg7[%c0, %c0_4] : memref<8x256xf32, #tpu.memory_space<vmem>>, vector<8x256xf32>
    %c0_5 = arith.constant 0 : index
    %c0_6 = arith.constant 0 : index
    %9 = vector.load %arg2[%c0_5, %c0_6] : memref<8x512xbf16, #tpu.memory_space<vmem>>, vector<8x512xbf16>
    %c0_7 = arith.constant 0 : index
    %c0_8 = arith.constant 0 : index
    %10 = vector.load %arg3[%c0_7, %c0_8] : memref<512x256xbf16, #tpu.memory_space<vmem>>, vector<512x256xbf16>
    %cst = arith.constant dense<0.000000e+00> : vector<8x256xf32>
    %11 = tpu.matmul %9, %10, %cst {dimension_numbers = #tpu.dot_dimension_numbers<[1], [0], [0], [1], [0, 0, 1, 1], [], []>} : vector<8x512xbf16>, vector<512x256xbf16>, vector<8x256xf32> -> vector<8x256xf32>
    %12 = arith.addf %8, %11 : vector<8x256xf32>
    %c0_9 = arith.constant 0 : index
    %c0_10 = arith.constant 0 : index
    %13 = vector.load %arg7[%c0_9, %c0_10] : memref<8x256xf32, #tpu.memory_space<vmem>>, vector<8x256xf32>
    tpu.vector_store %arg7[%c0_9, %c0_10], %12 {strides = array<i32>} : memref<8x256xf32, #tpu.memory_space<vmem>>, vector<8x256xf32>,
    %c3_i32 = arith.constant 3 : i32
    %14 = arith.cmpi eq, %arg1, %c3_i32 : i32
    %15 = arith.extui %14 : i1 to i32
    %c0_i32_11 = arith.constant 0 : i32
    %16 = arith.cmpi ne, %15, %c0_i32_11 : i32
    scf.if %16 {
      %c0_15 = arith.constant 0 : index
      %c0_16 = arith.constant 0 : index
      %22 = vector.load %arg7[%c0_15, %c0_16] : memref<8x256xf32, #tpu.memory_space<vmem>>, vector<8x256xf32>
      %c8_i32 = arith.constant 8 : i32
      %23 = arith.muli %arg0, %c8_i32 : i32
      %24 = tpu.assume_multiple %23, 8 : i32
      %25 = arith.index_cast %24 : i32 to index
      %c0_17 = arith.constant 0 : index
      %26 = vector.load %arg6[%25, %c0_17] : memref<8x256xf32, #tpu.memory_space<vmem>>, vector<8x256xf32>
      tpu.vector_store %arg6[%25, %c0_17], %22 {strides = array<i32>} : memref<8x256xf32, #tpu.memory_space<vmem>>, vector<8x256xf32>,
      %c0_18 = arith.constant 0 : index
      %c0_19 = arith.constant 0 : index
      %27 = vector.load %arg8[%c0_18, %c0_19] : memref<1x256xf32, #tpu.memory_space<vmem>>, vector<1x256xf32>
      %cst_20 = arith.constant dense<0.000000e+00> : vector<256xf32>
      %28 = vector.multi_reduction <add>, %22, %cst_20 [0] : vector<8x256xf32> to vector<256xf32>
      %29 = vector.shape_cast %28 : vector<256xf32> to vector<1x256xf32>
      %30 = arith.addf %27, %29 : vector<1x256xf32>
      %c0_21 = arith.constant 0 : index
      %c0_22 = arith.constant 0 : index
      %31 = vector.load %arg8[%c0_21, %c0_22] : memref<1x256xf32, #tpu.memory_space<vmem>>, vector<1x256xf32>
      tpu.vector_store %arg8[%c0_21, %c0_22], %30 {strides = array<i32>} : memref<1x256xf32, #tpu.memory_space<vmem>>, vector<1x256xf32>,
      %c0_23 = arith.constant 0 : index
      %c0_24 = arith.constant 0 : index
      %32 = vector.load %arg9[%c0_23, %c0_24] : memref<1x256xf32, #tpu.memory_space<vmem>>, vector<1x256xf32>
      %33 = arith.mulf %22, %22 : vector<8x256xf32>
      %cst_25 = arith.constant dense<0.000000e+00> : vector<256xf32>
      %34 = vector.multi_reduction <add>, %33, %cst_25 [0] : vector<8x256xf32> to vector<256xf32>
      %35 = vector.shape_cast %34 : vector<256xf32> to vector<1x256xf32>
      %36 = arith.addf %32, %35 : vector<1x256xf32>
      %c0_26 = arith.constant 0 : index
      %c0_27 = arith.constant 0 : index
      %37 = vector.load %arg9[%c0_26, %c0_27] : memref<1x256xf32, #tpu.memory_space<vmem>>, vector<1x256xf32>
      tpu.vector_store %arg9[%c0_26, %c0_27], %36 {strides = array<i32>} : memref<1x256xf32, #tpu.memory_space<vmem>>, vector<1x256xf32>,
    } else {
    }
    %c0_i32_12 = arith.constant 0 : i32
    %17 = arith.cmpi eq, %arg0, %c0_i32_12 : i32
    %c3_i32_13 = arith.constant 3 : i32
    %18 = arith.cmpi eq, %arg1, %c3_i32_13 : i32
    %19 = arith.andi %17, %18 : i1
    %20 = arith.extui %19 : i1 to i32
    %c0_i32_14 = arith.constant 0 : i32
    %21 = arith.cmpi ne, %20, %c0_i32_14 : i32
    scf.if %21 {
      %c0_15 = arith.constant 0 : index
      %c0_16 = arith.constant 0 : index
      %22 = vector.load %arg8[%c0_15, %c0_16] : memref<1x256xf32, #tpu.memory_space<vmem>>, vector<1x256xf32>
      %cst_17 = arith.constant 1.250000e-01 : f32
      %23 = vector.broadcast %cst_17 : f32 to vector<1x256xf32>
      %24 = arith.mulf %22, %23 : vector<1x256xf32>
      %c0_18 = arith.constant 0 : index
      %c0_19 = arith.constant 0 : index
      %25 = vector.load %arg9[%c0_18, %c0_19] : memref<1x256xf32, #tpu.memory_space<vmem>>, vector<1x256xf32>
      %cst_20 = arith.constant 1.250000e-01 : f32
      %26 = vector.broadcast %cst_20 : f32 to vector<1x256xf32>
      %27 = arith.mulf %25, %26 : vector<1x256xf32>
      %28 = arith.mulf %24, %24 : vector<1x256xf32>
      %29 = arith.subf %27, %28 : vector<1x256xf32>
      %cst_21 = arith.constant 0.000000e+00 : f32
      %30 = vector.broadcast %cst_21 : f32 to vector<1x256xf32>
      %31 = arith.maximumf %29, %30 : vector<1x256xf32>
      %c0_22 = arith.constant 0 : index
      %c0_23 = arith.constant 0 : index
      %32 = vector.load %arg4[%c0_22, %c0_23] : memref<1x256xf32, #tpu.memory_space<vmem>>, vector<1x256xf32>
      %cst_24 = arith.constant 9.99999974E-6 : f32
      %33 = vector.broadcast %cst_24 : f32 to vector<1x256xf32>
      %34 = arith.addf %31, %33 : vector<1x256xf32>
      %35 = math.rsqrt %34 : vector<1x256xf32>
      %36 = arith.mulf %32, %35 : vector<1x256xf32>
      %c0_25 = arith.constant 0 : index
      %c0_26 = arith.constant 0 : index
      %37 = vector.load %arg5[%c0_25, %c0_26] : memref<1x256xf32, #tpu.memory_space<vmem>>, vector<1x256xf32>
      %38 = arith.mulf %24, %36 : vector<1x256xf32>
      %39 = arith.subf %37, %38 : vector<1x256xf32>
      %c0_i32_27 = arith.constant 0 : i32
      %c8_i32 = arith.constant 8 : i32
      %40 = arith.muli %c0_i32_27, %c8_i32 : i32
      %41 = tpu.assume_multiple %40, 8 : i32
      %42 = arith.index_cast %41 : i32 to index
      %c0_28 = arith.constant 0 : index
      %43 = vector.load %arg6[%42, %c0_28] : memref<8x256xf32, #tpu.memory_space<vmem>>, vector<8x256xf32>
      %44 = vector.broadcast %36 : vector<1x256xf32> to vector<8x256xf32>
      %45 = arith.mulf %43, %44 : vector<8x256xf32>
      %46 = vector.broadcast %39 : vector<1x256xf32> to vector<8x256xf32>
      %47 = arith.addf %45, %46 : vector<8x256xf32>
      %cst_29 = arith.constant 0.000000e+00 : f32
      %48 = vector.broadcast %cst_29 : f32 to vector<8x256xf32>
      %49 = arith.cmpf oge, %47, %48 : vector<8x256xf32>
      %cst_30 = arith.constant 2.000000e-01 : f32
      %50 = vector.broadcast %cst_30 : f32 to vector<8x256xf32>
      %51 = arith.mulf %50, %47 : vector<8x256xf32>
      %52 = arith.select %49, %47, %51 : vector<8x256xi1>, vector<8x256xf32>
      %53 = arith.index_cast %41 : i32 to index
      %c0_31 = arith.constant 0 : index
      %54 = vector.load %arg6[%53, %c0_31] : memref<8x256xf32, #tpu.memory_space<vmem>>, vector<8x256xf32>
      tpu.vector_store %arg6[%53, %c0_31], %52 {strides = array<i32>} : memref<8x256xf32, #tpu.memory_space<vmem>>, vector<8x256xf32>,
      %c1_i32 = arith.constant 1 : i32
    } else {
    }
    return
  }
  func.func @transform_0(%arg0: i32, %arg1: i32) -> (i32, i32) {
    %c0_i32 = arith.constant 0 : i32
    return %arg0, %arg1 : i32, i32
  }
  func.func @transform_1(%arg0: i32, %arg1: i32) -> (i32, i32) {
    %c0_i32 = arith.constant 0 : i32
    %c0_i32_0 = arith.constant 0 : i32
    return %arg1, %c0_i32 : i32, i32
  }
  func.func @transform_2(%arg0: i32, %arg1: i32) -> (i32, i32) {
    %c0_i32 = arith.constant 0 : i32
    %c0_i32_0 = arith.constant 0 : i32
    %c0_i32_1 = arith.constant 0 : i32
    return %c0_i32, %c0_i32_0 : i32, i32
  }
  func.func @transform_3(%arg0: i32, %arg1: i32) -> (i32, i32) {
    %c0_i32 = arith.constant 0 : i32
    %c0_i32_0 = arith.constant 0 : i32
    %c0_i32_1 = arith.constant 0 : i32
    return %c0_i32, %c0_i32_0 : i32, i32
  }
  func.func @transform_4(%arg0: i32, %arg1: i32) -> (i32, i32) {
    %c0_i32 = arith.constant 0 : i32
    %c0_i32_0 = arith.constant 0 : i32
    %c0_i32_1 = arith.constant 0 : i32
    return %c0_i32, %c0_i32_0 : i32, i32
  }
}

module attributes {stable_mosaic.version = 11 : i64} {
  func.func @_conv_bn_lrelu_kernel(%arg0: i32, %arg1: i32, %arg2: memref<8x512xbf16, #tpu.memory_space<vmem>>, %arg3: memref<512x512xbf16, #tpu.memory_space<vmem>>, %arg4: memref<1x512xf32, #tpu.memory_space<vmem>>, %arg5: memref<1x512xf32, #tpu.memory_space<vmem>>, %arg6: memref<8x512xf32, #tpu.memory_space<vmem>>, %arg7: memref<8x512xf32, #tpu.memory_space<vmem>>, %arg8: memref<1x512xf32, #tpu.memory_space<vmem>>, %arg9: memref<1x512xf32, #tpu.memory_space<vmem>>) attributes {dimension_semantics = [#tpu.dimension_semantics<arbitrary>, #tpu.dimension_semantics<arbitrary>], iteration_bounds = array<i64: 1, 8>, scalar_prefetch = 0 : i64, scratch_operands = 3 : i64, tpu.core_type = #tpu.core_type<tc>, window_params = [{transform_indices = @transform_0, window_bounds = array<i64: 8, 512>}, {transform_indices = @transform_1, window_bounds = array<i64: 512, 512>}, {pipeline_mode = #tpu.pipeline_mode<synchronous>, transform_indices = @transform_2, window_bounds = array<i64: 1, 512>}, {pipeline_mode = #tpu.pipeline_mode<synchronous>, transform_indices = @transform_3, window_bounds = array<i64: 1, 512>}, {pipeline_mode = #tpu.pipeline_mode<synchronous>, transform_indices = @transform_4, window_bounds = array<i64: 8, 512>}]} {
    %c0_i32 = arith.constant 0 : i32
    %0 = arith.cmpi eq, %arg1, %c0_i32 : i32
    %1 = arith.extui %0 : i1 to i32
    %c0_i32_0 = arith.constant 0 : i32
    %2 = arith.cmpi ne, %1, %c0_i32_0 : i32
    scf.if %2 {
      %cst_15 = arith.constant 0.000000e+00 : f32
      %22 = vector.broadcast %cst_15 : f32 to vector<8x512xf32>
      %c0_16 = arith.constant 0 : index
      %c0_17 = arith.constant 0 : index
      %23 = vector.load %arg7[%c0_16, %c0_17] : memref<8x512xf32, #tpu.memory_space<vmem>>, vector<8x512xf32>
      tpu.vector_store %arg7[%c0_16, %c0_17], %22 {strides = array<i32>} : memref<8x512xf32, #tpu.memory_space<vmem>>, vector<8x512xf32>,
    } else {
    }
    %c0_i32_1 = arith.constant 0 : i32
    %3 = arith.cmpi eq, %arg0, %c0_i32_1 : i32
    %c0_i32_2 = arith.constant 0 : i32
    %4 = arith.cmpi eq, %arg1, %c0_i32_2 : i32
    %5 = arith.andi %3, %4 : i1
    %6 = arith.extui %5 : i1 to i32
    %c0_i32_3 = arith.constant 0 : i32
    %7 = arith.cmpi ne, %6, %c0_i32_3 : i32
    scf.if %7 {
      %cst_15 = arith.constant 0.000000e+00 : f32
      %22 = vector.broadcast %cst_15 : f32 to vector<1x512xf32>
      %c0_16 = arith.constant 0 : index
      %c0_17 = arith.constant 0 : index
      %23 = vector.load %arg8[%c0_16, %c0_17] : memref<1x512xf32, #tpu.memory_space<vmem>>, vector<1x512xf32>
      tpu.vector_store %arg8[%c0_16, %c0_17], %22 {strides = array<i32>} : memref<1x512xf32, #tpu.memory_space<vmem>>, vector<1x512xf32>,
      %cst_18 = arith.constant 0.000000e+00 : f32
      %24 = vector.broadcast %cst_18 : f32 to vector<1x512xf32>
      %c0_19 = arith.constant 0 : index
      %c0_20 = arith.constant 0 : index
      %25 = vector.load %arg9[%c0_19, %c0_20] : memref<1x512xf32, #tpu.memory_space<vmem>>, vector<1x512xf32>
      tpu.vector_store %arg9[%c0_19, %c0_20], %24 {strides = array<i32>} : memref<1x512xf32, #tpu.memory_space<vmem>>, vector<1x512xf32>,
    } else {
    }
    %c0 = arith.constant 0 : index
    %c0_4 = arith.constant 0 : index
    %8 = vector.load %arg7[%c0, %c0_4] : memref<8x512xf32, #tpu.memory_space<vmem>>, vector<8x512xf32>
    %c0_5 = arith.constant 0 : index
    %c0_6 = arith.constant 0 : index
    %9 = vector.load %arg2[%c0_5, %c0_6] : memref<8x512xbf16, #tpu.memory_space<vmem>>, vector<8x512xbf16>
    %c0_7 = arith.constant 0 : index
    %c0_8 = arith.constant 0 : index
    %10 = vector.load %arg3[%c0_7, %c0_8] : memref<512x512xbf16, #tpu.memory_space<vmem>>, vector<512x512xbf16>
    %cst = arith.constant dense<0.000000e+00> : vector<8x512xf32>
    %11 = tpu.matmul %9, %10, %cst {dimension_numbers = #tpu.dot_dimension_numbers<[1], [0], [0], [1], [0, 0, 1, 1], [], []>} : vector<8x512xbf16>, vector<512x512xbf16>, vector<8x512xf32> -> vector<8x512xf32>
    %12 = arith.addf %8, %11 : vector<8x512xf32>
    %c0_9 = arith.constant 0 : index
    %c0_10 = arith.constant 0 : index
    %13 = vector.load %arg7[%c0_9, %c0_10] : memref<8x512xf32, #tpu.memory_space<vmem>>, vector<8x512xf32>
    tpu.vector_store %arg7[%c0_9, %c0_10], %12 {strides = array<i32>} : memref<8x512xf32, #tpu.memory_space<vmem>>, vector<8x512xf32>,
    %c7_i32 = arith.constant 7 : i32
    %14 = arith.cmpi eq, %arg1, %c7_i32 : i32
    %15 = arith.extui %14 : i1 to i32
    %c0_i32_11 = arith.constant 0 : i32
    %16 = arith.cmpi ne, %15, %c0_i32_11 : i32
    scf.if %16 {
      %c0_15 = arith.constant 0 : index
      %c0_16 = arith.constant 0 : index
      %22 = vector.load %arg7[%c0_15, %c0_16] : memref<8x512xf32, #tpu.memory_space<vmem>>, vector<8x512xf32>
      %c8_i32 = arith.constant 8 : i32
      %23 = arith.muli %arg0, %c8_i32 : i32
      %24 = tpu.assume_multiple %23, 8 : i32
      %25 = arith.index_cast %24 : i32 to index
      %c0_17 = arith.constant 0 : index
      %26 = vector.load %arg6[%25, %c0_17] : memref<8x512xf32, #tpu.memory_space<vmem>>, vector<8x512xf32>
      tpu.vector_store %arg6[%25, %c0_17], %22 {strides = array<i32>} : memref<8x512xf32, #tpu.memory_space<vmem>>, vector<8x512xf32>,
      %c0_18 = arith.constant 0 : index
      %c0_19 = arith.constant 0 : index
      %27 = vector.load %arg8[%c0_18, %c0_19] : memref<1x512xf32, #tpu.memory_space<vmem>>, vector<1x512xf32>
      %cst_20 = arith.constant dense<0.000000e+00> : vector<512xf32>
      %28 = vector.multi_reduction <add>, %22, %cst_20 [0] : vector<8x512xf32> to vector<512xf32>
      %29 = vector.shape_cast %28 : vector<512xf32> to vector<1x512xf32>
      %30 = arith.addf %27, %29 : vector<1x512xf32>
      %c0_21 = arith.constant 0 : index
      %c0_22 = arith.constant 0 : index
      %31 = vector.load %arg8[%c0_21, %c0_22] : memref<1x512xf32, #tpu.memory_space<vmem>>, vector<1x512xf32>
      tpu.vector_store %arg8[%c0_21, %c0_22], %30 {strides = array<i32>} : memref<1x512xf32, #tpu.memory_space<vmem>>, vector<1x512xf32>,
      %c0_23 = arith.constant 0 : index
      %c0_24 = arith.constant 0 : index
      %32 = vector.load %arg9[%c0_23, %c0_24] : memref<1x512xf32, #tpu.memory_space<vmem>>, vector<1x512xf32>
      %33 = arith.mulf %22, %22 : vector<8x512xf32>
      %cst_25 = arith.constant dense<0.000000e+00> : vector<512xf32>
      %34 = vector.multi_reduction <add>, %33, %cst_25 [0] : vector<8x512xf32> to vector<512xf32>
      %35 = vector.shape_cast %34 : vector<512xf32> to vector<1x512xf32>
      %36 = arith.addf %32, %35 : vector<1x512xf32>
      %c0_26 = arith.constant 0 : index
      %c0_27 = arith.constant 0 : index
      %37 = vector.load %arg9[%c0_26, %c0_27] : memref<1x512xf32, #tpu.memory_space<vmem>>, vector<1x512xf32>
      tpu.vector_store %arg9[%c0_26, %c0_27], %36 {strides = array<i32>} : memref<1x512xf32, #tpu.memory_space<vmem>>, vector<1x512xf32>,
    } else {
    }
    %c0_i32_12 = arith.constant 0 : i32
    %17 = arith.cmpi eq, %arg0, %c0_i32_12 : i32
    %c7_i32_13 = arith.constant 7 : i32
    %18 = arith.cmpi eq, %arg1, %c7_i32_13 : i32
    %19 = arith.andi %17, %18 : i1
    %20 = arith.extui %19 : i1 to i32
    %c0_i32_14 = arith.constant 0 : i32
    %21 = arith.cmpi ne, %20, %c0_i32_14 : i32
    scf.if %21 {
      %c0_15 = arith.constant 0 : index
      %c0_16 = arith.constant 0 : index
      %22 = vector.load %arg8[%c0_15, %c0_16] : memref<1x512xf32, #tpu.memory_space<vmem>>, vector<1x512xf32>
      %cst_17 = arith.constant 5.000000e-01 : f32
      %23 = vector.broadcast %cst_17 : f32 to vector<1x512xf32>
      %24 = arith.mulf %22, %23 : vector<1x512xf32>
      %c0_18 = arith.constant 0 : index
      %c0_19 = arith.constant 0 : index
      %25 = vector.load %arg9[%c0_18, %c0_19] : memref<1x512xf32, #tpu.memory_space<vmem>>, vector<1x512xf32>
      %cst_20 = arith.constant 5.000000e-01 : f32
      %26 = vector.broadcast %cst_20 : f32 to vector<1x512xf32>
      %27 = arith.mulf %25, %26 : vector<1x512xf32>
      %28 = arith.mulf %24, %24 : vector<1x512xf32>
      %29 = arith.subf %27, %28 : vector<1x512xf32>
      %cst_21 = arith.constant 0.000000e+00 : f32
      %30 = vector.broadcast %cst_21 : f32 to vector<1x512xf32>
      %31 = arith.maximumf %29, %30 : vector<1x512xf32>
      %c0_22 = arith.constant 0 : index
      %c0_23 = arith.constant 0 : index
      %32 = vector.load %arg4[%c0_22, %c0_23] : memref<1x512xf32, #tpu.memory_space<vmem>>, vector<1x512xf32>
      %cst_24 = arith.constant 9.99999974E-6 : f32
      %33 = vector.broadcast %cst_24 : f32 to vector<1x512xf32>
      %34 = arith.addf %31, %33 : vector<1x512xf32>
      %35 = math.rsqrt %34 : vector<1x512xf32>
      %36 = arith.mulf %32, %35 : vector<1x512xf32>
      %c0_25 = arith.constant 0 : index
      %c0_26 = arith.constant 0 : index
      %37 = vector.load %arg5[%c0_25, %c0_26] : memref<1x512xf32, #tpu.memory_space<vmem>>, vector<1x512xf32>
      %38 = arith.mulf %24, %36 : vector<1x512xf32>
      %39 = arith.subf %37, %38 : vector<1x512xf32>
      %c0_i32_27 = arith.constant 0 : i32
      %c8_i32 = arith.constant 8 : i32
      %40 = arith.muli %c0_i32_27, %c8_i32 : i32
      %41 = tpu.assume_multiple %40, 8 : i32
      %42 = arith.index_cast %41 : i32 to index
      %c0_28 = arith.constant 0 : index
      %43 = vector.load %arg6[%42, %c0_28] : memref<8x512xf32, #tpu.memory_space<vmem>>, vector<8x512xf32>
      %44 = vector.broadcast %36 : vector<1x512xf32> to vector<8x512xf32>
      %45 = arith.mulf %43, %44 : vector<8x512xf32>
      %46 = vector.broadcast %39 : vector<1x512xf32> to vector<8x512xf32>
      %47 = arith.addf %45, %46 : vector<8x512xf32>
      %cst_29 = arith.constant 0.000000e+00 : f32
      %48 = vector.broadcast %cst_29 : f32 to vector<8x512xf32>
      %49 = arith.cmpf oge, %47, %48 : vector<8x512xf32>
      %cst_30 = arith.constant 2.000000e-01 : f32
      %50 = vector.broadcast %cst_30 : f32 to vector<8x512xf32>
      %51 = arith.mulf %50, %47 : vector<8x512xf32>
      %52 = arith.select %49, %47, %51 : vector<8x512xi1>, vector<8x512xf32>
      %53 = arith.index_cast %41 : i32 to index
      %c0_31 = arith.constant 0 : index
      %54 = vector.load %arg6[%53, %c0_31] : memref<8x512xf32, #tpu.memory_space<vmem>>, vector<8x512xf32>
      tpu.vector_store %arg6[%53, %c0_31], %52 {strides = array<i32>} : memref<8x512xf32, #tpu.memory_space<vmem>>, vector<8x512xf32>,
      %c1_i32 = arith.constant 1 : i32
    } else {
    }
    return
  }
  func.func @transform_0(%arg0: i32, %arg1: i32) -> (i32, i32) {
    %c0_i32 = arith.constant 0 : i32
    return %arg0, %arg1 : i32, i32
  }
  func.func @transform_1(%arg0: i32, %arg1: i32) -> (i32, i32) {
    %c0_i32 = arith.constant 0 : i32
    %c0_i32_0 = arith.constant 0 : i32
    return %arg1, %c0_i32 : i32, i32
  }
  func.func @transform_2(%arg0: i32, %arg1: i32) -> (i32, i32) {
    %c0_i32 = arith.constant 0 : i32
    %c0_i32_0 = arith.constant 0 : i32
    %c0_i32_1 = arith.constant 0 : i32
    return %c0_i32, %c0_i32_0 : i32, i32
  }
  func.func @transform_3(%arg0: i32, %arg1: i32) -> (i32, i32) {
    %c0_i32 = arith.constant 0 : i32
    %c0_i32_0 = arith.constant 0 : i32
    %c0_i32_1 = arith.constant 0 : i32
    return %c0_i32, %c0_i32_0 : i32, i32
  }
  func.func @transform_4(%arg0: i32, %arg1: i32) -> (i32, i32) {
    %c0_i32 = arith.constant 0 : i32
    %c0_i32_0 = arith.constant 0 : i32
    %c0_i32_1 = arith.constant 0 : i32
    return %c0_i32, %c0_i32_0 : i32, i32
  }
}

module attributes {stable_mosaic.version = 11 : i64} {
  func.func @_matmul_bias_act_kernel(%arg0: i32, %arg1: i32, %arg2: memref<8x512xbf16, #tpu.memory_space<vmem>>, %arg3: memref<512x128xbf16, #tpu.memory_space<vmem>>, %arg4: memref<1x128xf32, #tpu.memory_space<vmem>>, %arg5: memref<8x128xf32, #tpu.memory_space<vmem>>, %arg6: memref<8x128xf32, #tpu.memory_space<vmem>>) attributes {dimension_semantics = [#tpu.dimension_semantics<parallel>, #tpu.dimension_semantics<arbitrary>], iteration_bounds = array<i64: 1, 16>, scalar_prefetch = 0 : i64, scratch_operands = 1 : i64, tpu.core_type = #tpu.core_type<tc>, window_params = [{transform_indices = @transform_0, window_bounds = array<i64: 8, 512>}, {transform_indices = @transform_1, window_bounds = array<i64: 512, 128>}, {pipeline_mode = #tpu.pipeline_mode<synchronous>, transform_indices = @transform_2, window_bounds = array<i64: 1, 128>}, {transform_indices = @transform_3, window_bounds = array<i64: 8, 128>}]} {
    %c0_i32 = arith.constant 0 : i32
    %0 = arith.cmpi eq, %arg1, %c0_i32 : i32
    %1 = arith.extui %0 : i1 to i32
    %c0_i32_0 = arith.constant 0 : i32
    %2 = arith.cmpi ne, %1, %c0_i32_0 : i32
    scf.if %2 {
      %cst_9 = arith.constant 0.000000e+00 : f32
      %12 = vector.broadcast %cst_9 : f32 to vector<8x128xf32>
      %c0_10 = arith.constant 0 : index
      %c0_11 = arith.constant 0 : index
      %13 = vector.load %arg6[%c0_10, %c0_11] : memref<8x128xf32, #tpu.memory_space<vmem>>, vector<8x128xf32>
      tpu.vector_store %arg6[%c0_10, %c0_11], %12 {strides = array<i32>} : memref<8x128xf32, #tpu.memory_space<vmem>>, vector<8x128xf32>,
    } else {
    }
    %c0 = arith.constant 0 : index
    %c0_1 = arith.constant 0 : index
    %3 = vector.load %arg6[%c0, %c0_1] : memref<8x128xf32, #tpu.memory_space<vmem>>, vector<8x128xf32>
    %c0_2 = arith.constant 0 : index
    %c0_3 = arith.constant 0 : index
    %4 = vector.load %arg2[%c0_2, %c0_3] : memref<8x512xbf16, #tpu.memory_space<vmem>>, vector<8x512xbf16>
    %c0_4 = arith.constant 0 : index
    %c0_5 = arith.constant 0 : index
    %5 = vector.load %arg3[%c0_4, %c0_5] : memref<512x128xbf16, #tpu.memory_space<vmem>>, vector<512x128xbf16>
    %cst = arith.constant dense<0.000000e+00> : vector<8x128xf32>
    %6 = tpu.matmul %4, %5, %cst {dimension_numbers = #tpu.dot_dimension_numbers<[1], [0], [0], [1], [0, 0, 1, 1], [], []>} : vector<8x512xbf16>, vector<512x128xbf16>, vector<8x128xf32> -> vector<8x128xf32>
    %7 = arith.addf %3, %6 : vector<8x128xf32>
    %c0_6 = arith.constant 0 : index
    %c0_7 = arith.constant 0 : index
    %8 = vector.load %arg6[%c0_6, %c0_7] : memref<8x128xf32, #tpu.memory_space<vmem>>, vector<8x128xf32>
    tpu.vector_store %arg6[%c0_6, %c0_7], %7 {strides = array<i32>} : memref<8x128xf32, #tpu.memory_space<vmem>>, vector<8x128xf32>,
    %c15_i32 = arith.constant 15 : i32
    %9 = arith.cmpi eq, %arg1, %c15_i32 : i32
    %10 = arith.extui %9 : i1 to i32
    %c0_i32_8 = arith.constant 0 : i32
    %11 = arith.cmpi ne, %10, %c0_i32_8 : i32
    scf.if %11 {
      %c0_9 = arith.constant 0 : index
      %c0_10 = arith.constant 0 : index
      %12 = vector.load %arg6[%c0_9, %c0_10] : memref<8x128xf32, #tpu.memory_space<vmem>>, vector<8x128xf32>
      %c0_11 = arith.constant 0 : index
      %c0_12 = arith.constant 0 : index
      %13 = vector.load %arg4[%c0_11, %c0_12] : memref<1x128xf32, #tpu.memory_space<vmem>>, vector<1x128xf32>
      %14 = vector.broadcast %13 : vector<1x128xf32> to vector<8x128xf32>
      %15 = arith.addf %12, %14 : vector<8x128xf32>
      %c0_13 = arith.constant 0 : index
      %c0_14 = arith.constant 0 : index
      %16 = vector.load %arg5[%c0_13, %c0_14] : memref<8x128xf32, #tpu.memory_space<vmem>>, vector<8x128xf32>
      tpu.vector_store %arg5[%c0_13, %c0_14], %15 {strides = array<i32>} : memref<8x128xf32, #tpu.memory_space<vmem>>, vector<8x128xf32>,
    } else {
    }
    return
  }
  func.func @transform_0(%arg0: i32, %arg1: i32) -> (i32, i32) {
    %c0_i32 = arith.constant 0 : i32
    return %arg0, %arg1 : i32, i32
  }
  func.func @transform_1(%arg0: i32, %arg1: i32) -> (i32, i32) {
    %c0_i32 = arith.constant 0 : i32
    %c0_i32_0 = arith.constant 0 : i32
    return %arg1, %c0_i32 : i32, i32
  }
  func.func @transform_2(%arg0: i32, %arg1: i32) -> (i32, i32) {
    %c0_i32 = arith.constant 0 : i32
    %c0_i32_0 = arith.constant 0 : i32
    %c0_i32_1 = arith.constant 0 : i32
    return %c0_i32, %c0_i32_0 : i32, i32
  }
  func.func @transform_3(%arg0: i32, %arg1: i32) -> (i32, i32) {
    %c0_i32 = arith.constant 0 : i32
    %c0_i32_0 = arith.constant 0 : i32
    return %arg0, %c0_i32 : i32, i32
  }
}

</mosaic_0001>

<bundles_post_ra>
// kernel: discriminator_forward.5
= control target key start
LH: loop header
LB: loop body
LE: loop exit
PB: predicated region body
PF: predicated region fallthrough
CT: control target
= control target key end

     0   :  { %8 = vsyncpa [#allocation4], 0  ;;  %s516_s15 = smov [#allocation3]   ;;  %s703_s0 = inlined_call_operand.vmem [shape: bf16[128,128], index: 0, kind: input, shape index: {}]   ;;  %s704_s1 = inlined_call_operand.vmem [shape: bf16[128,64], index: 1, kind: input, shape index: {}]   ;;  %s705_s2 = inlined_call_operand.hbm [shape: f32[1,64], index: 2, kind: input, shape index: {}]   ;;  %s706_s3 = inlined_call_operand.vmem [shape: f32[128,64], index: 3, kind: output, shape index: {}]  }
   0x1   :  { %s18_s14 = sshll.u32 %s705_s2, 4  ;;  %s20_s16 = sshll.u32 %s516_s15, 4  ;;  %s19_s14 = int_to_ptr.hbm [resolvable:$true] %s18_s14  ;;  %s21_s16 = int_to_ptr.vmem [resolvable:$true] %s20_s16 }
   0x2   :  { %23 = dma.hbm_to_vmem [thread:$0]  %s19_s14, 16, %s21_s16, [#allocation4]  }
   0x3   :  { %514 = dma.done.wait [#allocation4], 16  }
   0x4   :  { %515 = vsyncadd [#allocation4], 4294967280  ;;  %v462_v0 = vld [vmem:[%s704_s1 + $0x38] sm:$0xff]  ;;  %v461_v1 = vld [vmem:[%s704_s1 + $0x30] sm:$0xff]  ;;  %vm32_vm0 = vcmask 523264   ;;  %v517_v6 = vmov 0.0  }
   0x5   :  { %193 = vmatpush.bf16.msra.mxu0 %v462_v0  ;;  %463 = vmatpush.bf16.msra.mxu1 %v462_v0  ;;  %v460_v2 = vld [vmem:[%s704_s1 + $0x28] sm:$0xff]  ;;  %v459_v3 = vld [vmem:[%s704_s1 + $0x20] sm:$0xff]  ;;  %v458_v4 = vld [vmem:[%s704_s1 + $0x18] sm:$0xff]  ;;  %33 = vst.msk [vmem:[#allocation2] sm:$0xff] %vm32_vm0, %v517_v6 }
   0x6   :  { %464 = vmatpush.bf16.msra.mxu2 %v462_v0  ;;  %465 = vmatpush.bf16.msra.mxu3 %v462_v0  ;;  %v457_v5 = vld [vmem:[%s704_s1 + $0x10] sm:$0xff]  ;;  %34 = vst.msk [vmem:[#allocation2 + $0x8] sm:$0xff] %vm32_vm0, %v517_v6  ;;  %v456_v7 = vld [vmem:[%s704_s1 + $0x8] sm:$0xff]  ;;  %v455_v8 = vld [vmem:[%s704_s1] sm:$0xff] }
   0x7   :  { %35 = vst.msk [vmem:[#allocation2 + $0x10] sm:$0xff] %vm32_vm0, %v517_v6  ;;  %v447_v9 = vld [vmem:[%s703_s0] sm:$0xff]  ;;  %v449_v10 = vld [vmem:[%s703_s0 + $0x10] sm:$0xff]  ;;  %v448_v13 = vld [vmem:[%s703_s0 + $0x8] sm:$0xff] }
   0x8   :  { %36 = vst.msk [vmem:[#allocation2 + $0x18] sm:$0xff] %vm32_vm0, %v517_v6  ;;  %v451_v11 = vld [vmem:[%s703_s0 + $0x20] sm:$0xff]  ;;  %v453_v12 = vld [vmem:[%s703_s0 + $0x30] sm:$0xff]  ;;  %v450_v14 = vld [vmem:[%s703_s0 + $0x18] sm:$0xff] }
   0x9   :  { %194 = vmatpush.bf16.msra.mxu0 %v461_v1  ;;  %466 = vmatpush.bf16.msra.mxu1 %v461_v1  ;;  %37 = vst.msk [vmem:[#allocation2 + $0x20] sm:$0xff] %vm32_vm0, %v517_v6  ;;  %v452_v15 = vld [vmem:[%s703_s0 + $0x28] sm:$0xff]  ;;  %v454_v16 = vld [vmem:[%s703_s0 + $0x38] sm:$0xff]  ;;  %v607_v27 = vld [vmem:[#allocation3] ss:$0 sm:$0xff] }
   0xa   :  { %467 = vmatpush.bf16.msra.mxu2 %v461_v1  ;;  %468 = vmatpush.bf16.msra.mxu3 %v461_v1  ;;  %38 = vst.msk [vmem:[#allocation2 + $0x28] sm:$0xff] %vm32_vm0, %v517_v6 }
   0xb   :  { %39 = vst.msk [vmem:[#allocation2 + $0x30] sm:$0xff] %vm32_vm0, %v517_v6 }
   0xc   :  { %40 = vst.msk [vmem:[#allocation2 + $0x38] sm:$0xff] %vm32_vm0, %v517_v6  ;;  %v49_v17 = vld [vmem:[#allocation2] sm:$0xff] }
   0xd   :  { %195 = vmatpush.bf16.msra.mxu0 %v460_v2  ;;  %469 = vmatpush.bf16.msra.mxu1 %v460_v2  ;;  %41 = vst.msk [vmem:[#allocation2 + $0x40] sm:$0xff] %vm32_vm0, %v517_v6  ;;  %v50_v25 = vld [vmem:[#allocation2 + $0x8] sm:$0xff] }
   0xe   :  { %470 = vmatpush.bf16.msra.mxu2 %v460_v2  ;;  %471 = vmatpush.bf16.msra.mxu3 %v460_v2  ;;  %42 = vst.msk [vmem:[#allocation2 + $0x48] sm:$0xff] %vm32_vm0, %v517_v6  ;;  %v51_v44 = vld [vmem:[#allocation2 + $0x10] sm:$0xff] }
   0xf   :  { %43 = vst.msk [vmem:[#allocation2 + $0x50] sm:$0xff] %vm32_vm0, %v517_v6 }
  0x10   :  { %44 = vst.msk [vmem:[#allocation2 + $0x58] sm:$0xff] %vm32_vm0, %v517_v6  ;;  %v53_v18 = vld [vmem:[#allocation2 + $0x20] sm:$0xff] }
  0x11   :  { %196 = vmatpush.bf16.msra.mxu0 %v459_v3  ;;  %472 = vmatpush.bf16.msra.mxu1 %v459_v3  ;;  %45 = vst.msk [vmem:[#allocation2 + $0x60] sm:$0xff] %vm32_vm0, %v517_v6  ;;  %v54_v26 = vld [vmem:[#allocation2 + $0x28] sm:$0xff] }
  0x12   :  { %473 = vmatpush.bf16.msra.mxu2 %v459_v3  ;;  %474 = vmatpush.bf16.msra.mxu3 %v459_v3  ;;  %46 = vst.msk [vmem:[#allocation2 + $0x68] sm:$0xff] %vm32_vm0, %v517_v6  ;;  %v55_v45 = vld [vmem:[#allocation2 + $0x30] sm:$0xff] }
  0x13   :  { %47 = vst.msk [vmem:[#allocation2 + $0x70] sm:$0xff] %vm32_vm0, %v517_v6 }
  0x14   :  { %48 = vst.msk [vmem:[#allocation2 + $0x78] sm:$0xff] %vm32_vm0, %v517_v6  ;;  %v57_v23 = vld [vmem:[#allocation2 + $0x40] sm:$0xff]  ;;  %v52_v6 = vld [vmem:[#allocation2 + $0x18] sm:$0xff] }
  0x15   :  { %197 = vmatpush.bf16.msra.mxu0 %v458_v4  ;;  %475 = vmatpush.bf16.msra.mxu1 %v458_v4  ;;  %v58_v41 = vld [vmem:[#allocation2 + $0x48] sm:$0xff] }
  0x16   :  { %476 = vmatpush.bf16.msra.mxu2 %v458_v4  ;;  %477 = vmatpush.bf16.msra.mxu3 %v458_v4  ;;  %v59_v2 = vld [vmem:[#allocation2 + $0x50] sm:$0xff] }
  0x18   :  { %v61_v24 = vld [vmem:[#allocation2 + $0x60] sm:$0xff] }
  0x19   :  { %198 = vmatpush.bf16.msra.mxu0 %v457_v5  ;;  %478 = vmatpush.bf16.msra.mxu1 %v457_v5  ;;  %v62_v42 = vld [vmem:[#allocation2 + $0x68] sm:$0xff] }
  0x1a   :  { %479 = vmatpush.bf16.msra.mxu2 %v457_v5  ;;  %480 = vmatpush.bf16.msra.mxu3 %v457_v5  ;;  %v63_v3 = vld [vmem:[#allocation2 + $0x70] sm:$0xff] }
  0x1d   :  { %199 = vmatpush.bf16.msra.mxu0 %v456_v7  ;;  %481 = vmatpush.bf16.msra.mxu1 %v456_v7 }
  0x1e   :  { %482 = vmatpush.bf16.msra.mxu2 %v456_v7  ;;  %483 = vmatpush.bf16.msra.mxu3 %v456_v7 }
  0x21   :  { %200 = vmatpush.bf16.msra.mxu0 %v455_v8  ;;  %484 = vmatpush.bf16.msra.mxu1 %v455_v8 }
  0x22   :  { %485 = vmatpush.bf16.msra.mxu2 %v455_v8  ;;  %486 = vmatpush.bf16.msra.mxu3 %v455_v8 }
  0x24   :  { %201 = vmatmul.bf16.vlgmr.msra.gmra.mxu0 %v447_v9  ;;  %211 = vmatmul.bf16.vlgmr.msra.gmra.mxu1 %v449_v10 }
  0x25   :  { %221 = vmatmul.bf16.vlgmr.msra.gmra.mxu2 %v451_v11  ;;  %231 = vmatmul.bf16.vlgmr.msra.gmra.mxu3 %v453_v12  ;;  %v56_v11 = vld [vmem:[#allocation2 + $0x38] sm:$0xff] }
  0x34   :  { %206 = vmatmul.bf16.gmra.mxu0 %v448_v13  ;;  %216 = vmatmul.bf16.gmra.mxu1 %v450_v14 }
  0x35   :  { %226 = vmatmul.bf16.gmra.mxu2 %v452_v15  ;;  %236 = vmatmul.bf16.gmra.mxu3 %v454_v16 }
  0xa1   :  { %v202_v19 = vpop.f32.mrf.mxu0  ;;  %v212_v20 = vpop.f32.mrf.mxu1 }
  0xa2   :  { %v242_v21 = vadd.f32 %v202_v19, %v49_v17  ;;  %v246_v22 = vadd.f32 %v212_v20, %v53_v18 }
  0xa4   :  { %259 = vst.msk [vmem:[#allocation2] sm:$0xff] %vm32_vm0, %v242_v21 }
  0xa5   :  { %263 = vst.msk [vmem:[#allocation2 + $0x20] sm:$0xff] %vm32_vm0, %v246_v22 }
  0xa8   :  { %v222_v28 = vpop.f32.mrf.mxu2  ;;  %v232_v29 = vpop.f32.mrf.mxu3 }
  0xa9   :  { %v250_v30 = vadd.f32 %v222_v28, %v57_v23  ;;  %v254_v31 = vadd.f32 %v232_v29, %v61_v24  ;;  %v204_v32 = vpop.f32.mrf.mxu0  ;;  %v214_v33 = vpop.f32.mrf.mxu1 }
  0xaa   :  { %v243_v34 = vadd.f32 %v204_v32, %v50_v25  ;;  %v247_v35 = vadd.f32 %v214_v33, %v54_v26  ;;  %v64_v32 = vld [vmem:[#allocation2 + $0x78] sm:$0xff] }
  0xab   :  { %v278_v36 = vld [vmem:[#allocation2] sm:$0xff]  ;;  %267 = vst.msk [vmem:[#allocation2 + $0x40] sm:$0xff] %vm32_vm0, %v250_v30 }
  0xac   :  { %v298_v37 = vadd.f32 %v607_v27, %v278_v36  ;;  %v282_v38 = vld [vmem:[#allocation2 + $0x20] sm:$0xff]  ;;  %271 = vst.msk [vmem:[#allocation2 + $0x60] sm:$0xff] %vm32_vm0, %v254_v31  ;;  %v60_v31 = vld [vmem:[#allocation2 + $0x58] sm:$0xff] }
  0xad   :  { %v302_v39 = vadd.f32 %v607_v27, %v282_v38  ;;  %260 = vst.msk [vmem:[#allocation2 + $0x8] sm:$0xff] %vm32_vm0, %v243_v34 }
  0xae   :  { %vm314_vm1 = vcmp.ge.f32.partialorder %v298_v37, 0.0  ;;  %v330_v40 = vmul.f32 0.2, %v298_v37  ;;  %264 = vst.msk [vmem:[#allocation2 + $0x28] sm:$0xff] %vm32_vm0, %v247_v35 }
  0xaf   :  { %vm318_vm2 = vcmp.ge.f32.partialorder %v302_v39, 0.0  ;;  %v334_v43 = vmul.f32 0.2, %v302_v39 }
  0xb0   :  { %v346_v46 = vsel %vm314_vm1, %v298_v37, %v330_v40  ;;  %v224_v47 = vpop.f32.mrf.mxu2  ;;  %v234_v48 = vpop.f32.mrf.mxu3 }
  0xb1   :  { %362 = vst.msk [vmem:[%s706_s3] sm:$0xff] %vm32_vm0, %v346_v46  ;;  %v350_v49 = vsel %vm318_vm2, %v302_v39, %v334_v43  ;;  %v251_v50 = vadd.f32 %v224_v47, %v58_v41  ;;  %v255_v51 = vadd.f32 %v234_v48, %v62_v42  ;;  %v207_v52 = vpop.f32.mrf.mxu0  ;;  %v217_v53 = vpop.f32.mrf.mxu1 }
  0xb2   :  { %366 = vst.msk [vmem:[%s706_s3 + $0x20] sm:$0xff] %vm32_vm0, %v350_v49  ;;  %v286_v54 = vld [vmem:[#allocation2 + $0x40] sm:$0xff]  ;;  %v244_v55 = vadd.f32 %v207_v52, %v51_v44  ;;  %v248_v56 = vadd.f32 %v217_v53, %v55_v45 }
  0xb3   :  { %v306_v57 = vadd.f32 %v607_v27, %v286_v54  ;;  %v290_v58 = vld [vmem:[#allocation2 + $0x60] sm:$0xff]  ;;  %268 = vst.msk [vmem:[#allocation2 + $0x48] sm:$0xff] %vm32_vm0, %v251_v50 }
  0xb4   :  { %v310_v59 = vadd.f32 %v607_v27, %v290_v58  ;;  %v279_v60 = vld [vmem:[#allocation2 + $0x8] sm:$0xff]  ;;  %272 = vst.msk [vmem:[#allocation2 + $0x68] sm:$0xff] %vm32_vm0, %v255_v51 }
  0xb5   :  { %vm322_vm3 = vcmp.ge.f32.partialorder %v306_v57, 0.0  ;;  %v338_v61 = vmul.f32 0.2, %v306_v57  ;;  %v299_v62 = vadd.f32 %v607_v27, %v279_v60  ;;  %v283_v63 = vld [vmem:[#allocation2 + $0x28] sm:$0xff]  ;;  %261 = vst.msk [vmem:[#allocation2 + $0x10] sm:$0xff] %vm32_vm0, %v244_v55 }
  0xb6   :  { %vm326_vm4 = vcmp.ge.f32.partialorder %v310_v59, 0.0  ;;  %v342_v0 = vmul.f32 0.2, %v310_v59  ;;  %v303_v1 = vadd.f32 %v607_v27, %v283_v63  ;;  %265 = vst.msk [vmem:[#allocation2 + $0x30] sm:$0xff] %vm32_vm0, %v248_v56 }
  0xb7   :  { %v354_v4 = vsel %vm322_vm3, %v306_v57, %v338_v61  ;;  %vm315_vm5 = vcmp.ge.f32.partialorder %v299_v62, 0.0  ;;  %v331_v5 = vmul.f32 0.2, %v299_v62 }
  0xb8   :  { %370 = vst.msk [vmem:[%s706_s3 + $0x40] sm:$0xff] %vm32_vm0, %v354_v4  ;;  %v358_v7 = vsel %vm326_vm4, %v310_v59, %v342_v0  ;;  %vm319_vm6 = vcmp.ge.f32.partialorder %v303_v1, 0.0  ;;  %v335_v8 = vmul.f32 0.2, %v303_v1  ;;  %v227_v9 = vpop.f32.mrf.mxu2  ;;  %v237_v10 = vpop.f32.mrf.mxu3 }
  0xb9   :  { %374 = vst.msk [vmem:[%s706_s3 + $0x60] sm:$0xff] %vm32_vm0, %v358_v7  ;;  %v347_v12 = vsel %vm315_vm5, %v299_v62, %v331_v5  ;;  %v252_v13 = vadd.f32 %v227_v9, %v59_v2  ;;  %v256_v14 = vadd.f32 %v237_v10, %v63_v3  ;;  %v209_v15 = vpop.f32.mrf.mxu0  ;;  %v219_v16 = vpop.f32.mrf.mxu1 }
  0xba   :  { %363 = vst.msk [vmem:[%s706_s3 + $0x8] sm:$0xff] %vm32_vm0, %v347_v12  ;;  %v351_v17 = vsel %vm319_vm6, %v303_v1, %v335_v8  ;;  %v287_v18 = vld [vmem:[#allocation2 + $0x48] sm:$0xff]  ;;  %v245_v19 = vadd.f32 %v209_v15, %v52_v6  ;;  %v249_v22 = vadd.f32 %v219_v16, %v56_v11 }
  0xbb   :  { %367 = vst.msk [vmem:[%s706_s3 + $0x28] sm:$0xff] %vm32_vm0, %v351_v17  ;;  %v307_v20 = vadd.f32 %v607_v27, %v287_v18  ;;  %v291_v21 = vld [vmem:[#allocation2 + $0x68] sm:$0xff] }
  0xbc   :  { %v311_v23 = vadd.f32 %v607_v27, %v291_v21  ;;  %v280_v24 = vld [vmem:[#allocation2 + $0x10] sm:$0xff]  ;;  %269 = vst.msk [vmem:[#allocation2 + $0x50] sm:$0xff] %vm32_vm0, %v252_v13 }
  0xbd   :  { %vm323_vm7 = vcmp.ge.f32.partialorder %v307_v20, 0.0  ;;  %v339_v25 = vmul.f32 0.2, %v307_v20  ;;  %v300_v26 = vadd.f32 %v607_v27, %v280_v24  ;;  %v284_v28 = vld [vmem:[#allocation2 + $0x30] sm:$0xff]  ;;  %273 = vst.msk [vmem:[#allocation2 + $0x70] sm:$0xff] %vm32_vm0, %v256_v14 }
  0xbe   :  { %vm327_vm8 = vcmp.ge.f32.partialorder %v311_v23, 0.0  ;;  %v343_v29 = vmul.f32 0.2, %v311_v23  ;;  %v304_v30 = vadd.f32 %v607_v27, %v284_v28  ;;  %262 = vst.msk [vmem:[#allocation2 + $0x18] sm:$0xff] %vm32_vm0, %v245_v19 }
  0xbf   :  { %v355_v33 = vsel %vm323_vm7, %v307_v20, %v339_v25  ;;  %vm316_vm9 = vcmp.ge.f32.partialorder %v300_v26, 0.0  ;;  %v332_v34 = vmul.f32 0.2, %v300_v26  ;;  %266 = vst.msk [vmem:[#allocation2 + $0x38] sm:$0xff] %vm32_vm0, %v249_v22 }
  0xc0   :  { %371 = vst.msk [vmem:[%s706_s3 + $0x48] sm:$0xff] %vm32_vm0, %v355_v33  ;;  %v359_v35 = vsel %vm327_vm8, %v311_v23, %v343_v29  ;;  %vm320_vm10 = vcmp.ge.f32.partialorder %v304_v30, 0.0  ;;  %v336_v36 = vmul.f32 0.2, %v304_v30  ;;  %v229_v37 = vpop.f32.mrf.mxu2  ;;  %v239_v38 = vpop.f32.mrf.mxu3 }
  0xc1   :  { %375 = vst.msk [vmem:[%s706_s3 + $0x68] sm:$0xff] %vm32_vm0, %v359_v35  ;;  %v348_v39 = vsel %vm316_vm9, %v300_v26, %v332_v34  ;;  %v253_v40 = vadd.f32 %v229_v37, %v60_v31  ;;  %v257_v41 = vadd.f32 %v239_v38, %v64_v32 }
  0xc2   :  { %364 = vst.msk [vmem:[%s706_s3 + $0x10] sm:$0xff] %vm32_vm0, %v348_v39  ;;  %v352_v42 = vsel %vm320_vm10, %v304_v30, %v336_v36 }
  0xc3   :  { %368 = vst.msk [vmem:[%s706_s3 + $0x30] sm:$0xff] %vm32_vm0, %v352_v42  ;;  %v288_v43 = vld [vmem:[#allocation2 + $0x50] sm:$0xff] }
  0xc4   :  { %v308_v44 = vadd.f32 %v607_v27, %v288_v43  ;;  %v292_v45 = vld [vmem:[#allocation2 + $0x70] sm:$0xff]  ;;  %270 = vst.msk [vmem:[#allocation2 + $0x58] sm:$0xff] %vm32_vm0, %v253_v40 }
  0xc5   :  { %v312_v46 = vadd.f32 %v607_v27, %v292_v45  ;;  %v281_v47 = vld [vmem:[#allocation2 + $0x18] sm:$0xff]  ;;  %274 = vst.msk [vmem:[#allocation2 + $0x78] sm:$0xff] %vm32_vm0, %v257_v41 }
  0xc6   :  { %vm324_vm11 = vcmp.ge.f32.partialorder %v308_v44, 0.0  ;;  %v340_v48 = vmul.f32 0.2, %v308_v44  ;;  %v301_v49 = vadd.f32 %v607_v27, %v281_v47  ;;  %v285_v50 = vld [vmem:[#allocation2 + $0x38] sm:$0xff] }
  0xc7   :  { %vm328_vm12 = vcmp.ge.f32.partialorder %v312_v46, 0.0  ;;  %v344_v51 = vmul.f32 0.2, %v312_v46  ;;  %v305_v52 = vadd.f32 %v607_v27, %v285_v50 }
  0xc8   :  { %v356_v53 = vsel %vm324_vm11, %v308_v44, %v340_v48  ;;  %vm317_vm13 = vcmp.ge.f32.partialorder %v301_v49, 0.0  ;;  %v333_v54 = vmul.f32 0.2, %v301_v49 }
  0xc9   :  { %372 = vst.msk [vmem:[%s706_s3 + $0x50] sm:$0xff] %vm32_vm0, %v356_v53  ;;  %v360_v55 = vsel %vm328_vm12, %v312_v46, %v344_v51  ;;  %vm321_vm14 = vcmp.ge.f32.partialorder %v305_v52, 0.0  ;;  %v337_v56 = vmul.f32 0.2, %v305_v52 }
  0xca   :  { %376 = vst.msk [vmem:[%s706_s3 + $0x70] sm:$0xff] %vm32_vm0, %v360_v55  ;;  %v349_v57 = vsel %vm317_vm13, %v301_v49, %v333_v54 }
  0xcb   :  { %365 = vst.msk [vmem:[%s706_s3 + $0x18] sm:$0xff] %vm32_vm0, %v349_v57  ;;  %v353_v58 = vsel %vm321_vm14, %v305_v52, %v337_v56  ;;  %v289_v59 = vld [vmem:[#allocation2 + $0x58] sm:$0xff] }
  0xcc   :  { %369 = vst.msk [vmem:[%s706_s3 + $0x38] sm:$0xff] %vm32_vm0, %v353_v58  ;;  %v309_v60 = vadd.f32 %v607_v27, %v289_v59  ;;  %v293_v61 = vld [vmem:[#allocation2 + $0x78] sm:$0xff] }
  0xcd   :  { %v313_v62 = vadd.f32 %v607_v27, %v293_v61 }
  0xce   :  { %vm325_vm15 = vcmp.ge.f32.partialorder %v309_v60, 0.0  ;;  %v341_v63 = vmul.f32 0.2, %v309_v60 }
  0xcf   :  { %vm329_vm1 = vcmp.ge.f32.partialorder %v313_v62, 0.0  ;;  %v345_v0 = vmul.f32 0.2, %v313_v62 }
  0xd0   :  { %v357_v1 = vsel %vm325_vm15, %v309_v60, %v341_v63 }
  0xd1   :  { %373 = vst.msk [vmem:[%s706_s3 + $0x58] sm:$0xff] %vm32_vm0, %v357_v1  ;;  %v361_v2 = vsel %vm329_vm1, %v313_v62, %v345_v0 }
  0xd2   :  { %377 = vst.msk [vmem:[%s706_s3 + $0x78] sm:$0xff] %vm32_vm0, %v361_v2 }
  0xd3   :  { %382 = vsyncpa [#allocation4], 1 }

// kernel: discriminator_forward.6
= control target key start
LH: loop header
LB: loop body
LE: loop exit
PB: predicated region body
PF: predicated region fallthrough
CT: control target
= control target key end

     0   :  { %9 = vsyncpa [#allocation7], 0  ;;  %s1499_s0 = inlined_call_operand.vmem [shape: bf16[32,1024], index: 0, kind: input, shape index: {}]   ;;  %s1500_s1 = inlined_call_operand.vmem [shape: bf16[1024,128], index: 1, kind: input, shape index: {}]   ;;  %s1501_s2 = inlined_call_operand.hbm [shape: f32[1,128], index: 2, kind: input, shape index: {}]   ;;  %s1502_s3 = inlined_call_operand.hbm [shape: f32[1,128], index: 3, kind: input, shape index: {}]   ;;  %s1503_s4 = inlined_call_operand.vmem [shape: f32[32,128], index: 4, kind: output, shape index: {}]  }
   0x1   :  { %10 = vsyncpa [#allocation9], 0  ;;  %s1305_s15 = smov 0   ;;  %s1307_s16 = smov 0  }
   0x2   :  { %s1309_s17 = smov 0   ;;  %s1311_s18 = smov 0  }
   0x3   :  { %s1313_s19 = smov 0  }
   0x4 LB: > { %s880_s20 = sadd.s32 4294967295, %s1274_s19   ;;  %s25_s21 = sadd.s32 1, %s1270_s18  ;;  %s1274_s19 = sphi %s1313_s19, %s16_s19   ;;  %s1270_s18 = sphi %s1311_s18, %s1510_s18   ;;  %s1266_s17 = sphi %s1309_s17, %s1509_s17   ;;  %s1262_s16 = sphi %s1307_s16, %s1508_s16   ;;  %s1258_s15 = sphi %s1305_s15, %s1507_s15  }
   0x5   : > { %p26_p0 = scmp.ge.s32.totalorder %s25_s21, 2  ;;  %s37_s22 = sadd.s32 1, %s1262_s16 }
   0x6   : > { %p44_p1 = scmp.ne.s32.totalorder %s1262_s16, %s1258_s15  ;;  %p45_p2 = scmp.eq.s32.totalorder %s1274_s19, 0 }
   0x7   : > { %s1512_s21 = smov (%p26_p0, %s25_s21), 0  ;;  %p881_p4 = scmp.ge.s32.totalorder %s1274_s19, 1 }
   0x8   : > { %p1338_p3 = por %p45_p2, %p44_p1  ;;  %s33_s24 = ssub.s32 %s1270_s18, %s1512_s21 }
   0x9   : > { %p150_p5 = scmp.lt.s32.totalorder %s1274_s19, 3  ;;  %p35_p6 = scmp.eq.s32.totalorder %s33_s24, 0 }
   0xa   : > { %p1350_p8 = scmp.eq.s32.totalorder %s880_s20, 0  ;;  %s162_s30 = sshll.u32 %s1501_s2, 4  ;;  %s163_s30 = int_to_ptr.hbm [resolvable:$true] %s162_s30 }
   0xb   : > { %p1346_p7 = pnand %p881_p4, %p150_p5  ;;  %s1276_s5 = smov [#allocation6]  }
   0xc   : > { %s1355_s27 = scalar_select %p35_p6, %s1262_s16, %s37_s22  }
   0xd   : > { %p1111_p9 = pneg %p1346_p7  ;;  %s164_s6 = sshll.u32 %s1276_s5, 4  ;;  %s165_s6 = int_to_ptr.vmem [resolvable:$true] %s164_s6 }
   0xe   : > { %s174_s9 = sshll.u32 %s1502_s3, 4  ;;  %s1277_s10 = smov [#allocation8]   ;;  %s175_s9 = int_to_ptr.hbm [resolvable:$true] %s174_s9 }
   0xf   : > { %p1112_p10 = pnand %p1350_p8, %p1111_p9  ;;  %s176_s11 = sshll.u32 %s1277_s10, 4  ;;  %s177_s11 = int_to_ptr.vmem [resolvable:$true] %s176_s11 }
  0x10   : > { %p884_p11 = scmp.ge.s32.totalorder %s1274_s19, 2 }
  0x11   : > { %1114 = dma.hbm_to_vmem [thread:$0]  (!%p1112_p10), %s163_s30, 16, %s165_s6, [#allocation7]  }
  0x12   : > { %1117 = dma.hbm_to_vmem [thread:$0]  (!%p1112_p10), %s175_s9, 16, %s177_s11, [#allocation9]  }
  0x13   : > { %183 = sbr.rel (%p884_p11) target bundleno = 36 (0x24), region = 24 }
  0x18   : > { %186 = sbr.rel (!%p1338_p3) target bundleno = 36 (0x24), region = 28  ;;  %s188_s12 = sand.u32 (%p1338_p3), 1, %s1262_s16  }
  0x19   : > { %s1060_s13 = sshll.u32 (%p1338_p3), %s1270_s18, 4  ;;  %s885_s14 = sshll.u32 (%p1338_p3), %s188_s12, 6 }
  0x1a   : > { %s196_s24 = scalar_lea.vmem (%p1338_p3), %s1499_s0, %s1060_s13  ;;  %s190_s28 = scalar_lea.vmem (%p1338_p3), [#allocation5], %s885_s14 }
  0x1b   : > { %v209_v0 = vld [vmem:[%s196_s24] sm:$0xff] (%p1338_p3)  ;;  %v211_v1 = vld [vmem:[%s196_s24 + $0x8] sm:$0xff] (%p1338_p3) }
  0x1c   : > { %v213_v2 = vld [vmem:[%s196_s24 + $0x20] sm:$0xff] (%p1338_p3)  ;;  %210 = vst [vmem:[%s190_s28] sm:$0xff] (%p1338_p3), %v209_v0  ;;  %v215_v3 = vld [vmem:[%s196_s24 + $0x28] sm:$0xff] (%p1338_p3) }
  0x1d   : > { %212 = vst [vmem:[%s190_s28 + $0x8] sm:$0xff] %v211_v1  ;;  %v217_v4 = vld [vmem:[%s196_s24 + $0x40] sm:$0xff]  ;;  %v219_v5 = vld [vmem:[%s196_s24 + $0x48] sm:$0xff] }
  0x1e   : > { %214 = vst [vmem:[%s190_s28 + $0x10] sm:$0xff] %v213_v2  ;;  %v221_v6 = vld [vmem:[%s196_s24 + $0x60] sm:$0xff]  ;;  %v223_v7 = vld [vmem:[%s196_s24 + $0x68] sm:$0xff] }
  0x1f   : > { %216 = vst [vmem:[%s190_s28 + $0x18] sm:$0xff] %v215_v3 }
  0x20   : > { %218 = vst [vmem:[%s190_s28 + $0x20] sm:$0xff] %v217_v4 }
  0x21   : > { %220 = vst [vmem:[%s190_s28 + $0x28] sm:$0xff] %v219_v5 }
  0x22   : > { %222 = vst [vmem:[%s190_s28 + $0x30] sm:$0xff] %v221_v6 }
  0x23   : > { %224 = vst [vmem:[%s190_s28 + $0x38] sm:$0xff] %v223_v7 }
  0x24 PF: > { %242 = sbr.rel (%p1346_p7) target bundleno = 335 (0x14f), region = 55  ;;  %s245_s23 = sand.u32 (!%p1346_p7), 1, %s1258_s15  }
  0x25   : > { %s889_s29 = sshll.u32 (!%p1346_p7), %s245_s23, 6 }
  0x26   : > { %s1378_s30 = scalar_lea.vmem (!%p1346_p7), [#allocation5], %s889_s29 }
  0x29   : > { %1249 = dma.done.wait (%p1350_p8), [#allocation7], 16  }
  0x2a   : > { %1251 = vsyncadd (%p1350_p8), [#allocation7], 4294967280 }
  0x2b   : > { %1253 = dma.done.wait (%p1350_p8), [#allocation9], 16  }
  0x2c   : > { %1255 = vsyncadd (%p1350_p8), [#allocation9], 4294967280  ;;  %s892_s25 = sshll.u32 %s1266_s17, 6  ;;  %p288_p12 = scmp.eq.s32.totalorder %s1266_s17, 0 }
  0x2d   : > { %p283_p13 = scmp.lt.s32.totalorder %s892_s25, 127  ;;  %p894_p0 = scmp.ne.s32.totalorder %s1266_s17, 0 }
  0x2f   : > { %s1514_s25 = smov (!%p283_p13, %s892_s25), 127  ;;  %291 = sbr.rel (%p894_p0) target bundleno = 57 (0x39), region = 71 }
  0x30   : > { %s893_s15 = sshll.u32 %s1514_s25, 2 }
  0x31   : > { %s1393_s7 = scalar_lea.vmem %s1500_s1, %s893_s15 }
  0x34   : > { %v1278_v8 = vmov 0.0  }
  0x35   : > { %292 = vst [vmem:[#allocation2 + $0x10] sm:$0xff] %v1278_v8 }
  0x36   : > { %293 = vst [vmem:[#allocation2] sm:$0xff] %v1278_v8 }
  0x37   : > { %294 = vst [vmem:[#allocation2 + $0x18] sm:$0xff] %v1278_v8 }
  0x38   : > { %295 = vst [vmem:[#allocation2 + $0x8] sm:$0xff] %v1278_v8 }
  0x39 PF: > { %300 = sbr.rel (!%p288_p12) target bundleno = 62 (0x3e), region = 75  ;;  %v1279_v9 = vmov (%p288_p12), 0.0  }
  0x3a   : > { %301 = vst [vmem:[#allocation3] sm:$0x1] (%p288_p12), %v1279_v9 }
  0x3b   : > { %302 = vst [vmem:[#allocation4] sm:$0x1] (%p288_p12), %v1279_v9 }
  0x3e PF: > { %v1077_v10 = vld [vmem:[%s1393_s7 + $0x38] sm:$0xff]  ;;  %v1076_v14 = vld [vmem:[%s1393_s7 + $0x30] sm:$0xff]  ;;  %v1075_v18 = vld [vmem:[%s1393_s7 + $0x28] sm:$0xff]  ;;  %p695_p1 = scmp.eq.s32.totalorder %s1266_s17, 1  ;;  %p1056_p2 = scmp.ne.s32.totalorder %s1266_s17, 1 }
  0x3f   : > { %v1085_v11 = vld [vmem:[%s1393_s7 + $0x78] sm:$0xff]  ;;  %611 = vmatpush.bf16.msra.mxu0 %v1077_v10  ;;  %v1084_v15 = vld [vmem:[%s1393_s7 + $0x70] sm:$0xff]  ;;  %v1083_v19 = vld [vmem:[%s1393_s7 + $0x68] sm:$0xff] }
  0x40   : > { %v1093_v12 = vld [vmem:[%s1393_s7 + $0xb8] sm:$0xff]  ;;  %630 = vmatpush.bf16.msra.mxu1 %v1085_v11  ;;  %v1092_v16 = vld [vmem:[%s1393_s7 + $0xb0] sm:$0xff]  ;;  %v1091_v20 = vld [vmem:[%s1393_s7 + $0xa8] sm:$0xff] }
  0x41   : > { %v1101_v13 = vld [vmem:[%s1393_s7 + $0xf8] sm:$0xff]  ;;  %649 = vmatpush.bf16.msra.mxu2 %v1093_v12  ;;  %v1100_v17 = vld [vmem:[%s1393_s7 + $0xf0] sm:$0xff]  ;;  %v1099_v21 = vld [vmem:[%s1393_s7 + $0xe8] sm:$0xff] }
  0x42   : > { %668 = vmatpush.bf16.msra.mxu3 %v1101_v13  ;;  %v1074_v22 = vld [vmem:[%s1393_s7 + $0x20] sm:$0xff]  ;;  %v1073_v26 = vld [vmem:[%s1393_s7 + $0x18] sm:$0xff]  ;;  %v1072_v30 = vld [vmem:[%s1393_s7 + $0x10] sm:$0xff] }
  0x43   : > { %612 = vmatpush.bf16.msra.mxu0 %v1076_v14  ;;  %v1082_v23 = vld [vmem:[%s1393_s7 + $0x60] sm:$0xff]  ;;  %v1081_v27 = vld [vmem:[%s1393_s7 + $0x58] sm:$0xff]  ;;  %v1080_v31 = vld [vmem:[%s1393_s7 + $0x50] sm:$0xff] }
  0x44   : > { %631 = vmatpush.bf16.msra.mxu1 %v1084_v15  ;;  %v1090_v24 = vld [vmem:[%s1393_s7 + $0xa0] sm:$0xff]  ;;  %v1089_v28 = vld [vmem:[%s1393_s7 + $0x98] sm:$0xff]  ;;  %v1088_v32 = vld [vmem:[%s1393_s7 + $0x90] sm:$0xff] }
  0x45   : > { %650 = vmatpush.bf16.msra.mxu2 %v1092_v16  ;;  %v1098_v25 = vld [vmem:[%s1393_s7 + $0xe0] sm:$0xff]  ;;  %v1097_v29 = vld [vmem:[%s1393_s7 + $0xd8] sm:$0xff]  ;;  %v1096_v33 = vld [vmem:[%s1393_s7 + $0xd0] sm:$0xff] }
  0x46   : > { %669 = vmatpush.bf16.msra.mxu3 %v1100_v17  ;;  %v1071_v34 = vld [vmem:[%s1393_s7 + $0x8] sm:$0xff]  ;;  %v1070_v38 = vld [vmem:[%s1393_s7] sm:$0xff]  ;;  %v1064_v43 = vld [vmem:[%s1378_s30 + $0xc] sm:$0xf0] }
  0x47   : > { %613 = vmatpush.bf16.msra.mxu0 %v1075_v18  ;;  %v1079_v35 = vld [vmem:[%s1393_s7 + $0x48] sm:$0xff]  ;;  %v1078_v39 = vld [vmem:[%s1393_s7 + $0x40] sm:$0xff]  ;;  %v900_v45 = vld [vmem:[%s1378_s30 + $0x10] sm:$0xf0] }
  0x48   : > { %632 = vmatpush.bf16.msra.mxu1 %v1083_v19  ;;  %v1087_v36 = vld [vmem:[%s1393_s7 + $0x88] sm:$0xff]  ;;  %v1086_v40 = vld [vmem:[%s1393_s7 + $0x80] sm:$0xff]  ;;  %v1065_v47 = vld [vmem:[%s1378_s30 + $0x14] sm:$0xf0] }
  0x49   : > { %651 = vmatpush.bf16.msra.mxu2 %v1091_v20  ;;  %v1095_v37 = vld [vmem:[%s1393_s7 + $0xc8] sm:$0xff]  ;;  %v1094_v41 = vld [vmem:[%s1393_s7 + $0xc0] sm:$0xff]  ;;  %v1068_v55 = vld [vmem:[%s1378_s30 + $0x2c] sm:$0xf0] }
  0x4a   : > { %670 = vmatpush.bf16.msra.mxu3 %v1099_v21  ;;  %v898_v42 = vld [vmem:[%s1378_s30] sm:$0xf]  ;;  %v1062_v44 = vld [vmem:[%s1378_s30 + $0x4] sm:$0xf]  ;;  %v906_v46 = vld [vmem:[%s1378_s30 + $0x8] sm:$0xf] }
  0x4b   : > { %614 = vmatpush.bf16.msra.mxu0 %v1074_v22  ;;  %v1063_v48 = vld [vmem:[%s1378_s30 + $0xc] sm:$0xf]  ;;  %v908_v49 = vld [vmem:[%s1378_s30 + $0x18] sm:$0xf0]  ;;  %v899_v50 = vor.u32 %v1064_v43, %v898_v42  ;;  %v903_v51 = vor.u32 %v1062_v44, %v900_v45  ;;  %v907_v52 = vor.u32 %v1065_v47, %v906_v46  ;;  %v914_v54 = vld [vmem:[%s1378_s30 + $0x20] sm:$0xf] }
  0x4c   : > { %633 = vmatpush.bf16.msra.mxu1 %v1082_v23  ;;  %v911_v53 = vor.u32 %v1063_v48, %v908_v49  ;;  %v1066_v56 = vld [vmem:[%s1378_s30 + $0x24] sm:$0xf]  ;;  %v916_v57 = vld [vmem:[%s1378_s30 + $0x30] sm:$0xf0]  ;;  %v922_v58 = vld [vmem:[%s1378_s30 + $0x28] sm:$0xf]  ;;  %v915_v62 = vor.u32 %v1068_v55, %v914_v54 }
  0x4d   : > { %652 = vmatpush.bf16.msra.mxu2 %v1090_v24  ;;  %v1069_v59 = vld [vmem:[%s1378_s30 + $0x34] sm:$0xf0]  ;;  %v1067_v60 = vld [vmem:[%s1378_s30 + $0x2c] sm:$0xf]  ;;  %v924_v61 = vld [vmem:[%s1378_s30 + $0x38] sm:$0xf0]  ;;  %v919_v63 = vor.u32 %v1066_v56, %v916_v57 }
  0x4e   : > { %671 = vmatpush.bf16.msra.mxu3 %v1098_v25  ;;  %v923_v0 = vor.u32 %v1069_v59, %v922_v58  ;;  %v927_v1 = vor.u32 %v1067_v60, %v924_v61  ;;  %v303_v10 = vld [vmem:[#allocation2 + $0x10] sm:$0xff]  ;;  %v304_v17 = vld [vmem:[#allocation2] sm:$0xff] }
  0x4f   : > { %615 = vmatpush.bf16.msra.mxu0 %v1073_v26  ;;  %v305_v26 = vld [vmem:[#allocation2 + $0x18] sm:$0xff] }
  0x50   : > { %634 = vmatpush.bf16.msra.mxu1 %v1081_v27 }
  0x51   : > { %653 = vmatpush.bf16.msra.mxu2 %v1089_v28 }
  0x52   : > { %672 = vmatpush.bf16.msra.mxu3 %v1097_v29 }
  0x53   : > { %616 = vmatpush.bf16.msra.mxu0 %v1072_v30 }
  0x54   : > { %635 = vmatpush.bf16.msra.mxu1 %v1080_v31 }
  0x55   : > { %654 = vmatpush.bf16.msra.mxu2 %v1088_v32 }
  0x56   : > { %673 = vmatpush.bf16.msra.mxu3 %v1096_v33 }
  0x57   : > { %617 = vmatpush.bf16.msra.mxu0 %v1071_v34  ;;  %v306_v34 = vld [vmem:[#allocation2 + $0x8] sm:$0xff] }
  0x58   : > { %636 = vmatpush.bf16.msra.mxu1 %v1079_v35 }
  0x59   : > { %655 = vmatpush.bf16.msra.mxu2 %v1087_v36 }
  0x5a   : > { %674 = vmatpush.bf16.msra.mxu3 %v1095_v37 }
  0x5b   : > { %618 = vmatpush.bf16.msra.mxu0 %v1070_v38 }
  0x5c   : > { %637 = vmatpush.bf16.msra.mxu1 %v1078_v39 }
  0x5d   : > { %656 = vmatpush.bf16.msra.mxu2 %v1086_v40 }
  0x5e   : > { %675 = vmatpush.bf16.msra.mxu3 %v1094_v41  ;;  %619 = vmatmul.bf16.vlgmr.msra.gmra.mxu0 %v899_v50 }
  0x5f   : > { %638 = vmatmul.bf16.vlgmr.msra.gmra.mxu1 %v903_v51 }
  0x60   : > { %657 = vmatmul.bf16.vlgmr.msra.gmra.mxu2 %v907_v52 }
  0x61   : > { %676 = vmatmul.bf16.vlgmr.msra.gmra.mxu3 %v911_v53 }
  0x6e   : > { %624 = vmatmul.bf16.gmra.mxu0 %v915_v62 }
  0x6f   : > { %643 = vmatmul.bf16.gmra.mxu1 %v919_v63 }
  0x70   : > { %662 = vmatmul.bf16.gmra.mxu2 %v923_v0 }
  0x71   : > { %681 = vmatmul.bf16.gmra.mxu3 %v927_v1 }
  0xdb   : > { %v620_v2 = vpop.f32.mrf.mxu0 }
  0xdc   : > { %v639_v3 = vpop.f32.mrf.mxu1 }
  0xdd   : > { %v640_v4 = vadd.f32 %v639_v3, %v620_v2 }
  0xe3   : > { %v658_v5 = vpop.f32.mrf.mxu2  ;;  %v622_v8 = vpop.f32.mrf.mxu0 }
  0xe4   : > { %v677_v6 = vpop.f32.mrf.mxu3  ;;  %v659_v7 = vadd.f32 %v658_v5, %v640_v4  ;;  %v641_v9 = vpop.f32.mrf.mxu1 }
  0xe5   : > { %v642_v13 = vadd.f32 %v641_v9, %v622_v8 }
  0xe6   : > { %v678_v11 = vadd.f32 %v677_v6, %v659_v7 }
  0xe8   : > { %v687_v12 = vadd.f32 %v678_v11, %v303_v10 }
  0xea   : > { %691 = vst [vmem:[#allocation2 + $0x10] sm:$0xff] %v687_v12 }
  0xeb   : > { %v660_v14 = vpop.f32.mrf.mxu2  ;;  %v625_v18 = vpop.f32.mrf.mxu0 }
  0xec   : > { %v679_v15 = vpop.f32.mrf.mxu3  ;;  %v661_v16 = vadd.f32 %v660_v14, %v642_v13  ;;  %v644_v19 = vpop.f32.mrf.mxu1 }
  0xed   : > { %v645_v22 = vadd.f32 %v644_v19, %v625_v18 }
  0xee   : > { %v680_v20 = vadd.f32 %v679_v15, %v661_v16 }
  0xf0   : > { %v688_v21 = vadd.f32 %v680_v20, %v304_v17 }
  0xf2   : > { %692 = vst [vmem:[#allocation2] sm:$0xff] %v688_v21 }
  0xf3   : > { %v663_v23 = vpop.f32.mrf.mxu2  ;;  %v627_v28 = vpop.f32.mrf.mxu0 }
  0xf4   : > { %v682_v24 = vpop.f32.mrf.mxu3  ;;  %v664_v25 = vadd.f32 %v663_v23, %v645_v22  ;;  %v646_v29 = vpop.f32.mrf.mxu1 }
  0xf5   : > { %v647_v31 = vadd.f32 %v646_v29, %v627_v28 }
  0xf6   : > { %v683_v27 = vadd.f32 %v682_v24, %v664_v25 }
  0xf8   : > { %v689_v30 = vadd.f32 %v683_v27, %v305_v26 }
  0xfa   : > { %693 = vst [vmem:[#allocation2 + $0x18] sm:$0xff] %v689_v30 }
  0xfb   : > { %v665_v32 = vpop.f32.mrf.mxu2 }
  0xfc   : > { %v666_v33 = vadd.f32 %v665_v32, %v647_v31  ;;  %v684_v35 = vpop.f32.mrf.mxu3 }
  0xfe   : > { %v685_v36 = vadd.f32 %v684_v35, %v666_v33  ;;  %698 = sbr.rel (%p1056_p2) target bundleno = 285 (0x11d), region = 79 }
 0x100   : > { %v690_v37 = vadd.f32 %v685_v36, %v306_v34 }
 0x102   : > { %694 = vst [vmem:[#allocation2 + $0x8] sm:$0xff] %v690_v37 }
 0x103   : > { %v699_v38 = vld [vmem:[#allocation2 + $0x10] sm:$0xff]  ;;  %v700_v39 = vld [vmem:[#allocation2] sm:$0xff]  ;;  %v701_v40 = vld [vmem:[#allocation2 + $0x18] sm:$0xff] }
 0x104   : > { %705 = vst [vmem:[%s1503_s4] sm:$0xff] %v699_v38  ;;  %v722_v41 = vmul.f32 %v699_v38, %v699_v38  ;;  %v710_v42 = vadd.f32 %v700_v39, %v699_v38  ;;  %v723_v43 = vmul.f32 %v700_v39, %v700_v39  ;;  %v724_v44 = vmul.f32 %v701_v40, %v701_v40  ;;  %v709_v61 = vld [vmem:[#allocation3] sm:$0x1]  ;;  %v721_v0 = vld [vmem:[#allocation4] sm:$0x1] }
 0x105   : > { %706 = vst [vmem:[%s1503_s4 + $0x8] sm:$0xff] %v700_v39 }
 0x106   : > { %v726_v46 = vadd.f32 %v723_v43, %v722_v41  ;;  %707 = vst [vmem:[%s1503_s4 + $0x10] sm:$0xff] %v701_v40  ;;  %v711_v47 = vadd.f32 %v710_v42, %v701_v40 }
 0x108   : > { %v727_v49 = vadd.f32 %v726_v46, %v724_v44 }
 0x109   : > { %v702_v45 = vld [vmem:[#allocation2 + $0x8] sm:$0xff] }
 0x10a   : > { %v725_v48 = vmul.f32 %v702_v45, %v702_v45  ;;  %708 = vst [vmem:[%s1503_s4 + $0x18] sm:$0xff] %v702_v45  ;;  %v712_v50 = vadd.f32 %v711_v47, %v702_v45 }
 0x10c   : > { %v713_v51 = vrot.slane %v712_v50, 4  ;;  %v728_v52 = vadd.f32 %v727_v49, %v725_v48 }
 0x10e   : > { %v714_v53 = vadd.f32 %v713_v51, %v712_v50  ;;  %v729_v54 = vrot.slane %v728_v52, 4 }
 0x110   : > { %v715_v55 = vrot.slane %v714_v53, 2  ;;  %v730_v56 = vadd.f32 %v729_v54, %v728_v52 }
 0x112   : > { %v716_v57 = vadd.f32 %v715_v55, %v714_v53  ;;  %v731_v58 = vrot.slane %v730_v56, 2 }
 0x114   : > { %v717_v59 = vrot.slane %v716_v57, 1  ;;  %v732_v60 = vadd.f32 %v731_v58, %v730_v56 }
 0x116   : > { %v718_v62 = vadd.f32 %v717_v59, %v716_v57  ;;  %v733_v63 = vrot.slane %v732_v60, 1 }
 0x118   : > { %v719_v1 = vadd.f32 %v718_v62, %v709_v61  ;;  %v734_v2 = vadd.f32 %v733_v63, %v732_v60 }
 0x11a   : > { %720 = vst [vmem:[#allocation3] sm:$0x1] %v719_v1  ;;  %v735_v3 = vadd.f32 %v734_v2, %v721_v0 }
 0x11c   : > { %736 = vst [vmem:[#allocation4] sm:$0x1] %v735_v3 }
 0x11d PF: > { %740 = sbr.rel (!%p695_p1) target bundleno = 335 (0x14f), region = 83  ;;  %v748_v17 = vld [vmem:[#allocation6] sm:$0x1] (%p695_p1)  ;;  %v761_v21 = vld [vmem:[#allocation8] sm:$0x1] (%p695_p1)  ;;  %v765_v23 = vld [vmem:[%s1503_s4 + $0x8] sm:$0xff] (%p695_p1) }
 0x11e   : > { %v764_v22 = vld [vmem:[%s1503_s4] sm:$0xff] (%p695_p1)  ;;  %v766_v24 = vld [vmem:[%s1503_s4 + $0x10] sm:$0xff] (%p695_p1)  ;;  %v767_v27 = vld [vmem:[%s1503_s4 + $0x18] sm:$0xff] (%p695_p1) }
 0x121   : > { %v741_v4 = vld [vmem:[#allocation3] sm:$0x1] (%p695_p1) }
 0x122   : > { %v742_v6 = vmul.f32 0.03125, %v741_v4 }
 0x123   : > { %v743_v5 = vld [vmem:[#allocation4] sm:$0x1] }
 0x124   : > { %v744_v7 = vmul.f32 0.03125, %v743_v5  ;;  %v745_v8 = vmul.f32 %v742_v6, %v742_v6 }
 0x126   : > { %v746_v9 = vsub.f32 %v744_v7, %v745_v8 }
 0x128   : > { %v747_v10 = vmax.f32 %v746_v9, 0.0 }
 0x12a   : > { %v749_v11 = vadd.f32 1e-05, %v747_v10 }
 0x12c   : > { %1166 = vrsqrt.f32 %v749_v11  ;;  %vm756_vm0 = vweird.f32 %v749_v11 }
 0x132   : > { %v1167_v12 = vpop.eup %1166 }
 0x133   : > { %v751_v13 = vmul.f32 %v1167_v12, %v749_v11  ;;  %vm757_vm1 = vweird.f32 %v1167_v12 }
 0x134   : > { %vm758_vm2 = vmor %vm756_vm0, %vm757_vm1 }
 0x135   : > { %v752_v14 = vmul.f32 %v1167_v12, %v751_v13 }
 0x137   : > { %v753_v15 = vmul.f32 0.5, %v752_v14 }
 0x139   : > { %v754_v16 = vsub.f32 1.5, %v753_v15 }
 0x13b   : > { %v755_v18 = vmul.f32 %v1167_v12, %v754_v16 }
 0x13d   : > { %v759_v19 = vsel %vm758_vm2, %v1167_v12, %v755_v18 }
 0x13e   : > { %v760_v20 = vmul.f32 %v759_v19, %v748_v17 }
 0x140   : > { %v762_v25 = vmul.f32 %v760_v20, %v742_v6  ;;  %v769_v26 = vperm.slane %v760_v20, 0 }
 0x142   : > { %v763_v28 = vsub.f32 %v761_v21, %v762_v25  ;;  %v771_v29 = vmul.f32 %v769_v26, %v764_v22  ;;  %v772_v30 = vmul.f32 %v769_v26, %v765_v23  ;;  %v773_v31 = vmul.f32 %v769_v26, %v766_v24 }
 0x143   : > { %v774_v32 = vmul.f32 %v769_v26, %v767_v27 }
 0x144   : > { %v776_v33 = vperm.slane %v763_v28, 0 }
 0x146   : > { %v778_v34 = vadd.f32 %v776_v33, %v771_v29  ;;  %v779_v35 = vadd.f32 %v776_v33, %v772_v30  ;;  %v780_v36 = vadd.f32 %v776_v33, %v773_v31  ;;  %v781_v37 = vadd.f32 %v776_v33, %v774_v32 }
 0x148   : > { %vm782_vm3 = vcmp.ge.f32.partialorder %v778_v34, 0.0  ;;  %v786_v38 = vmul.f32 0.2, %v778_v34  ;;  %vm783_vm4 = vcmp.ge.f32.partialorder %v779_v35, 0.0  ;;  %v787_v39 = vmul.f32 0.2, %v779_v35 }
 0x149   : > { %vm784_vm5 = vcmp.ge.f32.partialorder %v780_v36, 0.0  ;;  %v788_v40 = vmul.f32 0.2, %v780_v36  ;;  %vm785_vm6 = vcmp.ge.f32.partialorder %v781_v37, 0.0  ;;  %v789_v41 = vmul.f32 0.2, %v781_v37 }
 0x14a   : > { %v790_v42 = vsel %vm782_vm3, %v778_v34, %v786_v38  ;;  %v791_v43 = vsel %vm783_vm4, %v779_v35, %v787_v39 }
 0x14b   : > { %794 = vst [vmem:[%s1503_s4] sm:$0xff] %v790_v42  ;;  %v792_v44 = vsel %vm784_vm5, %v780_v36, %v788_v40  ;;  %v793_v45 = vsel %vm785_vm6, %v781_v37, %v789_v41 }
 0x14c   : > { %795 = vst [vmem:[%s1503_s4 + $0x8] sm:$0xff] %v791_v43 }
 0x14d   : > { %796 = vst [vmem:[%s1503_s4 + $0x10] sm:$0xff] %v792_v44 }
 0x14e   : > { %797 = vst [vmem:[%s1503_s4 + $0x18] sm:$0xff] %v793_v45 }
 0x14f PF: > { %s16_s19 = sadd.s32 1, %s1274_s19   ;;  %s1507_s15 = smov %s1262_s16 }
 0x150   : > { %p13_p3 = scmp.ge.s32.totalorder %s16_s19, 4   ;;  %s1508_s16 = smov %s1355_s27 }
 0x151   : > { %s1509_s17 = smov %s1270_s18  ;;  %s1510_s18 = smov %s1512_s21 }
 0x152   :  { %15 = sbr.rel (!%p13_p3) target bundleno = 4 (0x4), region = 119 }
 0x157   :  { %809 = vsyncpa [#allocation7], 1 }
 0x158   :  { %811 = vsyncpa [#allocation7 + $0x1], 1 }
 0x159   :  { %812 = vsyncpa [#allocation9], 1 }

// kernel: discriminator_forward.7
= control target key start
LH: loop header
LB: loop body
LE: loop exit
PB: predicated region body
PF: predicated region fallthrough
CT: control target
= control target key end

     0   :  { %s1351_s15 = smov 0   ;;  %s1353_s16 = smov 0   ;;  %s1568_s0 = inlined_call_operand.vmem [shape: bf16[8,2048], index: 0, kind: input, shape index: {}]   ;;  %s1569_s1 = inlined_call_operand.vmem [shape: bf16[2048,256], index: 1, kind: input, shape index: {}]   ;;  %s1570_s2 = inlined_call_operand.vmem [shape: f32[1,256], index: 2, kind: input, shape index: {}]   ;;  %s1571_s3 = inlined_call_operand.vmem [shape: f32[1,256], index: 3, kind: input, shape index: {}]   ;;  %s1572_s4 = inlined_call_operand.vmem [shape: f32[8,256], index: 4, kind: output, shape index: {}]  }
   0x1   :  { %s1355_s17 = smov 0  }
   0x2 LB: > { %s23_s18 = sadd.s32 1, %s1318_s16  ;;  %p937_p0 = scmp.ge.s32.totalorder %s1322_s17, 1  ;;  %s1322_s17 = sphi %s1355_s17, %s14_s17   ;;  %s1318_s16 = sphi %s1353_s16, %s1574_s16   ;;  %s1314_s15 = sphi %s1351_s15, %s1573_s15  }
   0x3   : > { %p24_p1 = scmp.ge.s32.totalorder %s23_s18, 4  ;;  %p188_p2 = scmp.lt.s32.totalorder %s1322_s17, 5 }
   0x5   : > { %s1576_s18 = smov (%p24_p1, %s23_s18), 0  ;;  %p189_p3 = pnand %p937_p0, %p188_p2 }
   0x6   : > { %s938_s19 = sshll.u32 (!%p189_p3), %s1314_s15, 2  ;;  %s940_s20 = sshll.u32 (!%p189_p3), %s1314_s15, 6 }
   0x7   : > { %192 = sbr.rel (%p189_p3) target bundleno = 310 (0x136), region = 36  ;;  %p222_p4 = scmp.lt.s32.totalorder (!%p189_p3), %s938_s19, 15 }
   0x8   : > { %p230_p5 = scmp.lt.s32.totalorder (!%p189_p3), %s940_s20, 255  ;;  %p236_p6 = scmp.eq.s32.totalorder (!%p189_p3), %s1314_s15, 0 }
   0x9   : > { %p943_p7 = scmp.ne.s32.totalorder (!%p189_p3), %s1314_s15, 0 }
   0xc   : > { %s1578_s19 = smov (!%p222_p4, %s938_s19), 15  ;;  %s1580_s20 = smov (!%p230_p5, %s940_s20), 255 }
   0xd   : > { %s939_s21 = sshll.u32 %s1578_s19, 2  ;;  %s1205_s25 = sshll.u32 %s1580_s20, 3 }
   0xe   : > { %s1377_s24 = scalar_lea.vmem %s1568_s0, %s939_s21  ;;  %s1382_s28 = scalar_lea.vmem %s1569_s1, %s1205_s25 }
   0xf   : > { %239 = sbr.rel (%p943_p7) target bundleno = 23 (0x17), region = 40 }
  0x14   : > { %v1324_v0 = vmov 0.0  }
  0x15   : > { %240 = vst [vmem:[#allocation2] sm:$0xff] %v1324_v0 }
  0x16   : > { %241 = vst [vmem:[#allocation2 + $0x8] sm:$0xff] %v1324_v0 }
  0x17 PF: > { %246 = sbr.rel (!%p236_p6) target bundleno = 28 (0x1c), region = 44  ;;  %v247_v1 = vlaneseq (%p236_p6)  ;;  %v1325_v2 = vmov (%p236_p6), 0.0  }
  0x19   : > { %vm249_vm0 = vcmp.lt.s32.totalorder (%p236_p6), %v247_v1, 256 }
  0x1a   : > { %251 = vst.msk [vmem:[#allocation3] sm:$0x3] (%p236_p6), %vm249_vm0, %v1325_v2 }
  0x1b   : > { %252 = vst.msk [vmem:[#allocation4] sm:$0x3] (%p236_p6), %vm249_vm0, %v1325_v2 }
  0x1c PF: > { %v1003_v3 = vld [vmem:[%s1382_s28 + $0x70] sm:$0xf]  ;;  %v1222_v4 = vld [vmem:[%s1382_s28 + $0x74] sm:$0xf0]  ;;  %v995_v14 = vld [vmem:[%s1382_s28 + $0x60] sm:$0xf] }
  0x1d   : > { %v1067_v5 = vld [vmem:[%s1382_s28 + $0xf0] sm:$0xf]  ;;  %v1004_v6 = vor.u32 %v1222_v4, %v1003_v3  ;;  %v1238_v7 = vld [vmem:[%s1382_s28 + $0xf4] sm:$0xf0]  ;;  %v1220_v16 = vld [vmem:[%s1382_s28 + $0x64] sm:$0xf0] }
  0x1e   : > { %v1131_v8 = vld [vmem:[%s1382_s28 + $0x170] sm:$0xf]  ;;  %v1254_v9 = vld [vmem:[%s1382_s28 + $0x174] sm:$0xf0]  ;;  %v1068_v10 = vor.u32 %v1238_v7, %v1067_v5  ;;  %v1059_v17 = vld [vmem:[%s1382_s28 + $0xe0] sm:$0xf]  ;;  %v996_v19 = vor.u32 %v1220_v16, %v995_v14 }
  0x1f   : > { %v1132_v11 = vor.u32 %v1254_v9, %v1131_v8  ;;  %v1195_v12 = vld [vmem:[%s1382_s28 + $0x1f0] sm:$0xf]  ;;  %v1270_v13 = vld [vmem:[%s1382_s28 + $0x1f4] sm:$0xf0]  ;;  %655 = vmatpush.bf16.msra.mxu0 %v1004_v6  ;;  %v1236_v18 = vld [vmem:[%s1382_s28 + $0xe4] sm:$0xf0] }
  0x20   : > { %v1196_v15 = vor.u32 %v1270_v13, %v1195_v12  ;;  %668 = vmatpush.bf16.msra.mxu1 %v1068_v10  ;;  %v1060_v20 = vor.u32 %v1236_v18, %v1059_v17  ;;  %v1123_v21 = vld [vmem:[%s1382_s28 + $0x160] sm:$0xf]  ;;  %v1252_v22 = vld [vmem:[%s1382_s28 + $0x164] sm:$0xf0]  ;;  %v987_v26 = vld [vmem:[%s1382_s28 + $0x50] sm:$0xf] }
  0x21   : > { %681 = vmatpush.bf16.msra.mxu2 %v1132_v11  ;;  %v1187_v23 = vld [vmem:[%s1382_s28 + $0x1e0] sm:$0xf]  ;;  %v1124_v24 = vor.u32 %v1252_v22, %v1123_v21  ;;  %v1268_v25 = vld [vmem:[%s1382_s28 + $0x1e4] sm:$0xf0]  ;;  %v1218_v27 = vld [vmem:[%s1382_s28 + $0x54] sm:$0xf0] }
  0x22   : > { %694 = vmatpush.bf16.msra.mxu3 %v1196_v15  ;;  %v1188_v28 = vor.u32 %v1268_v25, %v1187_v23  ;;  %v1051_v29 = vld [vmem:[%s1382_s28 + $0xd0] sm:$0xf]  ;;  %v1234_v30 = vld [vmem:[%s1382_s28 + $0xd4] sm:$0xf0]  ;;  %v988_v32 = vor.u32 %v1218_v27, %v987_v26  ;;  %v979_v38 = vld [vmem:[%s1382_s28 + $0x40] sm:$0xf] }
  0x23   : > { %v1115_v31 = vld [vmem:[%s1382_s28 + $0x150] sm:$0xf]  ;;  %656 = vmatpush.bf16.msra.mxu0 %v996_v19  ;;  %v1250_v33 = vld [vmem:[%s1382_s28 + $0x154] sm:$0xf0]  ;;  %v1052_v36 = vor.u32 %v1234_v30, %v1051_v29  ;;  %v1216_v39 = vld [vmem:[%s1382_s28 + $0x44] sm:$0xf0] }
  0x24   : > { %v1179_v34 = vld [vmem:[%s1382_s28 + $0x1d0] sm:$0xf]  ;;  %v1266_v35 = vld [vmem:[%s1382_s28 + $0x1d4] sm:$0xf0]  ;;  %669 = vmatpush.bf16.msra.mxu1 %v1060_v20  ;;  %v1116_v37 = vor.u32 %v1250_v33, %v1115_v31  ;;  %v1043_v40 = vld [vmem:[%s1382_s28 + $0xc0] sm:$0xf]  ;;  %v980_v47 = vor.u32 %v1216_v39, %v979_v38 }
  0x25   : > { %682 = vmatpush.bf16.msra.mxu2 %v1124_v24  ;;  %v1180_v41 = vor.u32 %v1266_v35, %v1179_v34  ;;  %v1232_v42 = vld [vmem:[%s1382_s28 + $0xc4] sm:$0xf0]  ;;  %v1107_v43 = vld [vmem:[%s1382_s28 + $0x140] sm:$0xf]  ;;  %v971_v50 = vld [vmem:[%s1382_s28 + $0x30] sm:$0xf] }
  0x26   : > { %695 = vmatpush.bf16.msra.mxu3 %v1188_v28  ;;  %v1248_v44 = vld [vmem:[%s1382_s28 + $0x144] sm:$0xf0]  ;;  %v1171_v45 = vld [vmem:[%s1382_s28 + $0x1c0] sm:$0xf]  ;;  %v1044_v48 = vor.u32 %v1232_v42, %v1043_v40  ;;  %v1214_v51 = vld [vmem:[%s1382_s28 + $0x34] sm:$0xf0] }
  0x27   : > { %v1264_v46 = vld [vmem:[%s1382_s28 + $0x1c4] sm:$0xf0]  ;;  %657 = vmatpush.bf16.msra.mxu0 %v988_v32  ;;  %v1108_v49 = vor.u32 %v1248_v44, %v1107_v43  ;;  %v1035_v52 = vld [vmem:[%s1382_s28 + $0xb0] sm:$0xf]  ;;  %v1230_v54 = vld [vmem:[%s1382_s28 + $0xb4] sm:$0xf0]  ;;  %v972_v59 = vor.u32 %v1214_v51, %v971_v50 }
  0x28   : > { %670 = vmatpush.bf16.msra.mxu1 %v1052_v36  ;;  %v1172_v53 = vor.u32 %v1264_v46, %v1171_v45  ;;  %v1099_v55 = vld [vmem:[%s1382_s28 + $0x130] sm:$0xf]  ;;  %v1246_v56 = vld [vmem:[%s1382_s28 + $0x134] sm:$0xf0]  ;;  %v1036_v60 = vor.u32 %v1230_v54, %v1035_v52  ;;  %v963_v62 = vld [vmem:[%s1382_s28 + $0x20] sm:$0xf] }
  0x29   : > { %683 = vmatpush.bf16.msra.mxu2 %v1116_v37  ;;  %v1163_v57 = vld [vmem:[%s1382_s28 + $0x1b0] sm:$0xf]  ;;  %v1262_v58 = vld [vmem:[%s1382_s28 + $0x1b4] sm:$0xf0]  ;;  %v1100_v61 = vor.u32 %v1246_v56, %v1099_v55  ;;  %v1212_v63 = vld [vmem:[%s1382_s28 + $0x24] sm:$0xf0] }
  0x2a   : > { %696 = vmatpush.bf16.msra.mxu3 %v1180_v41  ;;  %v1027_v0 = vld [vmem:[%s1382_s28 + $0xa0] sm:$0xf]  ;;  %v1164_v1 = vor.u32 %v1262_v58, %v1163_v57  ;;  %v1228_v2 = vld [vmem:[%s1382_s28 + $0xa4] sm:$0xf0]  ;;  %v964_v7 = vor.u32 %v1212_v63, %v963_v62  ;;  %v955_v10 = vld [vmem:[%s1382_s28 + $0x10] sm:$0xf] }
  0x2b   : > { %658 = vmatpush.bf16.msra.mxu0 %v980_v47  ;;  %v1091_v3 = vld [vmem:[%s1382_s28 + $0x120] sm:$0xf]  ;;  %v1244_v4 = vld [vmem:[%s1382_s28 + $0x124] sm:$0xf0]  ;;  %v1028_v8 = vor.u32 %v1228_v2, %v1027_v0  ;;  %v1210_v11 = vld [vmem:[%s1382_s28 + $0x14] sm:$0xf0] }
  0x2c   : > { %671 = vmatpush.bf16.msra.mxu1 %v1044_v48  ;;  %v1155_v5 = vld [vmem:[%s1382_s28 + $0x1a0] sm:$0xf]  ;;  %v1260_v6 = vld [vmem:[%s1382_s28 + $0x1a4] sm:$0xf0]  ;;  %v1092_v9 = vor.u32 %v1244_v4, %v1091_v3  ;;  %v1019_v12 = vld [vmem:[%s1382_s28 + $0x90] sm:$0xf]  ;;  %v956_v19 = vor.u32 %v1210_v11, %v955_v10 }
  0x2d   : > { %684 = vmatpush.bf16.msra.mxu2 %v1108_v49  ;;  %v1156_v13 = vor.u32 %v1260_v6, %v1155_v5  ;;  %v1226_v14 = vld [vmem:[%s1382_s28 + $0x94] sm:$0xf0]  ;;  %v1083_v15 = vld [vmem:[%s1382_s28 + $0x110] sm:$0xf]  ;;  %v947_v20 = vld [vmem:[%s1382_s28] sm:$0xf] }
  0x2e   : > { %697 = vmatpush.bf16.msra.mxu3 %v1172_v53  ;;  %v1242_v16 = vld [vmem:[%s1382_s28 + $0x114] sm:$0xf0]  ;;  %v1147_v17 = vld [vmem:[%s1382_s28 + $0x190] sm:$0xf]  ;;  %v1208_v21 = vld [vmem:[%s1382_s28 + $0x4] sm:$0xf0]  ;;  %v1020_v23 = vor.u32 %v1226_v14, %v1019_v12 }
  0x2f   : > { %659 = vmatpush.bf16.msra.mxu0 %v972_v59  ;;  %v1258_v18 = vld [vmem:[%s1382_s28 + $0x194] sm:$0xf0]  ;;  %v1011_v22 = vld [vmem:[%s1382_s28 + $0x80] sm:$0xf]  ;;  %v1084_v24 = vor.u32 %v1242_v16, %v1083_v15  ;;  %v1224_v25 = vld [vmem:[%s1382_s28 + $0x84] sm:$0xf0]  ;;  %v948_v35 = vor.u32 %v1208_v21, %v947_v20 }
  0x30   : > { %672 = vmatpush.bf16.msra.mxu1 %v1036_v60  ;;  %v1075_v26 = vld [vmem:[%s1382_s28 + $0x100] sm:$0xf]  ;;  %v1240_v27 = vld [vmem:[%s1382_s28 + $0x104] sm:$0xf0]  ;;  %v1148_v28 = vor.u32 %v1258_v18, %v1147_v17  ;;  %v1221_v31 = vld [vmem:[%s1382_s28 + $0x74] sm:$0xf]  ;;  %v1012_v40 = vor.u32 %v1224_v25, %v1011_v22 }
  0x31   : > { %685 = vmatpush.bf16.msra.mxu2 %v1100_v61  ;;  %v1139_v29 = vld [vmem:[%s1382_s28 + $0x180] sm:$0xf]  ;;  %v1256_v30 = vld [vmem:[%s1382_s28 + $0x184] sm:$0xf0]  ;;  %v1005_v32 = vld [vmem:[%s1382_s28 + $0x78] sm:$0xf0]  ;;  %v1076_v41 = vor.u32 %v1240_v27, %v1075_v26 }
  0x32   : > { %698 = vmatpush.bf16.msra.mxu3 %v1164_v1  ;;  %v1237_v33 = vld [vmem:[%s1382_s28 + $0xf4] sm:$0xf]  ;;  %v256_v34 = vld [vmem:[%s1377_s24 + $0x8] sm:$0xff]  ;;  %v1069_v36 = vld [vmem:[%s1382_s28 + $0xf8] sm:$0xf0]  ;;  %v1140_v45 = vor.u32 %v1256_v30, %v1139_v29  ;;  %v1008_v46 = vor.u32 %v1221_v31, %v1005_v32  ;;  %p763_p8 = scmp.eq.s32.totalorder %s1314_s15, 3 }
  0x33   : > { %660 = vmatpush.bf16.msra.mxu0 %v964_v7  ;;  %v1253_v37 = vld [vmem:[%s1382_s28 + $0x174] sm:$0xf]  ;;  %v1133_v38 = vld [vmem:[%s1382_s28 + $0x178] sm:$0xf0]  ;;  %v325_v39 = vunpack.c.l.b16 %v256_v34  ;;  %v326_v44 = vunpack.c.h.b16 %v256_v34  ;;  %v255_v47 = vld [vmem:[%s1377_s24] sm:$0xff]  ;;  %v1072_v48 = vor.u32 %v1237_v33, %v1069_v36  ;;  %p1201_p9 = scmp.ne.s32.totalorder %s1314_s15, 3 }
  0x34   : > { %673 = vmatpush.bf16.msra.mxu1 %v1028_v8  ;;  %v1269_v42 = vld [vmem:[%s1382_s28 + $0x1f4] sm:$0xf]  ;;  %v1197_v43 = vld [vmem:[%s1382_s28 + $0x1f8] sm:$0xf0]  ;;  %v1136_v49 = vor.u32 %v1253_v37, %v1133_v38  ;;  %v1219_v50 = vld [vmem:[%s1382_s28 + $0x64] sm:$0xf]  ;;  %v323_v53 = vunpack.c.l.b16 %v255_v47  ;;  %v324_v54 = vunpack.c.h.b16 %v255_v47 }
  0x35   : > { %686 = vmatpush.bf16.msra.mxu2 %v1092_v9  ;;  %v997_v51 = vld [vmem:[%s1382_s28 + $0x68] sm:$0xf0]  ;;  %v1235_v52 = vld [vmem:[%s1382_s28 + $0xe4] sm:$0xf]  ;;  %v1200_v55 = vor.u32 %v1269_v42, %v1197_v43  ;;  %v1465_v59 = vpack.c.b16 %v325_v39, %v325_v39  ;;  %v1469_v62 = vpack.c.b16 %v326_v44, %v326_v44  ;;  %v1217_v4 = vld [vmem:[%s1382_s28 + $0x54] sm:$0xf] }
  0x36   : > { %699 = vmatpush.bf16.msra.mxu3 %v1156_v13  ;;  %v1061_v56 = vld [vmem:[%s1382_s28 + $0xe8] sm:$0xf0]  ;;  %v1251_v57 = vld [vmem:[%s1382_s28 + $0x164] sm:$0xf]  ;;  %v1471_v63 = vpack.c.b16 %v323_v53, %v323_v53  ;;  %v1000_v0 = vor.u32 %v1219_v50, %v997_v51  ;;  %v1473_v1 = vpack.c.b16 %v324_v54, %v324_v54  ;;  %v989_v5 = vld [vmem:[%s1382_s28 + $0x58] sm:$0xf0] }
  0x37   : > { %661 = vmatpush.bf16.msra.mxu0 %v956_v19  ;;  %v1125_v58 = vld [vmem:[%s1382_s28 + $0x168] sm:$0xf0]  ;;  %v1267_v60 = vld [vmem:[%s1382_s28 + $0x1e4] sm:$0xf]  ;;  %v1064_v2 = vor.u32 %v1235_v52, %v1061_v56  ;;  %v1233_v6 = vld [vmem:[%s1382_s28 + $0xd4] sm:$0xf]  ;;  %v992_v13 = vor.u32 %v1217_v4, %v989_v5 }
  0x38   : > { %674 = vmatpush.bf16.msra.mxu1 %v1020_v23  ;;  %v1189_v61 = vld [vmem:[%s1382_s28 + $0x1e8] sm:$0xf0]  ;;  %v1128_v3 = vor.u32 %v1251_v57, %v1125_v58  ;;  %v1053_v8 = vld [vmem:[%s1382_s28 + $0xd8] sm:$0xf0]  ;;  %v1249_v9 = vld [vmem:[%s1382_s28 + $0x154] sm:$0xf] }
  0x39   : > { %687 = vmatpush.bf16.msra.mxu2 %v1084_v24  ;;  %v1192_v7 = vor.u32 %v1267_v60, %v1189_v61  ;;  %v1117_v10 = vld [vmem:[%s1382_s28 + $0x158] sm:$0xf0]  ;;  %v1265_v11 = vld [vmem:[%s1382_s28 + $0x1d4] sm:$0xf]  ;;  %v1056_v14 = vor.u32 %v1233_v6, %v1053_v8  ;;  %v1215_v16 = vld [vmem:[%s1382_s28 + $0x44] sm:$0xf] }
  0x3a   : > { %700 = vmatpush.bf16.msra.mxu3 %v1148_v28  ;;  %v1181_v12 = vld [vmem:[%s1382_s28 + $0x1d8] sm:$0xf0]  ;;  %v1120_v15 = vor.u32 %v1249_v9, %v1117_v10  ;;  %v981_v17 = vld [vmem:[%s1382_s28 + $0x48] sm:$0xf0]  ;;  %v1231_v18 = vld [vmem:[%s1382_s28 + $0xc4] sm:$0xf] }
  0x3b   : > { %662 = vmatpush.bf16.msra.mxu0 %v948_v35  ;;  %v1184_v19 = vor.u32 %v1265_v11, %v1181_v12  ;;  %v1045_v20 = vld [vmem:[%s1382_s28 + $0xc8] sm:$0xf0]  ;;  %v1247_v21 = vld [vmem:[%s1382_s28 + $0x144] sm:$0xf]  ;;  %v984_v25 = vor.u32 %v1215_v16, %v981_v17  ;;  %v1213_v28 = vld [vmem:[%s1382_s28 + $0x34] sm:$0xf] }
  0x3c   : > { %675 = vmatpush.bf16.msra.mxu1 %v1012_v40  ;;  %v1109_v22 = vld [vmem:[%s1382_s28 + $0x148] sm:$0xf0]  ;;  %v1263_v23 = vld [vmem:[%s1382_s28 + $0x1c4] sm:$0xf]  ;;  %v1048_v26 = vor.u32 %v1231_v18, %v1045_v20  ;;  %v973_v29 = vld [vmem:[%s1382_s28 + $0x38] sm:$0xf0] }
  0x3d   : > { %688 = vmatpush.bf16.msra.mxu2 %v1076_v41  ;;  %v1173_v24 = vld [vmem:[%s1382_s28 + $0x1c8] sm:$0xf0]  ;;  %v1112_v27 = vor.u32 %v1247_v21, %v1109_v22  ;;  %v1229_v30 = vld [vmem:[%s1382_s28 + $0xb4] sm:$0xf]  ;;  %v1037_v32 = vld [vmem:[%s1382_s28 + $0xb8] sm:$0xf0]  ;;  %v976_v37 = vor.u32 %v1213_v28, %v973_v29 }
  0x3e   : > { %701 = vmatpush.bf16.msra.mxu3 %v1140_v45  ;;  %663 = vmatmul.bf16.vlgmr.msra.gmra.mxu0 %v1471_v63  ;;  %v1176_v31 = vor.u32 %v1263_v23, %v1173_v24  ;;  %v1245_v33 = vld [vmem:[%s1382_s28 + $0x134] sm:$0xf]  ;;  %v1101_v34 = vld [vmem:[%s1382_s28 + $0x138] sm:$0xf0]  ;;  %v1040_v38 = vor.u32 %v1229_v30, %v1037_v32  ;;  %v1211_v40 = vld [vmem:[%s1382_s28 + $0x24] sm:$0xf] }
  0x3f   : > { %707 = vmatpush.bf16.msrb.mxu0 %v1008_v46  ;;  %676 = vmatmul.bf16.vlgmr.msra.gmra.mxu1 %v1473_v1  ;;  %v1261_v35 = vld [vmem:[%s1382_s28 + $0x1b4] sm:$0xf]  ;;  %v1165_v36 = vld [vmem:[%s1382_s28 + $0x1b8] sm:$0xf0]  ;;  %v1104_v39 = vor.u32 %v1245_v33, %v1101_v34  ;;  %v965_v41 = vld [vmem:[%s1382_s28 + $0x28] sm:$0xf0] }
  0x40   : > { %720 = vmatpush.bf16.msrb.mxu1 %v1072_v48  ;;  %689 = vmatmul.bf16.vlgmr.msra.gmra.mxu2 %v1465_v59  ;;  %v1227_v42 = vld [vmem:[%s1382_s28 + $0xa4] sm:$0xf]  ;;  %v1168_v43 = vor.u32 %v1261_v35, %v1165_v36  ;;  %v1029_v44 = vld [vmem:[%s1382_s28 + $0xa8] sm:$0xf0]  ;;  %v1209_v52 = vld [vmem:[%s1382_s28 + $0x14] sm:$0xf] }
  0x41   : > { %733 = vmatpush.bf16.msrb.mxu2 %v1136_v49  ;;  %702 = vmatmul.bf16.vlgmr.msra.gmra.mxu3 %v1469_v62  ;;  %v1243_v45 = vld [vmem:[%s1382_s28 + $0x124] sm:$0xf]  ;;  %v1093_v46 = vld [vmem:[%s1382_s28 + $0x128] sm:$0xf0]  ;;  %v968_v49 = vor.u32 %v1211_v40, %v965_v41  ;;  %v1032_v50 = vor.u32 %v1227_v42, %v1029_v44  ;;  %v957_v53 = vld [vmem:[%s1382_s28 + $0x18] sm:$0xf0] }
  0x42   : > { %746 = vmatpush.bf16.msrb.mxu3 %v1200_v55  ;;  %v1259_v47 = vld [vmem:[%s1382_s28 + $0x1a4] sm:$0xf]  ;;  %v1157_v48 = vld [vmem:[%s1382_s28 + $0x1a8] sm:$0xf0]  ;;  %v1096_v51 = vor.u32 %v1243_v45, %v1093_v46  ;;  %v1225_v54 = vld [vmem:[%s1382_s28 + $0x94] sm:$0xf] }
  0x43   : > { %708 = vmatpush.bf16.msrb.mxu0 %v1000_v0  ;;  %v1160_v55 = vor.u32 %v1259_v47, %v1157_v48  ;;  %v1021_v56 = vld [vmem:[%s1382_s28 + $0x98] sm:$0xf0]  ;;  %v1241_v57 = vld [vmem:[%s1382_s28 + $0x114] sm:$0xf]  ;;  %v960_v0 = vor.u32 %v1209_v52, %v957_v53  ;;  %v1207_v4 = vld [vmem:[%s1382_s28 + $0x4] sm:$0xf] }
  0x44   : > { %721 = vmatpush.bf16.msrb.mxu1 %v1064_v2  ;;  %v1085_v58 = vld [vmem:[%s1382_s28 + $0x118] sm:$0xf0]  ;;  %v1257_v60 = vld [vmem:[%s1382_s28 + $0x194] sm:$0xf]  ;;  %v1024_v2 = vor.u32 %v1225_v54, %v1021_v56  ;;  %v949_v5 = vld [vmem:[%s1382_s28 + $0x8] sm:$0xf0] }
  0x45   : > { %734 = vmatpush.bf16.msrb.mxu2 %v1128_v3  ;;  %v1149_v61 = vld [vmem:[%s1382_s28 + $0x198] sm:$0xf0]  ;;  %v1088_v3 = vor.u32 %v1241_v57, %v1085_v58  ;;  %v1223_v6 = vld [vmem:[%s1382_s28 + $0x84] sm:$0xf]  ;;  %v1013_v8 = vld [vmem:[%s1382_s28 + $0x88] sm:$0xf0] }
  0x46   : > { %747 = vmatpush.bf16.msrb.mxu3 %v1192_v7  ;;  %v1152_v7 = vor.u32 %v1257_v60, %v1149_v61  ;;  %v1239_v9 = vld [vmem:[%s1382_s28 + $0x104] sm:$0xf]  ;;  %v1077_v10 = vld [vmem:[%s1382_s28 + $0x108] sm:$0xf0] }
  0x47   : > { %709 = vmatpush.bf16.msrb.mxu0 %v992_v13  ;;  %v1255_v11 = vld [vmem:[%s1382_s28 + $0x184] sm:$0xf]  ;;  %v1141_v12 = vld [vmem:[%s1382_s28 + $0x188] sm:$0xf0]  ;;  %v952_v13 = vor.u32 %v1207_v4, %v949_v5 }
  0x48   : > { %722 = vmatpush.bf16.msrb.mxu1 %v1056_v14  ;;  %v1016_v14 = vor.u32 %v1223_v6, %v1013_v8  ;;  %v1144_v16 = vor.u32 %v1255_v11, %v1141_v12  ;;  %v253_v23 = vld [vmem:[#allocation2] sm:$0xff]  ;;  %v254_v33 = vld [vmem:[#allocation2 + $0x8] sm:$0xff] }
  0x49   : > { %735 = vmatpush.bf16.msrb.mxu2 %v1120_v15  ;;  %v1080_v15 = vor.u32 %v1239_v9, %v1077_v10 }
  0x4a   : > { %748 = vmatpush.bf16.msrb.mxu3 %v1184_v19 }
  0x4b   : > { %710 = vmatpush.bf16.msrb.mxu0 %v984_v25 }
  0x4c   : > { %723 = vmatpush.bf16.msrb.mxu1 %v1048_v26 }
  0x4d   : > { %736 = vmatpush.bf16.msrb.mxu2 %v1112_v27 }
  0x4e   : > { %749 = vmatpush.bf16.msrb.mxu3 %v1176_v31 }
  0x4f   : > { %711 = vmatpush.bf16.msrb.mxu0 %v976_v37 }
  0x50   : > { %724 = vmatpush.bf16.msrb.mxu1 %v1040_v38 }
  0x51   : > { %737 = vmatpush.bf16.msrb.mxu2 %v1104_v39 }
  0x52   : > { %750 = vmatpush.bf16.msrb.mxu3 %v1168_v43 }
  0x53   : > { %712 = vmatpush.bf16.msrb.mxu0 %v968_v49 }
  0x54   : > { %725 = vmatpush.bf16.msrb.mxu1 %v1032_v50 }
  0x55   : > { %738 = vmatpush.bf16.msrb.mxu2 %v1096_v51 }
  0x56   : > { %751 = vmatpush.bf16.msrb.mxu3 %v1160_v55 }
  0x57   : > { %713 = vmatpush.bf16.msrb.mxu0 %v960_v0 }
  0x58   : > { %726 = vmatpush.bf16.msrb.mxu1 %v1024_v2 }
  0x59   : > { %739 = vmatpush.bf16.msrb.mxu2 %v1088_v3 }
  0x5a   : > { %752 = vmatpush.bf16.msrb.mxu3 %v1152_v7 }
  0x5b   : > { %714 = vmatpush.bf16.msrb.mxu0 %v952_v13 }
  0x5c   : > { %727 = vmatpush.bf16.msrb.mxu1 %v1016_v14 }
  0x5d   : > { %740 = vmatpush.bf16.msrb.mxu2 %v1080_v15 }
  0x5e   : > { %753 = vmatpush.bf16.msrb.mxu3 %v1144_v16  ;;  %715 = vmatmul.bf16.vlgmr.msrb.gmra.mxu0 %v1471_v63 }
  0x5f   : > { %728 = vmatmul.bf16.vlgmr.msrb.gmra.mxu1 %v1473_v1 }
  0x60   : > { %741 = vmatmul.bf16.vlgmr.msrb.gmra.mxu2 %v1465_v59 }
  0x61   : > { %754 = vmatmul.bf16.vlgmr.msrb.gmra.mxu3 %v1469_v62 }
  0xbb   : > { %v664_v17 = vpop.f32.mrf.mxu0 }
  0xbc   : > { %v677_v18 = vpop.f32.mrf.mxu1 }
  0xbd   : > { %v678_v19 = vadd.f32 %v677_v18, %v664_v17 }
  0xc3   : > { %v690_v20 = vpop.f32.mrf.mxu2  ;;  %v666_v25 = vpop.f32.mrf.mxu0 }
  0xc4   : > { %v691_v21 = vadd.f32 %v690_v20, %v678_v19  ;;  %v703_v22 = vpop.f32.mrf.mxu3  ;;  %v679_v26 = vpop.f32.mrf.mxu1 }
  0xc6   : > { %v704_v24 = vadd.f32 %v703_v22, %v691_v21 }
  0xc8   : > { %v759_v27 = vadd.f32 %v704_v24, %v253_v23 }
  0xca   : > { %761 = vst [vmem:[#allocation2] sm:$0xff] %v759_v27 }
  0xcb   : > { %v692_v63 = vpop.f32.mrf.mxu2 }
  0xcc   : > { %v705_v28 = vpop.f32.mrf.mxu3 }
  0xdb   : > { %v716_v1 = vpop.f32.mrf.mxu0 }
  0xdc   : > { %v729_v29 = vpop.f32.mrf.mxu1 }
  0xdd   : > { %v730_v59 = vadd.f32 %v729_v29, %v716_v1 }
  0xe3   : > { %v742_v30 = vpop.f32.mrf.mxu2  ;;  %v718_v32 = vpop.f32.mrf.mxu0 }
  0xe4   : > { %v743_v62 = vadd.f32 %v742_v30, %v730_v59  ;;  %v755_v31 = vpop.f32.mrf.mxu3  ;;  %v731_v34 = vpop.f32.mrf.mxu1 }
  0xe6   : > { %v756_v35 = vadd.f32 %v755_v31, %v743_v62 }
  0xe8   : > { %v760_v36 = vadd.f32 %v756_v35, %v254_v33  ;;  %766 = sbr.rel (%p1201_p9) target bundleno = 262 (0x106), region = 48 }
  0xea   : > { %762 = vst [vmem:[#allocation2 + $0x8] sm:$0xff] %v760_v36 }
  0xeb   : > { %v744_v37 = vpop.f32.mrf.mxu2 }
  0xec   : > { %v757_v38 = vpop.f32.mrf.mxu3 }
  0xed   : > { %v767_v39 = vld [vmem:[#allocation2] sm:$0xff]  ;;  %v797_v0 = vlaneseq  ;;  %vm793_vm1 = vcmask 1040384   ;;  %v777_v6 = vld [vmem:[#allocation3] sm:$0x3]  ;;  %v802_v11 = vld [vmem:[#allocation4] sm:$0x3] }
  0xee   : > { %775 = vst [vmem:[%s1572_s4] sm:$0xff] %v767_v39  ;;  %v778_v41 = vrot.slane %v767_v39, 4  ;;  %v803_v42 = vmul.f32 %v767_v39, %v767_v39 }
  0xef   : > { %vm799_vm2 = vcmp.lt.s32.totalorder %v797_v0, 256 }
  0xf0   : > { %v779_v45 = vadd.f32 %v778_v41, %v767_v39  ;;  %v805_v46 = vrot.slane %v803_v42, 4 }
  0xf1   : > { %v768_v40 = vld [vmem:[#allocation2 + $0x8] sm:$0xff] }
  0xf2   : > { %v784_v43 = vrot.slane %v768_v40, 4  ;;  %v804_v44 = vmul.f32 %v768_v40, %v768_v40  ;;  %776 = vst [vmem:[%s1572_s4 + $0x8] sm:$0xff] %v768_v40  ;;  %v780_v49 = vrot.slane %v779_v45, 2  ;;  %v806_v50 = vadd.f32 %v805_v46, %v803_v42 }
  0xf4   : > { %v785_v47 = vadd.f32 %v784_v43, %v768_v40  ;;  %v811_v48 = vrot.slane %v804_v44, 4  ;;  %v781_v53 = vadd.f32 %v780_v49, %v779_v45  ;;  %v807_v54 = vrot.slane %v806_v50, 2 }
  0xf6   : > { %v786_v51 = vrot.slane %v785_v47, 2  ;;  %v812_v52 = vadd.f32 %v811_v48, %v804_v44  ;;  %v782_v57 = vrot.slane %v781_v53, 1  ;;  %v808_v60 = vadd.f32 %v807_v54, %v806_v50 }
  0xf8   : > { %v787_v55 = vadd.f32 %v786_v51, %v785_v47  ;;  %v813_v56 = vrot.slane %v812_v52, 2  ;;  %v783_v2 = vadd.f32 %v782_v57, %v781_v53  ;;  %v809_v4 = vrot.slane %v808_v60, 1 }
  0xfa   : > { %v788_v58 = vrot.slane %v787_v55, 1  ;;  %v814_v61 = vadd.f32 %v813_v56, %v812_v52  ;;  %v810_v8 = vadd.f32 %v809_v4, %v808_v60 }
  0xfc   : > { %v789_v3 = vadd.f32 %v788_v58, %v787_v55  ;;  %v815_v5 = vrot.slane %v814_v61, 1 }
  0xfe   : > { %v792_v7 = vrot.slane %v789_v3, 7  ;;  %v816_v9 = vadd.f32 %v815_v5, %v814_v61 }
 0x100   : > { %v794_v10 = vsel %vm793_vm1, %v783_v2, %v792_v7  ;;  %v819_v12 = vrot.slane %v816_v9, 7 }
 0x101   : > { %v796_v13 = vadd.f32 %v794_v10, %v777_v6 }
 0x102   : > { %v820_v14 = vsel %vm793_vm1, %v810_v8, %v819_v12 }
 0x103   : > { %801 = vst.msk [vmem:[#allocation3] sm:$0x3] %vm799_vm2, %v796_v13  ;;  %v822_v15 = vadd.f32 %v820_v14, %v802_v11 }
 0x105   : > { %823 = vst.msk [vmem:[#allocation4] sm:$0x3] %vm799_vm2, %v822_v15 }
 0x106 PF: > { %827 = sbr.rel (!%p763_p8) target bundleno = 310 (0x136), region = 52  ;;  %v835_v28 = vld [vmem:[%s1570_s2] sm:$0x3] (%p763_p8)  ;;  %v855_v31 = vld [vmem:[%s1572_s4 + $0x8] sm:$0xff] (%p763_p8) }
 0x107   : > { %v848_v30 = vld [vmem:[%s1571_s3] sm:$0x3] (%p763_p8) }
 0x108   : > { %v854_v62 = vld [vmem:[%s1572_s4] sm:$0xff] (%p763_p8) }
 0x10a   : > { %v828_v16 = vld [vmem:[#allocation3] sm:$0x3] (%p763_p8) }
 0x10b   : > { %v829_v18 = vmul.f32 0.125, %v828_v16 }
 0x10c   : > { %v830_v17 = vld [vmem:[#allocation4] sm:$0x3] }
 0x10d   : > { %v831_v19 = vmul.f32 0.125, %v830_v17  ;;  %v832_v20 = vmul.f32 %v829_v18, %v829_v18 }
 0x10f   : > { %v833_v21 = vsub.f32 %v831_v19, %v832_v20 }
 0x111   : > { %v834_v22 = vmax.f32 %v833_v21, 0.0 }
 0x113   : > { %v836_v23 = vadd.f32 1e-05, %v834_v22 }
 0x115   : > { %1298 = vrsqrt.f32 %v836_v23  ;;  %vm843_vm3 = vweird.f32 %v836_v23 }
 0x11b   : > { %v1299_v24 = vpop.eup %1298 }
 0x11c   : > { %v838_v25 = vmul.f32 %v1299_v24, %v836_v23  ;;  %vm844_vm4 = vweird.f32 %v1299_v24 }
 0x11d   : > { %vm845_vm5 = vmor %vm843_vm3, %vm844_vm4 }
 0x11e   : > { %v839_v26 = vmul.f32 %v1299_v24, %v838_v25 }
 0x120   : > { %v840_v27 = vmul.f32 0.5, %v839_v26 }
 0x122   : > { %v841_v63 = vsub.f32 1.5, %v840_v27 }
 0x124   : > { %v842_v1 = vmul.f32 %v1299_v24, %v841_v63 }
 0x126   : > { %v846_v29 = vsel %vm845_vm5, %v1299_v24, %v842_v1 }
 0x127   : > { %v847_v59 = vmul.f32 %v846_v29, %v835_v28 }
 0x129   : > { %v849_v32 = vmul.f32 %v847_v59, %v829_v18  ;;  %v857_v33 = vperm.slane %v847_v59, 0  ;;  %v858_v34 = vperm.slane %v847_v59, 1 }
 0x12b   : > { %v850_v35 = vsub.f32 %v848_v30, %v849_v32  ;;  %v861_v36 = vmul.f32 %v857_v33, %v854_v62  ;;  %v862_v37 = vmul.f32 %v858_v34, %v855_v31 }
 0x12d   : > { %v864_v38 = vperm.slane %v850_v35, 0  ;;  %v865_v39 = vperm.slane %v850_v35, 1 }
 0x12f   : > { %v868_v40 = vadd.f32 %v864_v38, %v861_v36  ;;  %v869_v41 = vadd.f32 %v865_v39, %v862_v37 }
 0x131   : > { %vm870_vm6 = vcmp.ge.f32.partialorder %v868_v40, 0.0  ;;  %v872_v42 = vmul.f32 0.2, %v868_v40  ;;  %vm871_vm7 = vcmp.ge.f32.partialorder %v869_v41, 0.0  ;;  %v873_v43 = vmul.f32 0.2, %v869_v41 }
 0x133   : > { %v874_v44 = vsel %vm870_vm6, %v868_v40, %v872_v42  ;;  %v875_v45 = vsel %vm871_vm7, %v869_v41, %v873_v43 }
 0x134   : > { %876 = vst [vmem:[%s1572_s4] sm:$0xff] %v874_v44 }
 0x135   : > { %877 = vst [vmem:[%s1572_s4 + $0x8] sm:$0xff] %v875_v45 }
 0x136 PF: > { %s14_s17 = sadd.s32 1, %s1322_s17   ;;  %s1573_s15 = smov %s1318_s16 }
 0x137   : > { %p11_p10 = scmp.ge.s32.totalorder %s14_s17, 6   ;;  %s1574_s16 = smov %s1576_s18 }
 0x139   :  { %13 = sbr.rel (!%p11_p10) target bundleno = 2 (0x2), region = 83 }

// kernel: discriminator_forward.8
= control target key start
LH: loop header
LB: loop body
LE: loop exit
PB: predicated region body
PF: predicated region fallthrough
CT: control target
= control target key end

     0   :  { %s2233_s15 = smov 0   ;;  %s2235_s16 = smov 0   ;;  %s2612_s0 = inlined_call_operand.vmem [shape: bf16[8,4096], index: 0, kind: input, shape index: {}]   ;;  %s2613_s1 = inlined_call_operand.vmem [shape: bf16[4096,512], index: 1, kind: input, shape index: {}]   ;;  %s2614_s2 = inlined_call_operand.vmem [shape: f32[1,512], index: 2, kind: input, shape index: {}]   ;;  %s2615_s3 = inlined_call_operand.vmem [shape: f32[1,512], index: 3, kind: input, shape index: {}]   ;;  %s2616_s4 = inlined_call_operand.vmem [shape: f32[8,512], index: 4, kind: output, shape index: {}]  }
   0x1   :  { %s2237_s17 = smov 0  }
   0x2 LB: > { %s23_s18 = sadd.s32 1, %s2200_s16  ;;  %p1499_p0 = scmp.ge.s32.totalorder %s2204_s17, 1  ;;  %s2204_s17 = sphi %s2237_s17, %s14_s17   ;;  %s2200_s16 = sphi %s2235_s16, %s2618_s16   ;;  %s2196_s15 = sphi %s2233_s15, %s2617_s15  }
   0x3   : > { %p24_p1 = scmp.ge.s32.totalorder %s23_s18, 8  ;;  %p188_p2 = scmp.lt.s32.totalorder %s2204_s17, 9 }
   0x5   : > { %s2620_s18 = smov (%p24_p1, %s23_s18), 0  ;;  %p189_p3 = pnand %p1499_p0, %p188_p2 }
   0x6   : > { %s1500_s19 = sshll.u32 (!%p189_p3), %s2196_s15, 2  ;;  %s1502_s20 = sshll.u32 (!%p189_p3), %s2196_s15, 6 }
   0x7   : > { %192 = sbr.rel (%p189_p3) target bundleno = 379 (0x17b), region = 36  ;;  %p222_p4 = scmp.lt.s32.totalorder (!%p189_p3), %s1500_s19, 31 }
   0x8   : > { %p230_p5 = scmp.lt.s32.totalorder (!%p189_p3), %s1502_s20, 511  ;;  %p236_p6 = scmp.eq.s32.totalorder (!%p189_p3), %s2196_s15, 0 }
   0x9   : > { %p1505_p7 = scmp.ne.s32.totalorder (!%p189_p3), %s2196_s15, 0 }
   0xc   : > { %s2622_s19 = smov (!%p222_p4, %s1500_s19), 31  ;;  %s2624_s20 = smov (!%p230_p5, %s1502_s20), 511 }
   0xd   : > { %s1501_s21 = sshll.u32 %s2622_s19, 2  ;;  %s2023_s25 = sshll.u32 %s2624_s20, 4 }
   0xe   : > { %s2259_s24 = scalar_lea.vmem %s2612_s0, %s1501_s21  ;;  %s2264_s28 = scalar_lea.vmem %s2613_s1, %s2023_s25 }
   0xf   : > { %239 = sbr.rel (%p1505_p7) target bundleno = 25 (0x19), region = 40 }
  0x14   : > { %v2206_v0 = vmov 0.0  }
  0x15   : > { %240 = vst [vmem:[#allocation2 + $0x10] sm:$0xff] %v2206_v0 }
  0x16   : > { %241 = vst [vmem:[#allocation2] sm:$0xff] %v2206_v0 }
  0x17   : > { %242 = vst [vmem:[#allocation2 + $0x18] sm:$0xff] %v2206_v0 }
  0x18   : > { %243 = vst [vmem:[#allocation2 + $0x8] sm:$0xff] %v2206_v0 }
  0x19 PF: > { %248 = sbr.rel (!%p236_p6) target bundleno = 30 (0x1e), region = 44  ;;  %v249_v1 = vlaneseq (%p236_p6)  ;;  %v2207_v2 = vmov (%p236_p6), 0.0  }
  0x1b   : > { %vm251_vm0 = vcmp.lt.s32.totalorder (%p236_p6), %v249_v1, 512 }
  0x1c   : > { %253 = vst.msk [vmem:[#allocation3] sm:$0xf] (%p236_p6), %vm251_vm0, %v2207_v2 }
  0x1d   : > { %254 = vst.msk [vmem:[#allocation4] sm:$0xf] (%p236_p6), %vm251_vm0, %v2207_v2 }
  0x1e PF: > { %v1621_v3 = vld [vmem:[%s2264_s28 + $0xe0] sm:$0xf]  ;;  %v2055_v4 = vld [vmem:[%s2264_s28 + $0xec] sm:$0xf0]  ;;  %p1259_p8 = scmp.eq.s32.totalorder %s2196_s15, 7  ;;  %p2019_p9 = scmp.ne.s32.totalorder %s2196_s15, 7 }
  0x1f   : > { %v1749_v5 = vld [vmem:[%s2264_s28 + $0x1e0] sm:$0xf]  ;;  %v1622_v6 = vor.u32 %v2055_v4, %v1621_v3  ;;  %v2087_v7 = vld [vmem:[%s2264_s28 + $0x1ec] sm:$0xf0] }
  0x20   : > { %v1877_v8 = vld [vmem:[%s2264_s28 + $0x2e0] sm:$0xf]  ;;  %v2119_v9 = vld [vmem:[%s2264_s28 + $0x2ec] sm:$0xf0]  ;;  %v1750_v10 = vor.u32 %v2087_v7, %v1749_v5 }
  0x21   : > { %v1878_v11 = vor.u32 %v2119_v9, %v1877_v8  ;;  %v2005_v12 = vld [vmem:[%s2264_s28 + $0x3e0] sm:$0xf]  ;;  %v2151_v13 = vld [vmem:[%s2264_s28 + $0x3ec] sm:$0xf0]  ;;  %1043 = vmatpush.bf16.msra.mxu0 %v1622_v6 }
  0x22   : > { %v1605_v14 = vld [vmem:[%s2264_s28 + $0xc0] sm:$0xf]  ;;  %v2006_v15 = vor.u32 %v2151_v13, %v2005_v12  ;;  %v2051_v16 = vld [vmem:[%s2264_s28 + $0xcc] sm:$0xf0]  ;;  %1056 = vmatpush.bf16.msra.mxu1 %v1750_v10 }
  0x23   : > { %v1733_v17 = vld [vmem:[%s2264_s28 + $0x1c0] sm:$0xf]  ;;  %v2083_v18 = vld [vmem:[%s2264_s28 + $0x1cc] sm:$0xf0]  ;;  %1069 = vmatpush.bf16.msra.mxu2 %v1878_v11  ;;  %v1606_v19 = vor.u32 %v2051_v16, %v1605_v14 }
  0x24   : > { %v1734_v20 = vor.u32 %v2083_v18, %v1733_v17  ;;  %v1861_v21 = vld [vmem:[%s2264_s28 + $0x2c0] sm:$0xf]  ;;  %v2115_v22 = vld [vmem:[%s2264_s28 + $0x2cc] sm:$0xf0]  ;;  %1082 = vmatpush.bf16.msra.mxu3 %v2006_v15 }
  0x25   : > { %v1989_v23 = vld [vmem:[%s2264_s28 + $0x3c0] sm:$0xf]  ;;  %v1862_v24 = vor.u32 %v2115_v22, %v1861_v21  ;;  %v2147_v25 = vld [vmem:[%s2264_s28 + $0x3cc] sm:$0xf0]  ;;  %1044 = vmatpush.bf16.msra.mxu0 %v1606_v19 }
  0x26   : > { %v1589_v26 = vld [vmem:[%s2264_s28 + $0xa0] sm:$0xf]  ;;  %v2047_v27 = vld [vmem:[%s2264_s28 + $0xac] sm:$0xf0]  ;;  %v1990_v28 = vor.u32 %v2147_v25, %v1989_v23  ;;  %1057 = vmatpush.bf16.msra.mxu1 %v1734_v20 }
  0x27   : > { %v1717_v29 = vld [vmem:[%s2264_s28 + $0x1a0] sm:$0xf]  ;;  %v2079_v30 = vld [vmem:[%s2264_s28 + $0x1ac] sm:$0xf0]  ;;  %v1590_v32 = vor.u32 %v2047_v27, %v1589_v26  ;;  %1070 = vmatpush.bf16.msra.mxu2 %v1862_v24 }
  0x28   : > { %v1845_v31 = vld [vmem:[%s2264_s28 + $0x2a0] sm:$0xf]  ;;  %v2111_v33 = vld [vmem:[%s2264_s28 + $0x2ac] sm:$0xf0]  ;;  %v1718_v36 = vor.u32 %v2079_v30, %v1717_v29  ;;  %1083 = vmatpush.bf16.msra.mxu3 %v1990_v28 }
  0x29   : > { %v1973_v34 = vld [vmem:[%s2264_s28 + $0x3a0] sm:$0xf]  ;;  %v2143_v35 = vld [vmem:[%s2264_s28 + $0x3ac] sm:$0xf0]  ;;  %v1846_v37 = vor.u32 %v2111_v33, %v1845_v31  ;;  %1045 = vmatpush.bf16.msra.mxu0 %v1590_v32  ;;  %v2053_v31 = vld [vmem:[%s2264_s28 + $0xe4] sm:$0xf] }
  0x2a   : > { %v1573_v38 = vld [vmem:[%s2264_s28 + $0x80] sm:$0xf]  ;;  %v2043_v39 = vld [vmem:[%s2264_s28 + $0x8c] sm:$0xf0]  ;;  %v1974_v41 = vor.u32 %v2143_v35, %v1973_v34  ;;  %1058 = vmatpush.bf16.msra.mxu1 %v1718_v36  ;;  %v1623_v32 = vld [vmem:[%s2264_s28 + $0xf0] sm:$0xf0] }
  0x2b   : > { %v1701_v40 = vld [vmem:[%s2264_s28 + $0x180] sm:$0xf]  ;;  %v2075_v42 = vld [vmem:[%s2264_s28 + $0x18c] sm:$0xf0]  ;;  %v1574_v47 = vor.u32 %v2043_v39, %v1573_v38  ;;  %1071 = vmatpush.bf16.msra.mxu2 %v1846_v37  ;;  %v2085_v33 = vld [vmem:[%s2264_s28 + $0x1e4] sm:$0xf] }
  0x2c   : > { %v1829_v43 = vld [vmem:[%s2264_s28 + $0x280] sm:$0xf]  ;;  %v2107_v44 = vld [vmem:[%s2264_s28 + $0x28c] sm:$0xf0]  ;;  %v1702_v48 = vor.u32 %v2075_v42, %v1701_v40  ;;  %1084 = vmatpush.bf16.msra.mxu3 %v1974_v41  ;;  %v1751_v35 = vld [vmem:[%s2264_s28 + $0x1f0] sm:$0xf0] }
  0x2d   : > { %v1957_v45 = vld [vmem:[%s2264_s28 + $0x380] sm:$0xf]  ;;  %v2139_v46 = vld [vmem:[%s2264_s28 + $0x38c] sm:$0xf0]  ;;  %v1830_v49 = vor.u32 %v2107_v44, %v1829_v43  ;;  %1046 = vmatpush.bf16.msra.mxu0 %v1574_v47  ;;  %v2117_v36 = vld [vmem:[%s2264_s28 + $0x2e4] sm:$0xf]  ;;  %v1626_v43 = vor.u32 %v2053_v31, %v1623_v32  ;;  %v1754_v44 = vor.u32 %v2085_v33, %v1751_v35 }
  0x2e   : > { %v1557_v50 = vld [vmem:[%s2264_s28 + $0x60] sm:$0xf]  ;;  %v2039_v51 = vld [vmem:[%s2264_s28 + $0x6c] sm:$0xf0]  ;;  %v1958_v53 = vor.u32 %v2139_v46, %v1957_v45  ;;  %1059 = vmatpush.bf16.msra.mxu1 %v1702_v48  ;;  %v1879_v37 = vld [vmem:[%s2264_s28 + $0x2f0] sm:$0xf0] }
  0x2f   : > { %v1685_v52 = vld [vmem:[%s2264_s28 + $0x160] sm:$0xf]  ;;  %v2071_v54 = vld [vmem:[%s2264_s28 + $0x16c] sm:$0xf0]  ;;  %v1558_v59 = vor.u32 %v2039_v51, %v1557_v50  ;;  %1072 = vmatpush.bf16.msra.mxu2 %v1830_v49  ;;  %v2149_v40 = vld [vmem:[%s2264_s28 + $0x3e4] sm:$0xf]  ;;  %v1882_v45 = vor.u32 %v2117_v36, %v1879_v37 }
  0x30   : > { %v1813_v55 = vld [vmem:[%s2264_s28 + $0x260] sm:$0xf]  ;;  %v2103_v56 = vld [vmem:[%s2264_s28 + $0x26c] sm:$0xf0]  ;;  %v1686_v60 = vor.u32 %v2071_v54, %v1685_v52  ;;  %1085 = vmatpush.bf16.msra.mxu3 %v1958_v53  ;;  %v2007_v41 = vld [vmem:[%s2264_s28 + $0x3f0] sm:$0xf0] }
  0x31   : > { %v1941_v57 = vld [vmem:[%s2264_s28 + $0x360] sm:$0xf]  ;;  %v2135_v58 = vld [vmem:[%s2264_s28 + $0x36c] sm:$0xf0]  ;;  %v1814_v61 = vor.u32 %v2103_v56, %v1813_v55  ;;  %1047 = vmatpush.bf16.msra.mxu0 %v1558_v59  ;;  %v2049_v46 = vld [vmem:[%s2264_s28 + $0xc4] sm:$0xf]  ;;  %v2010_v49 = vor.u32 %v2149_v40, %v2007_v41 }
  0x32   : > { %v1541_v62 = vld [vmem:[%s2264_s28 + $0x40] sm:$0xf]  ;;  %v2035_v63 = vld [vmem:[%s2264_s28 + $0x4c] sm:$0xf0]  ;;  %v1942_v1 = vor.u32 %v2135_v58, %v1941_v57  ;;  %1060 = vmatpush.bf16.msra.mxu1 %v1686_v60  ;;  %v1607_v47 = vld [vmem:[%s2264_s28 + $0xd0] sm:$0xf0] }
  0x33   : > { %v1669_v0 = vld [vmem:[%s2264_s28 + $0x140] sm:$0xf]  ;;  %v2067_v2 = vld [vmem:[%s2264_s28 + $0x14c] sm:$0xf0]  ;;  %v1542_v7 = vor.u32 %v2035_v63, %v1541_v62  ;;  %1073 = vmatpush.bf16.msra.mxu2 %v1814_v61  ;;  %v2081_v48 = vld [vmem:[%s2264_s28 + $0x1c4] sm:$0xf]  ;;  %v1610_v55 = vor.u32 %v2049_v46, %v1607_v47 }
  0x34   : > { %v1797_v3 = vld [vmem:[%s2264_s28 + $0x240] sm:$0xf]  ;;  %v2099_v4 = vld [vmem:[%s2264_s28 + $0x24c] sm:$0xf0]  ;;  %v1670_v8 = vor.u32 %v2067_v2, %v1669_v0  ;;  %1086 = vmatpush.bf16.msra.mxu3 %v1942_v1  ;;  %v1735_v50 = vld [vmem:[%s2264_s28 + $0x1d0] sm:$0xf0] }
  0x35   : > { %v1925_v5 = vld [vmem:[%s2264_s28 + $0x340] sm:$0xf]  ;;  %v2131_v6 = vld [vmem:[%s2264_s28 + $0x34c] sm:$0xf0]  ;;  %v1798_v9 = vor.u32 %v2099_v4, %v1797_v3  ;;  %1048 = vmatpush.bf16.msra.mxu0 %v1542_v7  ;;  %v2113_v51 = vld [vmem:[%s2264_s28 + $0x2c4] sm:$0xf]  ;;  %v1738_v56 = vor.u32 %v2081_v48, %v1735_v50 }
  0x36   : > { %v1525_v10 = vld [vmem:[%s2264_s28 + $0x20] sm:$0xf]  ;;  %v2031_v11 = vld [vmem:[%s2264_s28 + $0x2c] sm:$0xf0]  ;;  %v1926_v13 = vor.u32 %v2131_v6, %v1925_v5  ;;  %1061 = vmatpush.bf16.msra.mxu1 %v1670_v8  ;;  %v1863_v52 = vld [vmem:[%s2264_s28 + $0x2d0] sm:$0xf0] }
  0x37   : > { %v1653_v12 = vld [vmem:[%s2264_s28 + $0x120] sm:$0xf]  ;;  %v2063_v14 = vld [vmem:[%s2264_s28 + $0x12c] sm:$0xf0]  ;;  %v1526_v19 = vor.u32 %v2031_v11, %v1525_v10  ;;  %1074 = vmatpush.bf16.msra.mxu2 %v1798_v9  ;;  %v2145_v53 = vld [vmem:[%s2264_s28 + $0x3c4] sm:$0xf]  ;;  %v1866_v57 = vor.u32 %v2113_v51, %v1863_v52 }
  0x38   : > { %v1781_v15 = vld [vmem:[%s2264_s28 + $0x220] sm:$0xf]  ;;  %v2095_v16 = vld [vmem:[%s2264_s28 + $0x22c] sm:$0xf0]  ;;  %v1654_v22 = vor.u32 %v2063_v14, %v1653_v12  ;;  %1087 = vmatpush.bf16.msra.mxu3 %v1926_v13  ;;  %v1991_v54 = vld [vmem:[%s2264_s28 + $0x3d0] sm:$0xf0] }
  0x39   : > { %v1909_v17 = vld [vmem:[%s2264_s28 + $0x320] sm:$0xf]  ;;  %v2127_v18 = vld [vmem:[%s2264_s28 + $0x32c] sm:$0xf0]  ;;  %v1782_v23 = vor.u32 %v2095_v16, %v1781_v15  ;;  %1049 = vmatpush.bf16.msra.mxu0 %v1526_v19  ;;  %v2045_v58 = vld [vmem:[%s2264_s28 + $0xa4] sm:$0xf]  ;;  %v1994_v61 = vor.u32 %v2145_v53, %v1991_v54 }
  0x3a   : > { %v1509_v20 = vld [vmem:[%s2264_s28] sm:$0xf]  ;;  %v2027_v21 = vld [vmem:[%s2264_s28 + $0xc] sm:$0xf0]  ;;  %v1910_v27 = vor.u32 %v2127_v18, %v1909_v17  ;;  %1062 = vmatpush.bf16.msra.mxu1 %v1654_v22  ;;  %v1591_v59 = vld [vmem:[%s2264_s28 + $0xb0] sm:$0xf0] }
  0x3b   : > { %v1637_v24 = vld [vmem:[%s2264_s28 + $0x100] sm:$0xf]  ;;  %v2059_v25 = vld [vmem:[%s2264_s28 + $0x10c] sm:$0xf0]  ;;  %v1510_v34 = vor.u32 %v2027_v21, %v1509_v20  ;;  %1075 = vmatpush.bf16.msra.mxu2 %v1782_v23  ;;  %v2077_v60 = vld [vmem:[%s2264_s28 + $0x1a4] sm:$0xf]  ;;  %v1594_v3 = vor.u32 %v2045_v58, %v1591_v59 }
  0x3c   : > { %v1765_v26 = vld [vmem:[%s2264_s28 + $0x200] sm:$0xf]  ;;  %v2091_v28 = vld [vmem:[%s2264_s28 + $0x20c] sm:$0xf0]  ;;  %v1638_v38 = vor.u32 %v2059_v25, %v1637_v24  ;;  %1088 = vmatpush.bf16.msra.mxu3 %v1910_v27  ;;  %v1719_v62 = vld [vmem:[%s2264_s28 + $0x1b0] sm:$0xf0] }
  0x3d   : > { %v1893_v29 = vld [vmem:[%s2264_s28 + $0x300] sm:$0xf]  ;;  %v2123_v30 = vld [vmem:[%s2264_s28 + $0x30c] sm:$0xf0]  ;;  %v1766_v39 = vor.u32 %v2091_v28, %v1765_v26  ;;  %1050 = vmatpush.bf16.msra.mxu0 %v1510_v34  ;;  %v2109_v63 = vld [vmem:[%s2264_s28 + $0x2a4] sm:$0xf]  ;;  %v1722_v5 = vor.u32 %v2077_v60, %v1719_v62 }
  0x3e   : > { %v1894_v42 = vor.u32 %v2123_v30, %v1893_v29  ;;  %1063 = vmatpush.bf16.msra.mxu1 %v1638_v38  ;;  %v1847_v0 = vld [vmem:[%s2264_s28 + $0x2b0] sm:$0xf0]  ;;  %v2141_v1 = vld [vmem:[%s2264_s28 + $0x3a4] sm:$0xf]  ;;  %v260_v4 = vld [vmem:[%s2259_s24 + $0x8] sm:$0xff] }
  0x3f   : > { %1076 = vmatpush.bf16.msra.mxu2 %v1766_v39  ;;  %v1975_v2 = vld [vmem:[%s2264_s28 + $0x3b0] sm:$0xf0]  ;;  %v1850_v6 = vor.u32 %v2109_v63, %v1847_v0  ;;  %v2041_v7 = vld [vmem:[%s2264_s28 + $0x84] sm:$0xf]  ;;  %v393_v10 = vunpack.c.l.b16 %v260_v4  ;;  %v394_v11 = vunpack.c.h.b16 %v260_v4 }
  0x40   : > { %1089 = vmatpush.bf16.msra.mxu3 %v1894_v42  ;;  %v1575_v8 = vld [vmem:[%s2264_s28 + $0x90] sm:$0xf0]  ;;  %v2073_v9 = vld [vmem:[%s2264_s28 + $0x184] sm:$0xf]  ;;  %v1978_v12 = vor.u32 %v2141_v1, %v1975_v2 }
  0x41   : > { %1095 = vmatpush.bf16.msrb.mxu0 %v1626_v43  ;;  %v1703_v13 = vld [vmem:[%s2264_s28 + $0x190] sm:$0xf0]  ;;  %v2105_v14 = vld [vmem:[%s2264_s28 + $0x284] sm:$0xf]  ;;  %v2366_v18 = vpack.c.b16 %v393_v10, %v393_v10  ;;  %v2368_v19 = vpack.c.b16 %v394_v11, %v394_v11  ;;  %v1578_v21 = vor.u32 %v2041_v7, %v1575_v8  ;;  %v2056_v10 = vld [vmem:[%s2264_s28 + $0xf4] sm:$0xf0] }
  0x42   : > { %1108 = vmatpush.bf16.msrb.mxu1 %v1754_v44  ;;  %v1831_v15 = vld [vmem:[%s2264_s28 + $0x290] sm:$0xf0]  ;;  %v2137_v16 = vld [vmem:[%s2264_s28 + $0x384] sm:$0xf]  ;;  %v1706_v24 = vor.u32 %v2073_v9, %v1703_v13  ;;  %v1629_v9 = vld [vmem:[%s2264_s28 + $0xe8] sm:$0xf] }
  0x43   : > { %1121 = vmatpush.bf16.msrb.mxu2 %v1882_v45  ;;  %v1959_v17 = vld [vmem:[%s2264_s28 + $0x390] sm:$0xf0]  ;;  %v259_v20 = vld [vmem:[%s2259_s24] sm:$0xff]  ;;  %v1834_v25 = vor.u32 %v2105_v14, %v1831_v15  ;;  %1090 = vmatmul.bf16.vlgmr.msra.gmra.mxu3 %v2368_v19  ;;  %v1757_v11 = vld [vmem:[%s2264_s28 + $0x1e8] sm:$0xf] }
  0x44   : > { %1134 = vmatpush.bf16.msrb.mxu3 %v2010_v49  ;;  %v391_v22 = vunpack.c.l.b16 %v259_v20  ;;  %v392_v23 = vunpack.c.h.b16 %v259_v20  ;;  %v2037_v26 = vld [vmem:[%s2264_s28 + $0x64] sm:$0xf]  ;;  %v1559_v27 = vld [vmem:[%s2264_s28 + $0x70] sm:$0xf0]  ;;  %v1962_v29 = vor.u32 %v2137_v16, %v1959_v17  ;;  %1077 = vmatmul.bf16.vlgmr.msra.gmra.mxu2 %v2366_v18  ;;  %v2088_v13 = vld [vmem:[%s2264_s28 + $0x1f4] sm:$0xf0] }
  0x45   : > { %1096 = vmatpush.bf16.msrb.mxu0 %v1610_v55  ;;  %v2069_v28 = vld [vmem:[%s2264_s28 + $0x164] sm:$0xf]  ;;  %v1687_v30 = vld [vmem:[%s2264_s28 + $0x170] sm:$0xf0]  ;;  %v1562_v37 = vor.u32 %v2037_v26, %v1559_v27  ;;  %v1885_v14 = vld [vmem:[%s2264_s28 + $0x2e8] sm:$0xf] }
  0x46   : > { %1109 = vmatpush.bf16.msrb.mxu1 %v1738_v56  ;;  %v2101_v31 = vld [vmem:[%s2264_s28 + $0x264] sm:$0xf]  ;;  %v1815_v32 = vld [vmem:[%s2264_s28 + $0x270] sm:$0xf0]  ;;  %v2378_v33 = vpack.c.b16 %v391_v22, %v391_v22  ;;  %v2380_v34 = vpack.c.b16 %v392_v23, %v392_v23  ;;  %v1690_v38 = vor.u32 %v2069_v28, %v1687_v30  ;;  %v2120_v15 = vld [vmem:[%s2264_s28 + $0x2f4] sm:$0xf0]  ;;  %v1630_v23 = vor.u32 %v2056_v10, %v1629_v9 }
  0x47   : > { %1122 = vmatpush.bf16.msrb.mxu2 %v1866_v57  ;;  %v2133_v35 = vld [vmem:[%s2264_s28 + $0x364] sm:$0xf]  ;;  %v1943_v36 = vld [vmem:[%s2264_s28 + $0x370] sm:$0xf0]  ;;  %v1818_v39 = vor.u32 %v2101_v31, %v1815_v32  ;;  %v2013_v20 = vld [vmem:[%s2264_s28 + $0x3e8] sm:$0xf] }
  0x48   : > { %1135 = vmatpush.bf16.msrb.mxu3 %v1994_v61  ;;  %1064 = vmatmul.bf16.vlgmr.msra.gmra.mxu1 %v2380_v34  ;;  %v2033_v40 = vld [vmem:[%s2264_s28 + $0x44] sm:$0xf]  ;;  %v1543_v41 = vld [vmem:[%s2264_s28 + $0x50] sm:$0xf0]  ;;  %v1946_v43 = vor.u32 %v2133_v35, %v1943_v36  ;;  %v1613_v26 = vld [vmem:[%s2264_s28 + $0xc8] sm:$0xf] }
  0x49   : > { %1097 = vmatpush.bf16.msrb.mxu0 %v1594_v3  ;;  %v2065_v42 = vld [vmem:[%s2264_s28 + $0x144] sm:$0xf]  ;;  %v1671_v44 = vld [vmem:[%s2264_s28 + $0x150] sm:$0xf0]  ;;  %v1546_v49 = vor.u32 %v2033_v40, %v1543_v41  ;;  %v2052_v27 = vld [vmem:[%s2264_s28 + $0xd4] sm:$0xf0] }
  0x4a   : > { %1110 = vmatpush.bf16.msrb.mxu1 %v1722_v5  ;;  %v2097_v45 = vld [vmem:[%s2264_s28 + $0x244] sm:$0xf]  ;;  %v1799_v46 = vld [vmem:[%s2264_s28 + $0x250] sm:$0xf0]  ;;  %1051 = vmatmul.bf16.vlgmr.msra.gmra.mxu0 %v2378_v33  ;;  %v1674_v50 = vor.u32 %v2065_v42, %v1671_v44  ;;  %v1741_v28 = vld [vmem:[%s2264_s28 + $0x1c8] sm:$0xf] }
  0x4b   : > { %1123 = vmatpush.bf16.msrb.mxu2 %v1850_v6  ;;  %v2129_v47 = vld [vmem:[%s2264_s28 + $0x344] sm:$0xf]  ;;  %v1927_v48 = vld [vmem:[%s2264_s28 + $0x350] sm:$0xf0]  ;;  %v1802_v51 = vor.u32 %v2097_v45, %v1799_v46  ;;  %v2084_v30 = vld [vmem:[%s2264_s28 + $0x1d4] sm:$0xf0] }
  0x4c   : > { %1136 = vmatpush.bf16.msrb.mxu3 %v1978_v12  ;;  %v2029_v52 = vld [vmem:[%s2264_s28 + $0x24] sm:$0xf]  ;;  %v1527_v53 = vld [vmem:[%s2264_s28 + $0x30] sm:$0xf0]  ;;  %v1930_v55 = vor.u32 %v2129_v47, %v1927_v48  ;;  %v1869_v31 = vld [vmem:[%s2264_s28 + $0x2c8] sm:$0xf] }
  0x4d   : > { %1098 = vmatpush.bf16.msrb.mxu0 %v1578_v21  ;;  %v2061_v54 = vld [vmem:[%s2264_s28 + $0x124] sm:$0xf]  ;;  %v1655_v56 = vld [vmem:[%s2264_s28 + $0x130] sm:$0xf0]  ;;  %v1530_v61 = vor.u32 %v2029_v52, %v1527_v53  ;;  %v2152_v21 = vld [vmem:[%s2264_s28 + $0x3f4] sm:$0xf0] }
  0x4e   : > { %1111 = vmatpush.bf16.msrb.mxu1 %v1706_v24  ;;  %v2093_v57 = vld [vmem:[%s2264_s28 + $0x224] sm:$0xf]  ;;  %v1783_v58 = vld [vmem:[%s2264_s28 + $0x230] sm:$0xf0]  ;;  %v1658_v0 = vor.u32 %v2061_v54, %v1655_v56  ;;  %v1758_v24 = vor.u32 %v2088_v13, %v1757_v11  ;;  %v2116_v32 = vld [vmem:[%s2264_s28 + $0x2d4] sm:$0xf0] }
  0x4f   : > { %1124 = vmatpush.bf16.msrb.mxu2 %v1834_v25  ;;  %v2125_v59 = vld [vmem:[%s2264_s28 + $0x324] sm:$0xf]  ;;  %v1911_v60 = vld [vmem:[%s2264_s28 + $0x330] sm:$0xf0]  ;;  %v1786_v1 = vor.u32 %v2093_v57, %v1783_v58  ;;  %v1886_v25 = vor.u32 %v2120_v15, %v1885_v14  ;;  %v1997_v35 = vld [vmem:[%s2264_s28 + $0x3c8] sm:$0xf] }
  0x50   : > { %1137 = vmatpush.bf16.msrb.mxu3 %v1962_v29  ;;  %v2025_v62 = vld [vmem:[%s2264_s28 + $0x4] sm:$0xf]  ;;  %v1511_v63 = vld [vmem:[%s2264_s28 + $0x10] sm:$0xf0]  ;;  %v1914_v5 = vor.u32 %v2125_v59, %v1911_v60  ;;  %v2014_v29 = vor.u32 %v2152_v21, %v2013_v20  ;;  %v2148_v36 = vld [vmem:[%s2264_s28 + $0x3d4] sm:$0xf0] }
  0x51   : > { %1099 = vmatpush.bf16.msrb.mxu0 %v1562_v37  ;;  %v2057_v2 = vld [vmem:[%s2264_s28 + $0x104] sm:$0xf]  ;;  %v1639_v3 = vld [vmem:[%s2264_s28 + $0x110] sm:$0xf0]  ;;  %v1514_v12 = vor.u32 %v2025_v62, %v1511_v63  ;;  %v1614_v37 = vor.u32 %v2052_v27, %v1613_v26  ;;  %v1597_v40 = vld [vmem:[%s2264_s28 + $0xa8] sm:$0xf] }
  0x52   : > { %1112 = vmatpush.bf16.msrb.mxu1 %v1690_v38  ;;  %v2089_v4 = vld [vmem:[%s2264_s28 + $0x204] sm:$0xf]  ;;  %v1767_v6 = vld [vmem:[%s2264_s28 + $0x210] sm:$0xf0]  ;;  %v1642_v16 = vor.u32 %v2057_v2, %v1639_v3  ;;  %v1742_v38 = vor.u32 %v2084_v30, %v1741_v28  ;;  %v2048_v41 = vld [vmem:[%s2264_s28 + $0xb4] sm:$0xf0] }
  0x53   : > { %1125 = vmatpush.bf16.msrb.mxu2 %v1818_v39  ;;  %v2121_v7 = vld [vmem:[%s2264_s28 + $0x304] sm:$0xf]  ;;  %v1895_v8 = vld [vmem:[%s2264_s28 + $0x310] sm:$0xf0]  ;;  %v1770_v17 = vor.u32 %v2089_v4, %v1767_v6  ;;  %v1870_v39 = vor.u32 %v2116_v32, %v1869_v31  ;;  %v1725_v42 = vld [vmem:[%s2264_s28 + $0x1a8] sm:$0xf] }
  0x54   : > { %1138 = vmatpush.bf16.msrb.mxu3 %v1946_v43  ;;  %v1898_v22 = vor.u32 %v2121_v7, %v1895_v8  ;;  %v1998_v43 = vor.u32 %v2148_v36, %v1997_v35  ;;  %v2080_v44 = vld [vmem:[%s2264_s28 + $0x1b4] sm:$0xf0]  ;;  %v1853_v45 = vld [vmem:[%s2264_s28 + $0x2a8] sm:$0xf] }
  0x55   : > { %1100 = vmatpush.bf16.msrb.mxu0 %v1546_v49  ;;  %v2112_v46 = vld [vmem:[%s2264_s28 + $0x2b4] sm:$0xf0]  ;;  %v1981_v47 = vld [vmem:[%s2264_s28 + $0x3a8] sm:$0xf]  ;;  %v1598_v49 = vor.u32 %v2048_v41, %v1597_v40 }
  0x56   : > { %1113 = vmatpush.bf16.msrb.mxu1 %v1674_v50  ;;  %v2144_v48 = vld [vmem:[%s2264_s28 + $0x3b4] sm:$0xf0]  ;;  %v1726_v50 = vor.u32 %v2080_v44, %v1725_v42  ;;  %v1581_v52 = vld [vmem:[%s2264_s28 + $0x88] sm:$0xf] }
  0x57   : > { %1126 = vmatpush.bf16.msrb.mxu2 %v1802_v51  ;;  %v1854_v51 = vor.u32 %v2112_v46, %v1853_v45  ;;  %v2044_v53 = vld [vmem:[%s2264_s28 + $0x94] sm:$0xf0]  ;;  %v1709_v54 = vld [vmem:[%s2264_s28 + $0x188] sm:$0xf] }
  0x58   : > { %1139 = vmatpush.bf16.msrb.mxu3 %v1930_v55  ;;  %v1982_v55 = vor.u32 %v2144_v48, %v1981_v47  ;;  %v2076_v56 = vld [vmem:[%s2264_s28 + $0x194] sm:$0xf0]  ;;  %v1837_v57 = vld [vmem:[%s2264_s28 + $0x288] sm:$0xf] }
  0x59   : > { %1101 = vmatpush.bf16.msrb.mxu0 %v1530_v61  ;;  %v2108_v58 = vld [vmem:[%s2264_s28 + $0x294] sm:$0xf0]  ;;  %v1965_v59 = vld [vmem:[%s2264_s28 + $0x388] sm:$0xf]  ;;  %v1582_v61 = vor.u32 %v2044_v53, %v1581_v52  ;;  %v1710_v62 = vor.u32 %v2076_v56, %v1709_v54  ;;  %v1759_v53 = vld [vmem:[%s2264_s28 + $0x1f8] sm:$0xf0] }
  0x5a   : > { %1114 = vmatpush.bf16.msrb.mxu1 %v1658_v0  ;;  %v2140_v60 = vld [vmem:[%s2264_s28 + $0x394] sm:$0xf0]  ;;  %v1838_v63 = vor.u32 %v2108_v58, %v1837_v57  ;;  %v1565_v0 = vld [vmem:[%s2264_s28 + $0x68] sm:$0xf]  ;;  %v2118_v54 = vld [vmem:[%s2264_s28 + $0x2ec] sm:$0xf] }
  0x5b   : > { %1127 = vmatpush.bf16.msrb.mxu2 %v1786_v1  ;;  %v2040_v1 = vld [vmem:[%s2264_s28 + $0x74] sm:$0xf0]  ;;  %v1693_v2 = vld [vmem:[%s2264_s28 + $0x168] sm:$0xf]  ;;  %v1966_v3 = vor.u32 %v2140_v60, %v1965_v59  ;;  %v2150_v58 = vld [vmem:[%s2264_s28 + $0x3ec] sm:$0xf] }
  0x5c   : > { %1140 = vmatpush.bf16.msrb.mxu3 %v1914_v5  ;;  %v2072_v4 = vld [vmem:[%s2264_s28 + $0x174] sm:$0xf0]  ;;  %v1821_v5 = vld [vmem:[%s2264_s28 + $0x268] sm:$0xf]  ;;  %v1566_v9 = vor.u32 %v2040_v1, %v1565_v0  ;;  %v2015_v59 = vld [vmem:[%s2264_s28 + $0x3f8] sm:$0xf0] }
  0x5d   : > { %1102 = vmatpush.bf16.msrb.mxu0 %v1514_v12  ;;  %v2104_v6 = vld [vmem:[%s2264_s28 + $0x274] sm:$0xf0]  ;;  %v1949_v7 = vld [vmem:[%s2264_s28 + $0x368] sm:$0xf]  ;;  %v1694_v10 = vor.u32 %v2072_v4, %v1693_v2  ;;  %v2050_v0 = vld [vmem:[%s2264_s28 + $0xcc] sm:$0xf] }
  0x5e   : > { %1115 = vmatpush.bf16.msrb.mxu1 %v1642_v16  ;;  %v2136_v8 = vld [vmem:[%s2264_s28 + $0x374] sm:$0xf0]  ;;  %v1822_v11 = vor.u32 %v2104_v6, %v1821_v5  ;;  %v1549_v12 = vld [vmem:[%s2264_s28 + $0x48] sm:$0xf]  ;;  %v1615_v1 = vld [vmem:[%s2264_s28 + $0xd8] sm:$0xf0] }
  0x5f   : > { %1128 = vmatpush.bf16.msrb.mxu2 %v1770_v17  ;;  %v2036_v13 = vld [vmem:[%s2264_s28 + $0x54] sm:$0xf0]  ;;  %v1677_v14 = vld [vmem:[%s2264_s28 + $0x148] sm:$0xf]  ;;  %v1950_v15 = vor.u32 %v2136_v8, %v1949_v7  ;;  %v2082_v2 = vld [vmem:[%s2264_s28 + $0x1cc] sm:$0xf] }
  0x60   : > { %1141 = vmatpush.bf16.msrb.mxu3 %v1898_v22  ;;  %1103 = vmatmul.bf16.vlgmr.msrb.gmra.mxu0 %v2378_v33  ;;  %v2068_v16 = vld [vmem:[%s2264_s28 + $0x154] sm:$0xf0]  ;;  %v1805_v17 = vld [vmem:[%s2264_s28 + $0x248] sm:$0xf]  ;;  %v1743_v4 = vld [vmem:[%s2264_s28 + $0x1d8] sm:$0xf0] }
  0x61   : > { %1147 = vmatpush.bf16.msra.mxu0 %v1630_v23  ;;  %1116 = vmatmul.bf16.vlgmr.msrb.gmra.mxu1 %v2380_v34  ;;  %v2100_v20 = vld [vmem:[%s2264_s28 + $0x254] sm:$0xf0]  ;;  %v1933_v21 = vld [vmem:[%s2264_s28 + $0x348] sm:$0xf]  ;;  %v1550_v23 = vor.u32 %v2036_v13, %v1549_v12  ;;  %v2114_v5 = vld [vmem:[%s2264_s28 + $0x2cc] sm:$0xf] }
  0x62   : > { %1160 = vmatpush.bf16.msra.mxu1 %v1758_v24  ;;  %1129 = vmatmul.bf16.vlgmr.msrb.gmra.mxu2 %v2366_v18  ;;  %v2132_v22 = vld [vmem:[%s2264_s28 + $0x354] sm:$0xf0]  ;;  %v1678_v24 = vor.u32 %v2068_v16, %v1677_v14  ;;  %v1533_v26 = vld [vmem:[%s2264_s28 + $0x28] sm:$0xf]  ;;  %v1871_v6 = vld [vmem:[%s2264_s28 + $0x2d8] sm:$0xf0] }
  0x63   : > { %1173 = vmatpush.bf16.msra.mxu2 %v1886_v25  ;;  %1142 = vmatmul.bf16.vlgmr.msrb.gmra.mxu3 %v2368_v19  ;;  %v1806_v25 = vor.u32 %v2100_v20, %v1805_v17  ;;  %v2032_v27 = vld [vmem:[%s2264_s28 + $0x34] sm:$0xf0]  ;;  %v1661_v28 = vld [vmem:[%s2264_s28 + $0x128] sm:$0xf]  ;;  %v2146_v7 = vld [vmem:[%s2264_s28 + $0x3cc] sm:$0xf] }
  0x64   : > { %1186 = vmatpush.bf16.msra.mxu3 %v2014_v29  ;;  %v1934_v29 = vor.u32 %v2132_v22, %v1933_v21  ;;  %v2064_v30 = vld [vmem:[%s2264_s28 + $0x134] sm:$0xf0]  ;;  %v1789_v31 = vld [vmem:[%s2264_s28 + $0x228] sm:$0xf]  ;;  %v1999_v8 = vld [vmem:[%s2264_s28 + $0x3d8] sm:$0xf0] }
  0x65   : > { %1148 = vmatpush.bf16.msra.mxu0 %v1614_v37  ;;  %v2096_v32 = vld [vmem:[%s2264_s28 + $0x234] sm:$0xf0]  ;;  %v1917_v35 = vld [vmem:[%s2264_s28 + $0x328] sm:$0xf]  ;;  %v1534_v37 = vor.u32 %v2032_v27, %v1533_v26  ;;  %v1662_v40 = vor.u32 %v2064_v30, %v1661_v28  ;;  %v2046_v12 = vld [vmem:[%s2264_s28 + $0xac] sm:$0xf] }
  0x66   : > { %1161 = vmatpush.bf16.msra.mxu1 %v1742_v38  ;;  %v2128_v36 = vld [vmem:[%s2264_s28 + $0x334] sm:$0xf0]  ;;  %v1517_v38 = vld [vmem:[%s2264_s28 + $0x8] sm:$0xf]  ;;  %v1790_v41 = vor.u32 %v2096_v32, %v1789_v31  ;;  %v1599_v13 = vld [vmem:[%s2264_s28 + $0xb8] sm:$0xf0] }
  0x67   : > { %1174 = vmatpush.bf16.msra.mxu2 %v1870_v39  ;;  %v2028_v39 = vld [vmem:[%s2264_s28 + $0x14] sm:$0xf0]  ;;  %v1645_v42 = vld [vmem:[%s2264_s28 + $0x108] sm:$0xf]  ;;  %v1918_v45 = vor.u32 %v2128_v36, %v1917_v35  ;;  %v2078_v14 = vld [vmem:[%s2264_s28 + $0x1ac] sm:$0xf] }
  0x68   : > { %1187 = vmatpush.bf16.msra.mxu3 %v1998_v43  ;;  %v2060_v43 = vld [vmem:[%s2264_s28 + $0x114] sm:$0xf0]  ;;  %v1773_v44 = vld [vmem:[%s2264_s28 + $0x208] sm:$0xf]  ;;  %v1518_v52 = vor.u32 %v2028_v39, %v1517_v38  ;;  %v1727_v16 = vld [vmem:[%s2264_s28 + $0x1b8] sm:$0xf0] }
  0x69   : > { %1149 = vmatpush.bf16.msra.mxu0 %v1598_v49  ;;  %v2092_v46 = vld [vmem:[%s2264_s28 + $0x214] sm:$0xf0]  ;;  %v1901_v47 = vld [vmem:[%s2264_s28 + $0x308] sm:$0xf]  ;;  %v2054_v49 = vld [vmem:[%s2264_s28 + $0xec] sm:$0xf]  ;;  %v1646_v56 = vor.u32 %v2060_v43, %v1645_v42 }
  0x6a   : > { %1162 = vmatpush.bf16.msra.mxu1 %v1726_v50  ;;  %v2124_v48 = vld [vmem:[%s2264_s28 + $0x314] sm:$0xf0]  ;;  %v1631_v50 = vld [vmem:[%s2264_s28 + $0xf8] sm:$0xf0]  ;;  %v1774_v57 = vor.u32 %v2092_v46, %v1773_v44  ;;  %v2110_v17 = vld [vmem:[%s2264_s28 + $0x2ac] sm:$0xf] }
  0x6b   : > { %1175 = vmatpush.bf16.msra.mxu2 %v1854_v51  ;;  %v2086_v51 = vld [vmem:[%s2264_s28 + $0x1ec] sm:$0xf]  ;;  %v1902_v60 = vor.u32 %v2124_v48, %v1901_v47  ;;  %v1855_v20 = vld [vmem:[%s2264_s28 + $0x2b8] sm:$0xf0] }
  0x6c   : > { %1188 = vmatpush.bf16.msra.mxu3 %v1982_v55  ;;  %v1887_v55 = vld [vmem:[%s2264_s28 + $0x2f8] sm:$0xf0]  ;;  %v2142_v21 = vld [vmem:[%s2264_s28 + $0x3ac] sm:$0xf] }
  0x6d   : > { %1150 = vmatpush.bf16.msra.mxu0 %v1582_v61  ;;  %v1634_v61 = vor.u32 %v2054_v49, %v1631_v50  ;;  %v1983_v22 = vld [vmem:[%s2264_s28 + $0x3b8] sm:$0xf0]  ;;  %v2042_v26 = vld [vmem:[%s2264_s28 + $0x8c] sm:$0xf] }
  0x6e   : > { %1163 = vmatpush.bf16.msra.mxu1 %v1710_v62  ;;  %v1762_v62 = vor.u32 %v2086_v51, %v1759_v53  ;;  %v1583_v27 = vld [vmem:[%s2264_s28 + $0x98] sm:$0xf0]  ;;  %v2074_v28 = vld [vmem:[%s2264_s28 + $0x18c] sm:$0xf] }
  0x6f   : > { %1176 = vmatpush.bf16.msra.mxu2 %v1838_v63  ;;  %v1890_v63 = vor.u32 %v2118_v54, %v1887_v55  ;;  %v1711_v30 = vld [vmem:[%s2264_s28 + $0x198] sm:$0xf0]  ;;  %v2106_v31 = vld [vmem:[%s2264_s28 + $0x28c] sm:$0xf] }
  0x70   : > { %1189 = vmatpush.bf16.msra.mxu3 %v1966_v3  ;;  %v2018_v3 = vor.u32 %v2150_v58, %v2015_v59  ;;  %v1839_v32 = vld [vmem:[%s2264_s28 + $0x298] sm:$0xf0]  ;;  %v2138_v35 = vld [vmem:[%s2264_s28 + $0x38c] sm:$0xf]  ;;  %v1714_v38 = vor.u32 %v2074_v28, %v1711_v30 }
  0x71   : > { %1151 = vmatpush.bf16.msra.mxu0 %v1566_v9  ;;  %v1618_v9 = vor.u32 %v2050_v0, %v1615_v1  ;;  %v1967_v36 = vld [vmem:[%s2264_s28 + $0x398] sm:$0xf0]  ;;  %v1842_v39 = vor.u32 %v2106_v31, %v1839_v32  ;;  %v2070_v42 = vld [vmem:[%s2264_s28 + $0x16c] sm:$0xf] }
  0x72   : > { %1164 = vmatpush.bf16.msra.mxu1 %v1694_v10  ;;  %v1746_v10 = vor.u32 %v2082_v2, %v1743_v4  ;;  %v1970_v43 = vor.u32 %v2138_v35, %v1967_v36  ;;  %v1695_v44 = vld [vmem:[%s2264_s28 + $0x178] sm:$0xf0]  ;;  %v2134_v47 = vld [vmem:[%s2264_s28 + $0x36c] sm:$0xf]  ;;  %v255_v35 = vld [vmem:[#allocation2 + $0x10] sm:$0xff] }
  0x73   : > { %1177 = vmatpush.bf16.msra.mxu2 %v1822_v11  ;;  %v1874_v11 = vor.u32 %v2114_v5, %v1871_v6  ;;  %v1823_v46 = vld [vmem:[%s2264_s28 + $0x278] sm:$0xf0]  ;;  %v1698_v50 = vor.u32 %v2070_v42, %v1695_v44  ;;  %v2066_v54 = vld [vmem:[%s2264_s28 + $0x14c] sm:$0xf]  ;;  %v256_v44 = vld [vmem:[#allocation2] sm:$0xff] }
  0x74   : > { %1190 = vmatpush.bf16.msra.mxu3 %v1950_v15  ;;  %v2002_v15 = vor.u32 %v2146_v7, %v1999_v8  ;;  %v1951_v48 = vld [vmem:[%s2264_s28 + $0x378] sm:$0xf0]  ;;  %v2130_v59 = vld [vmem:[%s2264_s28 + $0x34c] sm:$0xf] }
  0x75   : > { %1152 = vmatpush.bf16.msra.mxu0 %v1550_v23  ;;  %v1602_v23 = vor.u32 %v2046_v12, %v1599_v13  ;;  %v1551_v53 = vld [vmem:[%s2264_s28 + $0x58] sm:$0xf0]  ;;  %v1954_v55 = vor.u32 %v2134_v47, %v1951_v48  ;;  %v2030_v0 = vld [vmem:[%s2264_s28 + $0x2c] sm:$0xf] }
  0x76   : > { %1165 = vmatpush.bf16.msra.mxu1 %v1678_v24  ;;  %v1730_v24 = vor.u32 %v2078_v14, %v1727_v16  ;;  %v1807_v58 = vld [vmem:[%s2264_s28 + $0x258] sm:$0xf0]  ;;  %v2062_v2 = vld [vmem:[%s2264_s28 + $0x12c] sm:$0xf] }
  0x77   : > { %1178 = vmatpush.bf16.msra.mxu2 %v1806_v25  ;;  %v1858_v25 = vor.u32 %v2110_v17, %v1855_v20  ;;  %v1535_v1 = vld [vmem:[%s2264_s28 + $0x38] sm:$0xf0]  ;;  %v2094_v5 = vld [vmem:[%s2264_s28 + $0x22c] sm:$0xf] }
  0x78   : > { %1191 = vmatpush.bf16.msra.mxu3 %v1934_v29  ;;  %v1986_v29 = vor.u32 %v2142_v21, %v1983_v22  ;;  %v1663_v4 = vld [vmem:[%s2264_s28 + $0x138] sm:$0xf0]  ;;  %v2126_v7 = vld [vmem:[%s2264_s28 + $0x32c] sm:$0xf] }
  0x79   : > { %1153 = vmatpush.bf16.msra.mxu0 %v1534_v37  ;;  %v1586_v37 = vor.u32 %v2042_v26, %v1583_v27  ;;  %v1791_v6 = vld [vmem:[%s2264_s28 + $0x238] sm:$0xf0]  ;;  %v2026_v12 = vld [vmem:[%s2264_s28 + $0xc] sm:$0xf] }
  0x7a   : > { %1166 = vmatpush.bf16.msra.mxu1 %v1662_v40  ;;  %v2038_v40 = vld [vmem:[%s2264_s28 + $0x6c] sm:$0xf]  ;;  %v1919_v8 = vld [vmem:[%s2264_s28 + $0x338] sm:$0xf0] }
  0x7b   : > { %1179 = vmatpush.bf16.msra.mxu2 %v1790_v41  ;;  %v1567_v41 = vld [vmem:[%s2264_s28 + $0x78] sm:$0xf0]  ;;  %v2058_v14 = vld [vmem:[%s2264_s28 + $0x10c] sm:$0xf] }
  0x7c   : > { %1192 = vmatpush.bf16.msra.mxu3 %v1918_v45  ;;  %v2102_v45 = vld [vmem:[%s2264_s28 + $0x26c] sm:$0xf]  ;;  %v1570_v49 = vor.u32 %v2038_v40, %v1567_v41  ;;  %v1519_v13 = vld [vmem:[%s2264_s28 + $0x18] sm:$0xf0] }
  0x7d   : > { %1154 = vmatpush.bf16.msra.mxu0 %v1518_v52  ;;  %v1826_v51 = vor.u32 %v2102_v45, %v1823_v46  ;;  %v2034_v52 = vld [vmem:[%s2264_s28 + $0x4c] sm:$0xf]  ;;  %v1647_v16 = vld [vmem:[%s2264_s28 + $0x118] sm:$0xf0] }
  0x7e   : > { %1167 = vmatpush.bf16.msra.mxu1 %v1646_v56  ;;  %v1679_v56 = vld [vmem:[%s2264_s28 + $0x158] sm:$0xf0]  ;;  %v2090_v17 = vld [vmem:[%s2264_s28 + $0x20c] sm:$0xf] }
  0x7f   : > { %1180 = vmatpush.bf16.msra.mxu2 %v1774_v57  ;;  %v2098_v57 = vld [vmem:[%s2264_s28 + $0x24c] sm:$0xf]  ;;  %v1775_v20 = vld [vmem:[%s2264_s28 + $0x218] sm:$0xf0] }
  0x80   : > { %1193 = vmatpush.bf16.msra.mxu3 %v1902_v60  ;;  %1155 = vmatmul.bf16.vlgmr.msra.gmra.mxu0 %v2378_v33  ;;  %v1935_v60 = vld [vmem:[%s2264_s28 + $0x358] sm:$0xf0]  ;;  %v2122_v21 = vld [vmem:[%s2264_s28 + $0x30c] sm:$0xf] }
  0x81   : > { %1199 = vmatpush.bf16.msrb.mxu0 %v1634_v61  ;;  %1168 = vmatmul.bf16.vlgmr.msra.gmra.mxu1 %v2380_v34  ;;  %v1554_v61 = vor.u32 %v2034_v52, %v1551_v53  ;;  %v1903_v22 = vld [vmem:[%s2264_s28 + $0x318] sm:$0xf0] }
  0x82   : > { %1212 = vmatpush.bf16.msrb.mxu1 %v1762_v62  ;;  %1181 = vmatmul.bf16.vlgmr.msra.gmra.mxu2 %v2366_v18  ;;  %v1682_v62 = vor.u32 %v2066_v54, %v1679_v56  ;;  %v1906_v26 = vor.u32 %v2122_v21, %v1903_v22 }
  0x83   : > { %1225 = vmatpush.bf16.msrb.mxu2 %v1890_v63  ;;  %1194 = vmatmul.bf16.vlgmr.msra.gmra.mxu3 %v2368_v19  ;;  %v1810_v63 = vor.u32 %v2098_v57, %v1807_v58  ;;  %v257_v57 = vld [vmem:[#allocation2 + $0x18] sm:$0xff] }
  0x84   : > { %1238 = vmatpush.bf16.msrb.mxu3 %v2018_v3  ;;  %v1938_v3 = vor.u32 %v2130_v59, %v1935_v60 }
  0x85   : > { %1200 = vmatpush.bf16.msrb.mxu0 %v1618_v9  ;;  %v1538_v9 = vor.u32 %v2030_v0, %v1535_v1 }
  0x86   : > { %1213 = vmatpush.bf16.msrb.mxu1 %v1746_v10  ;;  %v1666_v10 = vor.u32 %v2062_v2, %v1663_v4 }
  0x87   : > { %1226 = vmatpush.bf16.msrb.mxu2 %v1874_v11  ;;  %v1794_v11 = vor.u32 %v2094_v5, %v1791_v6 }
  0x88   : > { %1239 = vmatpush.bf16.msrb.mxu3 %v2002_v15  ;;  %v1922_v15 = vor.u32 %v2126_v7, %v1919_v8  ;;  %v258_v7 = vld [vmem:[#allocation2 + $0x8] sm:$0xff] }
  0x89   : > { %1201 = vmatpush.bf16.msrb.mxu0 %v1602_v23  ;;  %v1522_v23 = vor.u32 %v2026_v12, %v1519_v13 }
  0x8a   : > { %1214 = vmatpush.bf16.msrb.mxu1 %v1730_v24  ;;  %v1650_v24 = vor.u32 %v2058_v14, %v1647_v16 }
  0x8b   : > { %1227 = vmatpush.bf16.msrb.mxu2 %v1858_v25  ;;  %v1778_v25 = vor.u32 %v2090_v17, %v1775_v20 }
  0x8c   : > { %1240 = vmatpush.bf16.msrb.mxu3 %v1986_v29 }
  0x8d   : > { %1202 = vmatpush.bf16.msrb.mxu0 %v1586_v37 }
  0x8e   : > { %1215 = vmatpush.bf16.msrb.mxu1 %v1714_v38 }
  0x8f   : > { %1228 = vmatpush.bf16.msrb.mxu2 %v1842_v39 }
  0x90   : > { %1241 = vmatpush.bf16.msrb.mxu3 %v1970_v43 }
  0x91   : > { %1203 = vmatpush.bf16.msrb.mxu0 %v1570_v49 }
  0x92   : > { %1216 = vmatpush.bf16.msrb.mxu1 %v1698_v50 }
  0x93   : > { %1229 = vmatpush.bf16.msrb.mxu2 %v1826_v51 }
  0x94   : > { %1242 = vmatpush.bf16.msrb.mxu3 %v1954_v55 }
  0x95   : > { %1204 = vmatpush.bf16.msrb.mxu0 %v1554_v61 }
  0x96   : > { %1217 = vmatpush.bf16.msrb.mxu1 %v1682_v62 }
  0x97   : > { %1230 = vmatpush.bf16.msrb.mxu2 %v1810_v63 }
  0x98   : > { %1243 = vmatpush.bf16.msrb.mxu3 %v1938_v3 }
  0x99   : > { %1205 = vmatpush.bf16.msrb.mxu0 %v1538_v9 }
  0x9a   : > { %1218 = vmatpush.bf16.msrb.mxu1 %v1666_v10 }
  0x9b   : > { %1231 = vmatpush.bf16.msrb.mxu2 %v1794_v11 }
  0x9c   : > { %1244 = vmatpush.bf16.msrb.mxu3 %v1922_v15 }
  0x9d   : > { %1206 = vmatpush.bf16.msrb.mxu0 %v1522_v23 }
  0x9e   : > { %1219 = vmatpush.bf16.msrb.mxu1 %v1650_v24 }
  0x9f   : > { %1232 = vmatpush.bf16.msrb.mxu2 %v1778_v25 }
  0xa0   : > { %1245 = vmatpush.bf16.msrb.mxu3 %v1906_v26  ;;  %1207 = vmatmul.bf16.vlgmr.msrb.gmra.mxu0 %v2378_v33 }
  0xa1   : > { %1220 = vmatmul.bf16.vlgmr.msrb.gmra.mxu1 %v2380_v34 }
  0xa2   : > { %1233 = vmatmul.bf16.vlgmr.msrb.gmra.mxu2 %v2366_v18 }
  0xa3   : > { %1246 = vmatmul.bf16.vlgmr.msrb.gmra.mxu3 %v2368_v19 }
  0xc5   : > { %v1065_v27 = vpop.f32.mrf.mxu1 }
  0xc6   : > { %v1091_v32 = vpop.f32.mrf.mxu3 }
  0xc7   : > { %v1052_v28 = vpop.f32.mrf.mxu0  ;;  %v1078_v30 = vpop.f32.mrf.mxu2 }
  0xc8   : > { %v1066_v29 = vadd.f32 %v1065_v27, %v1052_v28 }
  0xca   : > { %v1079_v31 = vadd.f32 %v1078_v30, %v1066_v29 }
  0xcc   : > { %v1092_v36 = vadd.f32 %v1091_v32, %v1079_v31 }
  0xcd   : > { %v1067_v37 = vpop.f32.mrf.mxu1 }
  0xce   : > { %v1251_v38 = vadd.f32 %v1092_v36, %v255_v35  ;;  %v1093_v40 = vpop.f32.mrf.mxu3 }
  0xcf   : > { %v1054_v39 = vpop.f32.mrf.mxu0  ;;  %v1080_v33 = vpop.f32.mrf.mxu2 }
  0xd0   : > { %1255 = vst [vmem:[#allocation2 + $0x10] sm:$0xff] %v1251_v38 }
  0xdd   : > { %v1104_v34 = vpop.f32.mrf.mxu0 }
  0xde   : > { %v1117_v41 = vpop.f32.mrf.mxu1 }
  0xdf   : > { %v1118_v18 = vadd.f32 %v1117_v41, %v1104_v34 }
  0xe5   : > { %v1130_v42 = vpop.f32.mrf.mxu2  ;;  %v1106_v46 = vpop.f32.mrf.mxu0 }
  0xe6   : > { %v1131_v19 = vadd.f32 %v1130_v42, %v1118_v18  ;;  %v1143_v43 = vpop.f32.mrf.mxu3  ;;  %v1119_v47 = vpop.f32.mrf.mxu1 }
  0xe8   : > { %v1144_v45 = vadd.f32 %v1143_v43, %v1131_v19 }
  0xea   : > { %v1252_v48 = vadd.f32 %v1144_v45, %v256_v44 }
  0xec   : > { %1256 = vst [vmem:[#allocation2] sm:$0xff] %v1252_v48 }
  0xed   : > { %v1132_v49 = vpop.f32.mrf.mxu2 }
  0xee   : > { %v1145_v50 = vpop.f32.mrf.mxu3 }
  0xfd   : > { %v1156_v51 = vpop.f32.mrf.mxu0 }
  0xfe   : > { %v1169_v52 = vpop.f32.mrf.mxu1 }
  0xff   : > { %v1170_v53 = vadd.f32 %v1169_v52, %v1156_v51 }
 0x105   : > { %v1182_v54 = vpop.f32.mrf.mxu2  ;;  %v1158_v59 = vpop.f32.mrf.mxu0 }
 0x106   : > { %v1183_v55 = vadd.f32 %v1182_v54, %v1170_v53  ;;  %v1195_v56 = vpop.f32.mrf.mxu3  ;;  %v1171_v60 = vpop.f32.mrf.mxu1 }
 0x108   : > { %v1196_v58 = vadd.f32 %v1195_v56, %v1183_v55 }
 0x10a   : > { %v1253_v61 = vadd.f32 %v1196_v58, %v257_v57 }
 0x10c   : > { %1257 = vst [vmem:[#allocation2 + $0x18] sm:$0xff] %v1253_v61 }
 0x10d   : > { %v1184_v62 = vpop.f32.mrf.mxu2 }
 0x10e   : > { %v1197_v63 = vpop.f32.mrf.mxu3 }
 0x11d   : > { %v1208_v0 = vpop.f32.mrf.mxu0 }
 0x11e   : > { %v1221_v1 = vpop.f32.mrf.mxu1 }
 0x11f   : > { %v1222_v2 = vadd.f32 %v1221_v1, %v1208_v0 }
 0x125   : > { %v1234_v3 = vpop.f32.mrf.mxu2  ;;  %v1210_v6 = vpop.f32.mrf.mxu0 }
 0x126   : > { %v1235_v4 = vadd.f32 %v1234_v3, %v1222_v2  ;;  %v1247_v5 = vpop.f32.mrf.mxu3  ;;  %v1223_v8 = vpop.f32.mrf.mxu1 }
 0x128   : > { %v1248_v9 = vadd.f32 %v1247_v5, %v1235_v4 }
 0x12a   : > { %v1254_v10 = vadd.f32 %v1248_v9, %v258_v7  ;;  %1262 = sbr.rel (%p2019_p9) target bundleno = 329 (0x149), region = 48 }
 0x12c   : > { %1258 = vst [vmem:[#allocation2 + $0x8] sm:$0xff] %v1254_v10 }
 0x12d   : > { %v1236_v11 = vpop.f32.mrf.mxu2 }
 0x12e   : > { %v1249_v12 = vpop.f32.mrf.mxu3 }
 0x12f   : > { %v1263_v13 = vld [vmem:[#allocation2 + $0x10] sm:$0xff]  ;;  %v1264_v14 = vld [vmem:[#allocation2] sm:$0xff]  ;;  %v1265_v15 = vld [vmem:[#allocation2 + $0x18] sm:$0xff]  ;;  %vm1309_vm1 = vcmask 1040384   ;;  %vm1311_vm2 = vcmask 1042434   ;;  %vm1313_vm3 = vcmask 1041408   ;;  %v1317_v1 = vlaneseq }
 0x130   : > { %1273 = vst [vmem:[%s2616_s4] sm:$0xff] %v1263_v13  ;;  %v1278_v16 = vrot.slane %v1263_v13, 4  ;;  %v1323_v17 = vmul.f32 %v1263_v13, %v1263_v13  ;;  %v1284_v20 = vrot.slane %v1264_v14, 4  ;;  %v1324_v21 = vmul.f32 %v1264_v14, %v1264_v14  ;;  %v1277_v8 = vld [vmem:[#allocation3] sm:$0xf] }
 0x131   : > { %1274 = vst [vmem:[%s2616_s4 + $0x8] sm:$0xff] %v1264_v14  ;;  %v1290_v23 = vrot.slane %v1265_v15, 4  ;;  %v1325_v24 = vmul.f32 %v1265_v15, %v1265_v15  ;;  %vm1319_vm4 = vcmp.lt.s32.totalorder %v1317_v1, 512 }
 0x132   : > { %v1279_v27 = vadd.f32 %v1278_v16, %v1263_v13  ;;  %v1327_v28 = vrot.slane %v1323_v17, 4  ;;  %v1285_v29 = vadd.f32 %v1284_v20, %v1264_v14  ;;  %v1333_v30 = vrot.slane %v1324_v21, 4  ;;  %1275 = vst [vmem:[%s2616_s4 + $0x10] sm:$0xff] %v1265_v15 }
 0x133   : > { %v1266_v22 = vld [vmem:[#allocation2 + $0x8] sm:$0xff]  ;;  %v1291_v31 = vadd.f32 %v1290_v23, %v1265_v15  ;;  %v1339_v32 = vrot.slane %v1325_v24, 4 }
 0x134   : > { %v1296_v25 = vrot.slane %v1266_v22, 4  ;;  %v1326_v26 = vmul.f32 %v1266_v22, %v1266_v22  ;;  %1276 = vst [vmem:[%s2616_s4 + $0x18] sm:$0xff] %v1266_v22  ;;  %v1280_v37 = vrot.slane %v1279_v27, 2  ;;  %v1328_v38 = vadd.f32 %v1327_v28, %v1323_v17  ;;  %v1322_v17 = vld [vmem:[#allocation4] sm:$0xf] }
 0x135   : > { %v1286_v39 = vrot.slane %v1285_v29, 2  ;;  %v1334_v33 = vadd.f32 %v1333_v30, %v1324_v21  ;;  %v1292_v40 = vrot.slane %v1291_v31, 2  ;;  %v1340_v34 = vadd.f32 %v1339_v32, %v1325_v24 }
 0x136   : > { %v1297_v35 = vadd.f32 %v1296_v25, %v1266_v22  ;;  %v1345_v36 = vrot.slane %v1326_v26, 4  ;;  %v1281_v42 = vadd.f32 %v1280_v37, %v1279_v27  ;;  %v1329_v19 = vrot.slane %v1328_v38, 2 }
 0x137   : > { %v1287_v43 = vadd.f32 %v1286_v39, %v1285_v29  ;;  %v1335_v44 = vrot.slane %v1334_v33, 2  ;;  %v1293_v45 = vadd.f32 %v1292_v40, %v1291_v31  ;;  %v1341_v46 = vrot.slane %v1340_v34, 2 }
 0x138   : > { %v1298_v41 = vrot.slane %v1297_v35, 2  ;;  %v1346_v18 = vadd.f32 %v1345_v36, %v1326_v26  ;;  %v1282_v49 = vrot.slane %v1281_v42, 1  ;;  %v1330_v50 = vadd.f32 %v1329_v19, %v1328_v38 }
 0x139   : > { %v1288_v51 = vrot.slane %v1287_v43, 1  ;;  %v1336_v52 = vadd.f32 %v1335_v44, %v1334_v33  ;;  %v1294_v53 = vrot.slane %v1293_v45, 1  ;;  %v1342_v54 = vadd.f32 %v1341_v46, %v1340_v34 }
 0x13a   : > { %v1299_v47 = vadd.f32 %v1298_v41, %v1297_v35  ;;  %v1347_v48 = vrot.slane %v1346_v18, 2  ;;  %v1283_v57 = vadd.f32 %v1282_v49, %v1281_v42  ;;  %v1331_v59 = vrot.slane %v1330_v50, 1 }
 0x13b   : > { %v1289_v58 = vadd.f32 %v1288_v51, %v1287_v43  ;;  %v1295_v60 = vadd.f32 %v1294_v53, %v1293_v45  ;;  %v1337_v62 = vrot.slane %v1336_v52, 1  ;;  %v1343_v63 = vrot.slane %v1342_v54, 1 }
 0x13c   : > { %v1300_v55 = vrot.slane %v1299_v47, 1  ;;  %v1348_v56 = vadd.f32 %v1347_v48, %v1346_v18  ;;  %v1332_v2 = vadd.f32 %v1331_v59, %v1330_v50 }
 0x13d   : > { %v1306_v0 = vrot.slane %v1289_v58, 7  ;;  %v1307_v4 = vrot.slane %v1295_v60, 6  ;;  %v1338_v6 = vadd.f32 %v1337_v62, %v1336_v52  ;;  %v1344_v7 = vadd.f32 %v1343_v63, %v1342_v54 }
 0x13e   : > { %v1301_v61 = vadd.f32 %v1300_v55, %v1299_v47  ;;  %v1349_v3 = vrot.slane %v1348_v56, 1 }
 0x13f   : > { %v1310_v9 = vsel %vm1309_vm1, %v1283_v57, %v1306_v0  ;;  %v1355_v12 = vrot.slane %v1338_v6, 7  ;;  %v1356_v13 = vrot.slane %v1344_v7, 6 }
 0x140   : > { %v1308_v5 = vrot.slane %v1301_v61, 5  ;;  %v1350_v10 = vadd.f32 %v1349_v3, %v1348_v56 }
 0x141   : > { %v1358_v20 = vsel %vm1309_vm1, %v1332_v2, %v1355_v12 }
 0x142   : > { %v1312_v11 = vsel %vm1311_vm2, %v1307_v4, %v1308_v5  ;;  %v1357_v15 = vrot.slane %v1350_v10, 5 }
 0x143   : > { %v1314_v14 = vsel %vm1313_vm3, %v1310_v9, %v1312_v11 }
 0x144   : > { %v1316_v16 = vadd.f32 %v1314_v14, %v1277_v8  ;;  %v1359_v21 = vsel %vm1311_vm2, %v1356_v13, %v1357_v15 }
 0x145   : > { %v1360_v22 = vsel %vm1313_vm3, %v1358_v20, %v1359_v21 }
 0x146   : > { %1321 = vst.msk [vmem:[#allocation3] sm:$0xf] %vm1319_vm4, %v1316_v16  ;;  %v1362_v23 = vadd.f32 %v1360_v22, %v1322_v17 }
 0x148   : > { %1363 = vst.msk [vmem:[#allocation4] sm:$0xf] %vm1319_vm4, %v1362_v23 }
 0x149 PF: > { %1367 = sbr.rel (!%p1259_p8) target bundleno = 379 (0x17b), region = 52  ;;  %v1375_v39 = vld [vmem:[%s2614_s2] sm:$0xf] (%p1259_p8)  ;;  %v1395_v42 = vld [vmem:[%s2616_s4 + $0x8] sm:$0xff] (%p1259_p8)  ;;  %v1396_v19 = vld [vmem:[%s2616_s4 + $0x10] sm:$0xff] (%p1259_p8) }
 0x14a   : > { %v1388_v41 = vld [vmem:[%s2615_s3] sm:$0xf] (%p1259_p8)  ;;  %v1397_v47 = vld [vmem:[%s2616_s4 + $0x18] sm:$0xff] (%p1259_p8) }
 0x14b   : > { %v1394_v18 = vld [vmem:[%s2616_s4] sm:$0xff] (%p1259_p8) }
 0x14d   : > { %v1368_v24 = vld [vmem:[#allocation3] sm:$0xf] (%p1259_p8) }
 0x14e   : > { %v1369_v26 = vmul.f32 0.5, %v1368_v24 }
 0x14f   : > { %v1370_v25 = vld [vmem:[#allocation4] sm:$0xf] }
 0x150   : > { %v1371_v27 = vmul.f32 0.5, %v1370_v25  ;;  %v1372_v28 = vmul.f32 %v1369_v26, %v1369_v26 }
 0x152   : > { %v1373_v29 = vsub.f32 %v1371_v27, %v1372_v28 }
 0x154   : > { %v1374_v30 = vmax.f32 %v1373_v29, 0.0 }
 0x156   : > { %v1376_v31 = vadd.f32 1e-05, %v1374_v30 }
 0x158   : > { %2180 = vrsqrt.f32 %v1376_v31  ;;  %vm1383_vm5 = vweird.f32 %v1376_v31 }
 0x15e   : > { %v2181_v32 = vpop.eup %2180 }
 0x15f   : > { %v1378_v35 = vmul.f32 %v2181_v32, %v1376_v31  ;;  %vm1384_vm6 = vweird.f32 %v2181_v32 }
 0x160   : > { %vm1385_vm7 = vmor %vm1383_vm5, %vm1384_vm6 }
 0x161   : > { %v1379_v36 = vmul.f32 %v2181_v32, %v1378_v35 }
 0x163   : > { %v1380_v37 = vmul.f32 0.5, %v1379_v36 }
 0x165   : > { %v1381_v38 = vsub.f32 1.5, %v1380_v37 }
 0x167   : > { %v1382_v33 = vmul.f32 %v2181_v32, %v1381_v38 }
 0x169   : > { %v1386_v40 = vsel %vm1385_vm7, %v2181_v32, %v1382_v33 }
 0x16a   : > { %v1387_v34 = vmul.f32 %v1386_v40, %v1375_v39 }
 0x16c   : > { %v1389_v43 = vmul.f32 %v1387_v34, %v1369_v26  ;;  %v1399_v44 = vperm.slane %v1387_v34, 0  ;;  %v1400_v45 = vperm.slane %v1387_v34, 1  ;;  %v1401_v46 = vperm.slane %v1387_v34, 2 }
 0x16d   : > { %v1402_v48 = vperm.slane %v1387_v34, 3 }
 0x16e   : > { %v1390_v49 = vsub.f32 %v1388_v41, %v1389_v43  ;;  %v1407_v50 = vmul.f32 %v1399_v44, %v1394_v18  ;;  %v1408_v51 = vmul.f32 %v1400_v45, %v1395_v42  ;;  %v1409_v52 = vmul.f32 %v1401_v46, %v1396_v19 }
 0x16f   : > { %v1410_v53 = vmul.f32 %v1402_v48, %v1397_v47 }
 0x170   : > { %v1412_v54 = vperm.slane %v1390_v49, 0  ;;  %v1413_v55 = vperm.slane %v1390_v49, 1  ;;  %v1414_v56 = vperm.slane %v1390_v49, 2  ;;  %v1415_v57 = vperm.slane %v1390_v49, 3 }
 0x172   : > { %v1420_v58 = vadd.f32 %v1412_v54, %v1407_v50  ;;  %v1421_v59 = vadd.f32 %v1413_v55, %v1408_v51  ;;  %v1422_v60 = vadd.f32 %v1414_v56, %v1409_v52  ;;  %v1423_v61 = vadd.f32 %v1415_v57, %v1410_v53 }
 0x174   : > { %vm1424_vm8 = vcmp.ge.f32.partialorder %v1420_v58, 0.0  ;;  %v1428_v62 = vmul.f32 0.2, %v1420_v58  ;;  %vm1425_vm9 = vcmp.ge.f32.partialorder %v1421_v59, 0.0  ;;  %v1429_v63 = vmul.f32 0.2, %v1421_v59 }
 0x175   : > { %vm1426_vm10 = vcmp.ge.f32.partialorder %v1422_v60, 0.0  ;;  %v1430_v0 = vmul.f32 0.2, %v1422_v60  ;;  %vm1427_vm11 = vcmp.ge.f32.partialorder %v1423_v61, 0.0  ;;  %v1431_v1 = vmul.f32 0.2, %v1423_v61 }
 0x176   : > { %v1432_v2 = vsel %vm1424_vm8, %v1420_v58, %v1428_v62  ;;  %v1433_v3 = vsel %vm1425_vm9, %v1421_v59, %v1429_v63 }
 0x177   : > { %1436 = vst [vmem:[%s2616_s4] sm:$0xff] %v1432_v2  ;;  %v1434_v4 = vsel %vm1426_vm10, %v1422_v60, %v1430_v0  ;;  %v1435_v5 = vsel %vm1427_vm11, %v1423_v61, %v1431_v1 }
 0x178   : > { %1437 = vst [vmem:[%s2616_s4 + $0x8] sm:$0xff] %v1433_v3 }
 0x179   : > { %1438 = vst [vmem:[%s2616_s4 + $0x10] sm:$0xff] %v1434_v4 }
 0x17a   : > { %1439 = vst [vmem:[%s2616_s4 + $0x18] sm:$0xff] %v1435_v5 }
 0x17b PF: > { %s14_s17 = sadd.s32 1, %s2204_s17   ;;  %s2617_s15 = smov %s2200_s16 }
 0x17c   : > { %p11_p10 = scmp.ge.s32.totalorder %s14_s17, 10   ;;  %s2618_s16 = smov %s2620_s18 }
 0x17e   :  { %13 = sbr.rel (!%p11_p10) target bundleno = 2 (0x2), region = 83 }

// kernel: discriminator_forward.9
= control target key start
LH: loop header
LB: loop body
LE: loop exit
PB: predicated region body
PF: predicated region fallthrough
CT: control target
= control target key end

     0   :  { %s883_s12 = smov 0   ;;  %s885_s13 = smov 0   ;;  %s966_s0 = inlined_call_operand.vmem [shape: bf16[8,8192], index: 0, kind: input, shape index: {}]   ;;  %s967_s1 = inlined_call_operand.vmem [shape: bf16[8192,128], index: 1, kind: input, shape index: {}]   ;;  %s968_s2 = inlined_call_operand.vmem [shape: f32[1,128], index: 2, kind: input, shape index: {}]   ;;  %s969_s3 = inlined_call_operand.vmem [shape: f32[8,128], index: 3, kind: output, shape index: {}]  }
   0x1   :  { %s887_s14 = smov 0  }
   0x2 LB: > { %s22_s15 = sadd.s32 1, %s856_s13  ;;  %p642_p0 = scmp.ge.s32.totalorder %s860_s14, 1  ;;  %s860_s14 = sphi %s887_s14, %s13_s14   ;;  %s856_s13 = sphi %s885_s13, %s971_s13   ;;  %s852_s12 = sphi %s883_s12, %s970_s12  }
   0x3   : > { %p23_p1 = scmp.ge.s32.totalorder %s22_s15, 16  ;;  %p167_p2 = scmp.lt.s32.totalorder %s860_s14, 17 }
   0x5   : > { %s973_s15 = smov (%p23_p1, %s22_s15), 0  ;;  %p168_p3 = pnand %p642_p0, %p167_p2 }
   0x6   : > { %s643_s16 = sshll.u32 (!%p168_p3), %s852_s12, 2  ;;  %s645_s17 = sshll.u32 (!%p168_p3), %s852_s12, 6 }
   0x7   : > { %171 = sbr.rel (%p168_p3) target bundleno = 205 (0xcd), region = 32  ;;  %p202_p4 = scmp.lt.s32.totalorder (!%p168_p3), %s643_s16, 63 }
   0x8   : > { %p210_p5 = scmp.lt.s32.totalorder (!%p168_p3), %s645_s17, 1023  ;;  %p647_p6 = scmp.ne.s32.totalorder (!%p168_p3), %s852_s12, 0 }
   0xc   : > { %s975_s16 = smov (!%p202_p4, %s643_s16), 63  ;;  %s977_s17 = smov (!%p210_p5, %s645_s17), 1023 }
   0xd   : > { %s644_s18 = sshll.u32 %s975_s16, 2  ;;  %s646_s22 = sshll.u32 %s977_s17, 2 }
   0xe   : > { %s908_s21 = scalar_lea.vmem %s966_s0, %s644_s18  ;;  %s913_s25 = scalar_lea.vmem %s967_s1, %s646_s22 }
   0xf   : > { %222 = sbr.rel (%p647_p6) target bundleno = 22 (0x16), region = 36 }
  0x14   : > { %v862_v0 = vmov 0.0  }
  0x15   : > { %223 = vst [vmem:[#allocation2] sm:$0xff] %v862_v0 }
  0x16 PF: > { %v787_v1 = vld [vmem:[%s913_s25 + $0x38] sm:$0xff]  ;;  %v786_v5 = vld [vmem:[%s913_s25 + $0x30] sm:$0xff]  ;;  %v785_v9 = vld [vmem:[%s913_s25 + $0x28] sm:$0xff]  ;;  %p776_p7 = scmp.ne.s32.totalorder %s852_s12, 15 }
  0x17   : > { %v795_v2 = vld [vmem:[%s913_s25 + $0x78] sm:$0xff]  ;;  %497 = vmatpush.bf16.msra.mxu0 %v787_v1  ;;  %v794_v6 = vld [vmem:[%s913_s25 + $0x70] sm:$0xff]  ;;  %v793_v10 = vld [vmem:[%s913_s25 + $0x68] sm:$0xff] }
  0x18   : > { %v803_v3 = vld [vmem:[%s913_s25 + $0xb8] sm:$0xff]  ;;  %510 = vmatpush.bf16.msra.mxu1 %v795_v2  ;;  %v802_v7 = vld [vmem:[%s913_s25 + $0xb0] sm:$0xff]  ;;  %v801_v11 = vld [vmem:[%s913_s25 + $0xa8] sm:$0xff] }
  0x19   : > { %v811_v4 = vld [vmem:[%s913_s25 + $0xf8] sm:$0xff]  ;;  %523 = vmatpush.bf16.msra.mxu2 %v803_v3  ;;  %v810_v8 = vld [vmem:[%s913_s25 + $0xf0] sm:$0xff]  ;;  %v809_v12 = vld [vmem:[%s913_s25 + $0xe8] sm:$0xff] }
  0x1a   : > { %536 = vmatpush.bf16.msra.mxu3 %v811_v4  ;;  %v784_v13 = vld [vmem:[%s913_s25 + $0x20] sm:$0xff]  ;;  %v783_v17 = vld [vmem:[%s913_s25 + $0x18] sm:$0xff]  ;;  %v782_v21 = vld [vmem:[%s913_s25 + $0x10] sm:$0xff] }
  0x1b   : > { %498 = vmatpush.bf16.msra.mxu0 %v786_v5  ;;  %v792_v14 = vld [vmem:[%s913_s25 + $0x60] sm:$0xff]  ;;  %v791_v18 = vld [vmem:[%s913_s25 + $0x58] sm:$0xff]  ;;  %v790_v22 = vld [vmem:[%s913_s25 + $0x50] sm:$0xff] }
  0x1c   : > { %511 = vmatpush.bf16.msra.mxu1 %v794_v6  ;;  %v800_v15 = vld [vmem:[%s913_s25 + $0xa0] sm:$0xff]  ;;  %v799_v19 = vld [vmem:[%s913_s25 + $0x98] sm:$0xff]  ;;  %v798_v23 = vld [vmem:[%s913_s25 + $0x90] sm:$0xff] }
  0x1d   : > { %524 = vmatpush.bf16.msra.mxu2 %v802_v7  ;;  %v808_v16 = vld [vmem:[%s913_s25 + $0xe0] sm:$0xff]  ;;  %v807_v20 = vld [vmem:[%s913_s25 + $0xd8] sm:$0xff]  ;;  %v806_v24 = vld [vmem:[%s913_s25 + $0xd0] sm:$0xff] }
  0x1e   : > { %537 = vmatpush.bf16.msra.mxu3 %v810_v8  ;;  %v781_v25 = vld [vmem:[%s913_s25 + $0x8] sm:$0xff]  ;;  %v225_v27 = vld [vmem:[%s908_s21] sm:$0xff] }
  0x1f   : > { %499 = vmatpush.bf16.msra.mxu0 %v785_v9  ;;  %v789_v26 = vld [vmem:[%s913_s25 + $0x48] sm:$0xff]  ;;  %v293_v31 = vunpack.c.l.b16 %v225_v27  ;;  %v294_v32 = vunpack.c.h.b16 %v225_v27  ;;  %v780_v33 = vld [vmem:[%s913_s25] sm:$0xff] }
  0x20   : > { %512 = vmatpush.bf16.msra.mxu1 %v793_v10  ;;  %v797_v28 = vld [vmem:[%s913_s25 + $0x88] sm:$0xff]  ;;  %v788_v34 = vld [vmem:[%s913_s25 + $0x40] sm:$0xff] }
  0x21   : > { %525 = vmatpush.bf16.msra.mxu2 %v801_v11  ;;  %v805_v29 = vld [vmem:[%s913_s25 + $0xc8] sm:$0xff]  ;;  %v796_v37 = vld [vmem:[%s913_s25 + $0x80] sm:$0xff]  ;;  %v297_v39 = vpack.c.b16 %v293_v31, %v293_v31  ;;  %v298_v40 = vpack.c.b16 %v294_v32, %v294_v32 }
  0x22   : > { %538 = vmatpush.bf16.msra.mxu3 %v809_v12  ;;  %v226_v30 = vld [vmem:[%s908_s21 + $0x8] sm:$0xff]  ;;  %v804_v38 = vld [vmem:[%s913_s25 + $0xc0] sm:$0xff] }
  0x23   : > { %500 = vmatpush.bf16.msra.mxu0 %v784_v13  ;;  %v295_v35 = vunpack.c.l.b16 %v226_v30  ;;  %v296_v36 = vunpack.c.h.b16 %v226_v30  ;;  %v224_v51 = vld [vmem:[#allocation2] sm:$0xff] }
  0x24   : > { %513 = vmatpush.bf16.msra.mxu1 %v792_v14 }
  0x25   : > { %526 = vmatpush.bf16.msra.mxu2 %v800_v15  ;;  %v299_v41 = vpack.c.b16 %v295_v35, %v295_v35  ;;  %v300_v42 = vpack.c.b16 %v296_v36, %v296_v36 }
  0x26   : > { %539 = vmatpush.bf16.msra.mxu3 %v808_v16 }
  0x27   : > { %501 = vmatpush.bf16.msra.mxu0 %v783_v17 }
  0x28   : > { %514 = vmatpush.bf16.msra.mxu1 %v791_v18 }
  0x29   : > { %527 = vmatpush.bf16.msra.mxu2 %v799_v19 }
  0x2a   : > { %540 = vmatpush.bf16.msra.mxu3 %v807_v20 }
  0x2b   : > { %502 = vmatpush.bf16.msra.mxu0 %v782_v21 }
  0x2c   : > { %515 = vmatpush.bf16.msra.mxu1 %v790_v22 }
  0x2d   : > { %528 = vmatpush.bf16.msra.mxu2 %v798_v23 }
  0x2e   : > { %541 = vmatpush.bf16.msra.mxu3 %v806_v24 }
  0x2f   : > { %503 = vmatpush.bf16.msra.mxu0 %v781_v25 }
  0x30   : > { %516 = vmatpush.bf16.msra.mxu1 %v789_v26 }
  0x31   : > { %529 = vmatpush.bf16.msra.mxu2 %v797_v28 }
  0x32   : > { %542 = vmatpush.bf16.msra.mxu3 %v805_v29 }
  0x33   : > { %504 = vmatpush.bf16.msra.mxu0 %v780_v33 }
  0x34   : > { %517 = vmatpush.bf16.msra.mxu1 %v788_v34 }
  0x35   : > { %530 = vmatpush.bf16.msra.mxu2 %v796_v37 }
  0x36   : > { %543 = vmatpush.bf16.msra.mxu3 %v804_v38  ;;  %505 = vmatmul.bf16.vlgmr.msra.gmra.mxu0 %v297_v39 }
  0x37   : > { %518 = vmatmul.bf16.vlgmr.msra.gmra.mxu1 %v298_v40 }
  0x38   : > { %531 = vmatmul.bf16.vlgmr.msra.gmra.mxu2 %v299_v41 }
  0x39   : > { %544 = vmatmul.bf16.vlgmr.msra.gmra.mxu3 %v300_v42 }
  0xb3   : > { %v506_v43 = vpop.f32.mrf.mxu0 }
  0xb4   : > { %v519_v44 = vpop.f32.mrf.mxu1 }
  0xb5   : > { %v520_v45 = vadd.f32 %v519_v44, %v506_v43 }
  0xbb   : > { %v532_v46 = vpop.f32.mrf.mxu2  ;;  %v508_v49 = vpop.f32.mrf.mxu0 }
  0xbc   : > { %v545_v47 = vpop.f32.mrf.mxu3  ;;  %v533_v48 = vadd.f32 %v532_v46, %v520_v45  ;;  %v521_v50 = vpop.f32.mrf.mxu1 }
  0xbe   : > { %v546_v52 = vadd.f32 %v545_v47, %v533_v48 }
  0xc0   : > { %v549_v53 = vadd.f32 %v546_v52, %v224_v51  ;;  %554 = sbr.rel (%p776_p7) target bundleno = 205 (0xcd), region = 40 }
  0xc2   : > { %550 = vst [vmem:[#allocation2] sm:$0xff] %v549_v53 }
  0xc3   : > { %v534_v54 = vpop.f32.mrf.mxu2 }
  0xc4   : > { %v547_v55 = vpop.f32.mrf.mxu3 }
  0xc5   : > { %v837_v57 = vld [vmem:[%s968_s2] ss:$0 sm:$0xff] }
  0xc9   : > { %v555_v56 = vld [vmem:[#allocation2] sm:$0xff] }
  0xca   : > { %v560_v58 = vadd.f32 %v837_v57, %v555_v56 }
  0xcc   : > { %561 = vst [vmem:[%s969_s3] sm:$0xff] %v560_v58 }
  0xcd PF: > { %s13_s14 = sadd.s32 1, %s860_s14   ;;  %s970_s12 = smov %s856_s13 }
  0xce   : > { %p10_p8 = scmp.ge.s32.totalorder %s13_s14, 18   ;;  %s971_s13 = smov %s973_s15 }
  0xd0   :  { %12 = sbr.rel (!%p10_p8) target bundleno = 2 (0x2), region = 73 }

</bundles_post_ra>
